<compile_context>
chip_gen: v7x
topology: tpu7x:2x2x1
jax: 0.10.0
libtpu: 0.0.40
codegen_flags: <defaults>
</compile_context>

<pallas_src>
import jax
import jax.numpy as jnp
from jax.experimental import pallas as pl
from jax.experimental.pallas import tpu as pltpu

C_IN = 348        # conv2d103 input channels
C_OUT = 3712      # conv2d103 output == conv2d104 in/out channels
H = W = 7
P = H * W         # 49 spatial positions
TN = 512          # output-channel tile: 3712 = 7*512 + 128 -> masked overhang


# ---------------------------------------------------------------------------
# Kernels
# ---------------------------------------------------------------------------
def _gate_kernel(v_ref, w1t_ref, b1_ref, x_ref, y_ref):
    """Gate: y = x * sigmoid(v @ w1t + b1), emitted in bf16.

    v_ref   : [1, C_IN]      f32  (x324 squeezed)
    w1t_ref : [C_IN, C_OUT]  f32  (conv2d103 weight, pre-transposed)
    b1_ref  : [1, C_OUT]     f32
    x_ref   : [P, C_OUT]     f32  (x321 channels-last)
    y_ref   : [P, C_OUT]     bf16 output (feeds the bf16 MXU pass below)
    """
    z = jnp.dot(v_ref[...], w1t_ref[...],
                preferred_element_type=jnp.float32)          # [1, C_OUT]
    s = jax.nn.sigmoid(z + b1_ref[...])
    y_ref[...] = (x_ref[...] * s).astype(y_ref.dtype)


def _matmul_kernel(y_ref, w2t_ref, o_ref):
    """One output-channel tile of conv2d104:  o = y @ w2t_tile.

    y_ref   : [P, C_OUT]   bf16 (resident across all grid steps)
    w2t_ref : [C_OUT, TN]  bf16 column tile of pre-transposed conv2d104 weight
    o_ref   : [P, TN]      f32  output tile (lane-dense stores)
    """
    # Contraction dim is dim 1 of y and dim 0 of w2t (MXU-natural, no vxpose).
    o_ref[...] = jnp.dot(y_ref[...], w2t_ref[...],
                         preferred_element_type=jnp.float32)


# ---------------------------------------------------------------------------
# Weight prep (run ONCE at weight-load time, not per forward call)
# ---------------------------------------------------------------------------
def prepare_params(w1, b1, w2):
    """w1: [C_OUT,C_IN,1,1], b1: [C_OUT], w2: [C_OUT,C_OUT,1,1]."""
    w1t = w1.reshape(C_OUT, C_IN).astype(jnp.float32).T          # [C_IN, C_OUT]
    b1r = b1.reshape(1, C_OUT).astype(jnp.float32)
    # bf16 stream for the dominant weight read; cast first so the one-time
    # transpose moves half the bytes.
    w2t = w2.reshape(C_OUT, C_OUT).astype(jnp.bfloat16).T        # [C_in, C_out]
    # TODO(synk): fp8 w2 with per-channel scales would cut the v7x stream 4x
    # if the accuracy budget allows; not enabled here.
    return w1t, b1r, w2t


# ---------------------------------------------------------------------------
# Forward
# ---------------------------------------------------------------------------
def se_block_forward(x324, x321, w1t, b1r, w2t):
    """x324: [1,C_IN,1,1], x321: [1,C_OUT,H,W]  ->  [1,C_OUT,H,W] f32 (NCHW)."""
    v = x324.reshape(1, C_IN).astype(jnp.float32)
    x = x321.reshape(C_OUT, P).T.astype(jnp.float32)             # [P, C_OUT] (~0.7 MB)

    # --- Gate: tiny single-shot kernel (everything fits in VMEM) -----------
    y = pl.pallas_call(
        _gate_kernel,
        out_shape=jax.ShapeDtypeStruct((P, C_OUT), jnp.bfloat16),
        compiler_params=pltpu.CompilerParams(
            vmem_limit_bytes=32 * 1024 * 1024,
        ),
    )(v, w1t, b1r, x)

    # --- Main matmul: stream bf16 w2t column tiles, parallel grid ----------
    out_flat = pl.pallas_call(
        _matmul_kernel,
        out_shape=jax.ShapeDtypeStruct((P, C_OUT), jnp.float32),
        grid_spec=pltpu.PrefetchScalarGridSpec(
            num_scalar_prefetch=0,
            grid=(pl.cdiv(C_OUT, TN),),
            in_specs=[
                # y resident across all steps (same block every iteration).
                pl.BlockSpec((P, C_OUT), lambda j: (0, 0)),
                # w2t column tile; 3-deep buffering hides step bubbles.
                pl.BlockSpec((C_OUT, TN), lambda j: (0, j),
                             pipeline_mode=pl.Buffered(3)),
            ],
            out_specs=pl.BlockSpec((P, TN), lambda j: (0, j)),
        ),
        compiler_params=pltpu.CompilerParams(
            # No cross-iteration state anymore -> safe to shard across
            # v7x's two TensorCores.
            dimension_semantics=("parallel",),
            vmem_limit_bytes=32 * 1024 * 1024,
        ),
    )(y, w2t)

    return out_flat.T.reshape(1, C_OUT, H, W)


def reference_forward(x324, x321, w1, b1, w2):
    # Pure-JAX f32 reference matching the PyTorch module.
    v = x324.reshape(1, C_IN)
    z = v @ w1.reshape(C_OUT, C_IN).T + b1.reshape(1, C_OUT)
    s = jax.nn.sigmoid(z)                                        # [1, C_OUT]
    y = x321 * s.reshape(1, C_OUT, 1, 1)
    out = w2.reshape(C_OUT, C_OUT) @ y.reshape(C_OUT, P)
    return out.reshape(1, C_OUT, H, W)


# ---------------------------------------------------------------------------
if __name__ == "__main__":
    key = jax.random.PRNGKey(0)
    k_x321, k_x324, k_w1, k_b1, k_w2 = jax.random.split(key, 5)

    # Inputs (shapes implied by the module's forward).
    x321 = jax.random.normal(k_x321, (1, C_OUT, H, W), dtype=jnp.float32)
    x324 = jax.random.normal(k_x324, (1, C_IN, 1, 1), dtype=jnp.float32)

    # Deterministic Conv2d-style parameter init.
    w1 = jax.random.normal(k_w1, (C_OUT, C_IN, 1, 1), jnp.float32) / jnp.sqrt(C_IN)
    b1 = jax.random.normal(k_b1, (C_OUT,), jnp.float32) / jnp.sqrt(C_IN)
    w2 = jax.random.normal(k_w2, (C_OUT, C_OUT, 1, 1), jnp.float32) / jnp.sqrt(C_OUT)

    # One-time weight prep (transpose + bf16 cast), then the fused forward.
    w1t, b1r, w2t = prepare_params(w1, b1, w2)
    out = jax.block_until_ready(se_block_forward(x324, x321, w1t, b1r, w2t))
    ref = jax.block_until_ready(reference_forward(x324, x321, w1, b1, w2))

    assert out.shape == (1, C_OUT, H, W)
    # bf16 weight streaming with f32 accumulation: ~0.2-0.5% relative error
    # vs. the exact-f32 reference.
    assert jnp.allclose(out, ref, rtol=2e-2, atol=2e-2)

    print("KERNEL_OK")
</pallas_src>

<mosaic_0001>
module attributes {stable_mosaic.version = 11 : i64} {
  func.func @_gate_kernel(%arg0: memref<1x348xf32, #tpu.memory_space<vmem>>, %arg1: memref<348x3712xf32, #tpu.memory_space<vmem>>, %arg2: memref<1x3712xf32, #tpu.memory_space<vmem>>, %arg3: memref<49x3712xf32, #tpu.memory_space<vmem>>, %arg4: memref<49x3712xbf16, #tpu.memory_space<vmem>>) attributes {dimension_semantics = [], scalar_prefetch = 0 : i64, scratch_operands = 0 : i64, tpu.core_type = #tpu.core_type<tc>} {
    %c0 = arith.constant 0 : index
    %c0_0 = arith.constant 0 : index
    %0 = vector.load %arg0[%c0, %c0_0] : memref<1x348xf32, #tpu.memory_space<vmem>>, vector<1x348xf32>
    %c0_1 = arith.constant 0 : index
    %c0_2 = arith.constant 0 : index
    %1 = vector.load %arg1[%c0_1, %c0_2] : memref<348x3712xf32, #tpu.memory_space<vmem>>, vector<348x3712xf32>
    %cst = arith.constant dense<0.000000e+00> : vector<1x3712xf32>
    %2 = tpu.matmul %0, %1, %cst {dimension_numbers = #tpu.dot_dimension_numbers<[1], [0], [0], [1], [0, 0, 1, 1], [], []>} : vector<1x348xf32>, vector<348x3712xf32>, vector<1x3712xf32> -> vector<1x3712xf32>
    %c0_3 = arith.constant 0 : index
    %c0_4 = arith.constant 0 : index
    %3 = vector.load %arg2[%c0_3, %c0_4] : memref<1x3712xf32, #tpu.memory_space<vmem>>, vector<1x3712xf32>
    %4 = arith.addf %2, %3 : vector<1x3712xf32>
    %5 = arith.negf %4 : vector<1x3712xf32>
    %6 = math.exp %5 : vector<1x3712xf32>
    %cst_5 = arith.constant 1.000000e+00 : f32
    %7 = vector.broadcast %cst_5 : f32 to vector<1x3712xf32>
    %8 = arith.addf %7, %6 : vector<1x3712xf32>
    %9 = arith.divf %7, %8 : vector<1x3712xf32>
    %c0_6 = arith.constant 0 : index
    %c0_7 = arith.constant 0 : index
    %10 = vector.load %arg3[%c0_6, %c0_7] : memref<49x3712xf32, #tpu.memory_space<vmem>>, vector<49x3712xf32>
    %11 = vector.broadcast %9 : vector<1x3712xf32> to vector<49x3712xf32>
    %12 = arith.mulf %10, %11 : vector<49x3712xf32>
    %13 = arith.truncf %12 : vector<49x3712xf32> to vector<49x3712xbf16>
    %c0_8 = arith.constant 0 : index
    %c0_9 = arith.constant 0 : index
    %14 = vector.load %arg4[%c0_8, %c0_9] : memref<49x3712xbf16, #tpu.memory_space<vmem>>, vector<49x3712xbf16>
    tpu.vector_store %arg4[%c0_8, %c0_9], %13 {strides = array<i32>} : memref<49x3712xbf16, #tpu.memory_space<vmem>>, vector<49x3712xbf16>,
    return
  }
}

</mosaic_0001>

<bundles_post_ra>
// kernel: tpu_custom_call.1
= control target key start
LH: loop header
LB: loop body
LE: loop exit
PB: predicated region body
PF: predicated region fallthrough
CT: control target
= control target key end

     0   :  { %9 = vsyncpa [#allocation3], 0  ;;  %s8299_s0 = inlined_call_operand.hbm [shape: f32[1,348], index: 0, kind: input, shape index: {}]   ;;  %s8300_s1 = inlined_call_operand.hbm [shape: f32[348,3712], index: 1, kind: input, shape index: {}]   ;;  %s8301_s2 = inlined_call_operand.hbm [shape: f32[1,3712], index: 2, kind: input, shape index: {}]   ;;  %s8302_s3 = inlined_call_operand.hbm [shape: f32[49,3712], index: 3, kind: input, shape index: {}]   ;;  %s8303_s4 = inlined_call_operand.hbm [shape: bf16[49,3712], index: 4, kind: output, shape index: {}]  }
   0x1   :  { %10 = vsyncpa [#allocation6], 0 }
   0x2   :  { %11 = vsyncpa [#allocation9], 0 }
   0x3   :  { %12 = vsyncpa [#allocation4], 0  ;;  %s7208_s15 = smov [#allocation5]   ;;  %s7090_s19 = scalar_lea.hbm %s8300_s1, 163328 }
   0x4   :  { %s28_s16 = sshll.u32 %s7208_s15, 4  ;;  %p7091_p0 = scmp.ne.s32.totalorder %s8300_s1, %s7090_s19  ;;  %s29_s16 = int_to_ptr.vmem [resolvable:$true] %s28_s16 }
   0x5   :  { %p7094_p1 = scmp.lt.u32.totalorder %s7090_s19, %s8300_s1 }
   0x7   :  { %p7096_p2 = pnand %p7094_p1, %p7091_p0 }
   0x9   :  { %7099 = shalt.err (!%p7096_p2)
}
   0xa   :  { %s7100_s24 = scalar_lea.vmem %s29_s16, 163328  ;;  %p7105_p4 = scmp.lt.s32.totalorder %s29_s16, %s29_s16 }
   0xb   :  { %p7101_p3 = scmp.ne.s32.totalorder %s29_s16, %s7100_s24  ;;  %p7106_p5 = scmp.lt.s32.totalorder %s7100_s24, %s7100_s24 }
   0xd   :  { %p7107_p6 = por %p7106_p5, %p7105_p4 }
   0xf   :  { %p7108_p7 = pnand %p7107_p6, %p7101_p3 }
  0x11   :  { %7111 = shalt.err (!%p7108_p7)
}
  0x12   :  { %s7209_s25 = smov 3712   ;;  %s7210_s26 = smov 232  }
  0x13   :  { %34 = dma.hbm_to_vmem [thread:$0]  %s8300_s1, 163328, %s29_s16, [#allocation6], %s7209_s25, %s7209_s25, %s7210_s26  }
  0x14   :  { %s7211_s29 = smov [#allocation2]   ;;  %s7212_s5 = smov [#allocation7]  }
  0x15   :  { %s19_s30 = sshll.u32 %s7211_s29, 4  ;;  %s41_s6 = sshll.u32 %s7212_s5, 4  ;;  %s20_s30 = int_to_ptr.vmem [resolvable:$true] %s19_s30  ;;  %s42_s6 = int_to_ptr.vmem [resolvable:$true] %s41_s6 }
  0x16   :  { %s7112_s9 = scalar_lea.hbm %s8299_s0, 48 }
  0x17   :  { %p7113_p8 = scmp.ne.s32.totalorder %s8299_s0, %s7112_s9  ;;  %p7116_p9 = scmp.lt.u32.totalorder %s7112_s9, %s8299_s0 }
  0x19   :  { %p7118_p10 = pnand %p7116_p9, %p7113_p8 }
  0x1b   :  { %7121 = shalt.err (!%p7118_p10)
}
  0x1c   :  { %s7122_s1 = scalar_lea.vmem %s20_s30, 48  ;;  %s7126_s14 = scalar_lea.vmem %s20_s30, 64 }
  0x1d   :  { %p7123_p11 = scmp.ne.s32.totalorder %s20_s30, %s7122_s1  ;;  %p7127_p12 = scmp.lt.s32.totalorder %s20_s30, %s20_s30 }
  0x1e   :  { %p7128_p13 = scmp.lt.s32.totalorder %s7126_s14, %s7122_s1 }
  0x20   :  { %p7129_p0 = por %p7128_p13, %p7127_p12 }
  0x22   :  { %p7130_p1 = pnand %p7129_p0, %p7123_p11 }
  0x24   :  { %7133 = shalt.err (!%p7130_p1)
}
  0x25   :  { %22 = dma.hbm_to_vmem [thread:$0]  %s8299_s0, 48, %s20_s30, [#allocation3]  }
  0x26   :  { %s7134_s19 = scalar_lea.hbm %s8301_s2, 464 }
  0x27   :  { %p7135_p2 = scmp.ne.s32.totalorder %s8301_s2, %s7134_s19  ;;  %p7138_p3 = scmp.lt.u32.totalorder %s7134_s19, %s8301_s2 }
  0x29   :  { %p7140_p4 = pnand %p7138_p3, %p7135_p2 }
  0x2b   :  { %7143 = shalt.err (!%p7140_p4)
}
  0x2c   :  { %s7144_s24 = scalar_lea.vmem %s42_s6, 464  ;;  %s7148_s27 = scalar_lea.vmem %s42_s6, 480 }
  0x2d   :  { %p7145_p5 = scmp.ne.s32.totalorder %s42_s6, %s7144_s24  ;;  %p7149_p6 = scmp.lt.s32.totalorder %s42_s6, %s42_s6 }
  0x2e   :  { %p7150_p7 = scmp.lt.s32.totalorder %s7148_s27, %s7144_s24 }
  0x30   :  { %p7151_p8 = por %p7150_p7, %p7149_p6 }
  0x32   :  { %p7152_p9 = pnand %p7151_p8, %p7145_p5 }
  0x34   :  { %7155 = shalt.err (!%p7152_p9)
}
  0x35   :  { %44 = dma.hbm_to_vmem [thread:$0]  %s8301_s2, 464, %s42_s6, [#allocation6]  }
  0x36   :  { %s7213_s29 = smov [#allocation8]   ;;  %s7156_s8 = scalar_lea.hbm %s8302_s3, 25984 }
  0x37   :  { %s50_s30 = sshll.u32 %s7213_s29, 4  ;;  %p7157_p10 = scmp.ne.s32.totalorder %s8302_s3, %s7156_s8  ;;  %s51_s30 = int_to_ptr.vmem [resolvable:$true] %s50_s30 }
  0x38   :  { %p7160_p11 = scmp.lt.u32.totalorder %s7156_s8, %s8302_s3 }
  0x3a   :  { %p7162_p12 = pnand %p7160_p11, %p7157_p10 }
  0x3c   :  { %7165 = shalt.err (!%p7162_p12)
}
  0x3d   :  { %s7166_s13 = scalar_lea.vmem %s51_s30, 25984  ;;  %p7171_p0 = scmp.lt.s32.totalorder %s51_s30, %s51_s30 }
  0x3e   :  { %p7167_p13 = scmp.ne.s32.totalorder %s51_s30, %s7166_s13  ;;  %p7172_p1 = scmp.lt.s32.totalorder %s7166_s13, %s7166_s13 }
  0x40   :  { %p7173_p2 = por %p7172_p1, %p7171_p0 }
  0x42   :  { %p7174_p3 = pnand %p7173_p2, %p7167_p13 }
  0x44   :  { %7177 = shalt.err (!%p7174_p3)
}
  0x45   :  { %56 = dma.hbm_to_vmem [thread:$0]  %s8302_s3, 25984, %s51_s30, [#allocation9], %s7209_s25, %s7209_s25, %s7210_s26  }
  0x46   :  { %7200 = dma.done.wait [#allocation3], 48  }
  0x47   :  { %7201 = vsyncadd [#allocation3], 4294967248 }
  0x48   :  { %7202 = dma.done.wait [#allocation6], 163792  }
  0x49   :  { %7203 = vsyncadd [#allocation6], 4294803504 }
  0x4a   :  { %7204 = dma.done.wait [#allocation9], 25984  }
  0x4b   :  { %7205 = vsyncadd [#allocation9], 4294941312  ;;  %v71_v0 = vld [vmem:[#allocation5 + $0x8] sm:$0xff]  ;;  %v100_v1 = vld [vmem:[#allocation5 + $0xf0] sm:$0xff]  ;;  %vm1517_vm0 = vcmask 1043456   ;;  %vm7215_vm1 = vmmov 1  }
  0x4c   :  { %v73_v2 = vld [vmem:[#allocation5 + $0x18] sm:$0xff]  ;;  %v5593_v3 = vpack.c.bf16 %v100_v1, %v71_v0  ;;  %v102_v4 = vld [vmem:[#allocation5 + $0x100] sm:$0xff]  ;;  %v99_v6 = vld [vmem:[#allocation5 + $0xe8] sm:$0xff]  ;;  %vm1514_vm3 = vcmask 752640   ;;  %vm5164_vm4 = vcmask 1040384   ;;  %vm5167_vm6 = vcmask 1044484  }
  0x4d   :  { %v70_v5 = vld [vmem:[#allocation5] sm:$0xff]  ;;  %v5683_v7 = vpack.c.bf16 %v102_v4, %v73_v2  ;;  %v72_v9 = vld [vmem:[#allocation5 + $0x10] sm:$0xff]  ;;  %v101_v10 = vld [vmem:[#allocation5 + $0xf8] sm:$0xff]  ;;  %vm5165_vm5 = vsmask.f32 256  ;;  %vm7217_vm11 = vmmov 0  }
  0x4e   :  { %v5595_v8 = vpack.c.bf16 %v99_v6, %v70_v5  ;;  %v129_v11 = vld [vmem:[#allocation5 + $0x1d8] sm:$0xff]  ;;  %5594 = vmatprep.subr.bf16.mxu0 %v5593_v3  ;;  %v5685_v12 = vpack.c.bf16 %v101_v10, %v72_v9  ;;  %v158_v13 = vld [vmem:[#allocation5 + $0x2c0] sm:$0xff]  ;;  %v131_v14 = vld [vmem:[#allocation5 + $0x1e8] sm:$0xff]  ;;  %vm5168_vm7 = vsmask.f32 4352  ;;  %s7218_s3 = smov [#allocation10]  }
  0x4f   :  { %v160_v15 = vld [vmem:[#allocation5 + $0x2d0] sm:$0xff]  ;;  %5684 = vmatprep.subr.bf16.mxu1 %v5683_v7  ;;  %v5597_v16 = vpack.c.bf16 %v158_v13, %v129_v11  ;;  %v157_v19 = vld [vmem:[#allocation5 + $0x2b8] sm:$0xff]  ;;  %v130_v20 = vld [vmem:[#allocation5 + $0x1e0] sm:$0xff]  ;;  %s5221_s25 = sshll.u32 %s7218_s3, 4  ;;  %s5222_s25 = int_to_ptr.vmem [resolvable:$true] %s5221_s25 }
  0x50   :  { %5596 = vmatpush1.bf16.msra.mxu0 %v5595_v8  ;;  %v5687_v17 = vpack.c.bf16 %v160_v15, %v131_v14  ;;  %v128_v18 = vld [vmem:[#allocation5 + $0x1d0] sm:$0xff]  ;;  %5686 = vmatpush1.bf16.msra.mxu1 %v5685_v12  ;;  %v159_v22 = vld [vmem:[#allocation5 + $0x2c8] sm:$0xff]  ;;  %v189_v27 = vld [vmem:[#allocation5 + $0x3b8] sm:$0xff]  ;;  %s7178_s26 = scalar_lea.vmem %s5222_s25, 12992  ;;  %p7183_p5 = scmp.lt.s32.totalorder %s5222_s25, %s5222_s25 }
  0x51   :  { %v5599_v21 = vpack.c.bf16 %v157_v19, %v128_v18  ;;  %v187_v23 = vld [vmem:[#allocation5 + $0x3a8] sm:$0xff]  ;;  %v216_v24 = vld [vmem:[#allocation5 + $0x490] sm:$0xff]  ;;  %5598 = vmatprep.subr.bf16.mxu0 %v5597_v16  ;;  %v5689_v25 = vpack.c.bf16 %v159_v22, %v130_v20  ;;  %v218_v28 = vld [vmem:[#allocation5 + $0x4a0] sm:$0xff]  ;;  %p7179_p4 = scmp.ne.s32.totalorder %s5222_s25, %s7178_s26  ;;  %p7184_p6 = scmp.lt.s32.totalorder %s7178_s26, %s7178_s26 }
  0x52   :  { %5688 = vmatprep.subr.bf16.mxu1 %v5687_v17  ;;  %v5601_v26 = vpack.c.bf16 %v216_v24, %v187_v23  ;;  %v186_v29 = vld [vmem:[#allocation5 + $0x3a0] sm:$0xff]  ;;  %v5691_v30 = vpack.c.bf16 %v218_v28, %v189_v27  ;;  %v215_v31 = vld [vmem:[#allocation5 + $0x488] sm:$0xff]  ;;  %v188_v32 = vld [vmem:[#allocation5 + $0x3b0] sm:$0xff] }
  0x53   :  { %v217_v33 = vld [vmem:[#allocation5 + $0x498] sm:$0xff]  ;;  %v5603_v34 = vpack.c.bf16 %v215_v31, %v186_v29  ;;  %v274_v36 = vld [vmem:[#allocation5 + $0x660] sm:$0xff]  ;;  %v247_v37 = vld [vmem:[#allocation5 + $0x588] sm:$0xff]  ;;  %p7185_p7 = por %p7184_p6, %p7183_p5 }
  0x54   :  { %5600 = vmatpush1.bf16.msra.mxu0 %v5599_v21  ;;  %v245_v35 = vld [vmem:[#allocation5 + $0x578] sm:$0xff]  ;;  %5690 = vmatpush1.bf16.msra.mxu1 %v5689_v25  ;;  %v5693_v38 = vpack.c.bf16 %v217_v33, %v188_v32  ;;  %v276_v40 = vld [vmem:[#allocation5 + $0x670] sm:$0xff]  ;;  %v246_v44 = vld [vmem:[#allocation5 + $0x580] sm:$0xff] }
  0x55   :  { %5602 = vmatprep.subr.bf16.mxu0 %v5601_v26  ;;  %v5605_v39 = vpack.c.bf16 %v274_v36, %v245_v35  ;;  %v244_v41 = vld [vmem:[#allocation5 + $0x570] sm:$0xff]  ;;  %v273_v42 = vld [vmem:[#allocation5 + $0x658] sm:$0xff]  ;;  %5692 = vmatprep.subr.bf16.mxu1 %v5691_v30  ;;  %v5695_v43 = vpack.c.bf16 %v276_v40, %v247_v37  ;;  %v275_v45 = vld [vmem:[#allocation5 + $0x668] sm:$0xff]  ;;  %p7186_p8 = pnand %p7185_p7, %p7179_p4 }
  0x56   :  { %v303_v46 = vld [vmem:[#allocation5 + $0x748] sm:$0xff]  ;;  %v332_v47 = vld [vmem:[#allocation5 + $0x830] sm:$0xff]  ;;  %v305_v48 = vld [vmem:[#allocation5 + $0x758] sm:$0xff]  ;;  %v5607_v50 = vpack.c.bf16 %v273_v42, %v244_v41  ;;  %v5697_v51 = vpack.c.bf16 %v275_v45, %v246_v44 }
  0x57   :  { %v334_v49 = vld [vmem:[#allocation5 + $0x840] sm:$0xff]  ;;  %v5609_v52 = vpack.c.bf16 %v332_v47, %v303_v46  ;;  %v331_v54 = vld [vmem:[#allocation5 + $0x828] sm:$0xff]  ;;  %v304_v55 = vld [vmem:[#allocation5 + $0x750] sm:$0xff]  ;;  %v1351_v46 = vlaneseq }
  0x58   :  { %5604 = vmatpush1.bf16.msra.mxu0 %v5603_v34  ;;  %5694 = vmatpush1.bf16.msra.mxu1 %v5693_v38  ;;  %v302_v53 = vld [vmem:[#allocation5 + $0x740] sm:$0xff]  ;;  %v5699_v56 = vpack.c.bf16 %v334_v49, %v305_v48  ;;  %v333_v57 = vld [vmem:[#allocation5 + $0x838] sm:$0xff]  ;;  %v363_v60 = vld [vmem:[#allocation5 + $0x928] sm:$0xff] }
  0x59   :  { %5606 = vmatprep.subr.bf16.mxu0 %v5605_v39  ;;  %5696 = vmatprep.subr.bf16.mxu1 %v5695_v43  ;;  %v361_v58 = vld [vmem:[#allocation5 + $0x918] sm:$0xff]  ;;  %v390_v59 = vld [vmem:[#allocation5 + $0xa00] sm:$0xff]  ;;  %v392_v61 = vld [vmem:[#allocation5 + $0xa10] sm:$0xff]  ;;  %v5611_v62 = vpack.c.bf16 %v331_v54, %v302_v53  ;;  %v5701_v63 = vpack.c.bf16 %v333_v57, %v304_v55 }
  0x5a   :  { %v5613_v0 = vpack.c.bf16 %v390_v59, %v361_v58  ;;  %v360_v1 = vld [vmem:[#allocation5 + $0x910] sm:$0xff]  ;;  %v389_v2 = vld [vmem:[#allocation5 + $0x9f8] sm:$0xff]  ;;  %v362_v3 = vld [vmem:[#allocation5 + $0x920] sm:$0xff]  ;;  %v5703_v4 = vpack.c.bf16 %v392_v61, %v363_v60  ;;  %v7300_v59 = vshrl.u32 %v1351_v46, 7 }
  0x5b   :  { %v391_v5 = vld [vmem:[#allocation5 + $0xa08] sm:$0xff]  ;;  %v448_v7 = vld [vmem:[#allocation5 + $0xbd0] sm:$0xff]  ;;  %v421_v8 = vld [vmem:[#allocation5 + $0xaf8] sm:$0xff]  ;;  %v5615_v10 = vpack.c.bf16 %v389_v2, %v360_v1 }
  0x5c   :  { %5608 = vmatpush1.bf16.msra.mxu0 %v5607_v50  ;;  %5698 = vmatpush1.bf16.msra.mxu1 %v5697_v51  ;;  %v419_v6 = vld [vmem:[#allocation5 + $0xae8] sm:$0xff]  ;;  %v450_v9 = vld [vmem:[#allocation5 + $0xbe0] sm:$0xff]  ;;  %v5705_v11 = vpack.c.bf16 %v391_v5, %v362_v3  ;;  %v420_v15 = vld [vmem:[#allocation5 + $0xaf0] sm:$0xff]  ;;  %8345 = vst [vmem:[#allocation15_spill] sm:$0xff] %v7300_v59 }
  0x5d   :  { %5610 = vmatprep.subr.bf16.mxu0 %v5609_v52  ;;  %5700 = vmatprep.subr.bf16.mxu1 %v5699_v56  ;;  %v5617_v12 = vpack.c.bf16 %v448_v7, %v419_v6  ;;  %v418_v13 = vld [vmem:[#allocation5 + $0xae0] sm:$0xff]  ;;  %v447_v14 = vld [vmem:[#allocation5 + $0xbc8] sm:$0xff]  ;;  %v5707_v16 = vpack.c.bf16 %v450_v9, %v421_v8  ;;  %v449_v17 = vld [vmem:[#allocation5 + $0xbd8] sm:$0xff]  ;;  %v7303_v8 = vsub.s32 1, %v7300_v59 }
  0x5e   :  { %v477_v18 = vld [vmem:[#allocation5 + $0xcb8] sm:$0xff]  ;;  %v506_v19 = vld [vmem:[#allocation5 + $0xda0] sm:$0xff]  ;;  %v479_v20 = vld [vmem:[#allocation5 + $0xcc8] sm:$0xff]  ;;  %v5619_v22 = vpack.c.bf16 %v447_v14, %v418_v13  ;;  %v5709_v23 = vpack.c.bf16 %v449_v17, %v420_v15 }
  0x5f   :  { %v508_v21 = vld [vmem:[#allocation5 + $0xdb0] sm:$0xff]  ;;  %v5621_v24 = vpack.c.bf16 %v506_v19, %v477_v18  ;;  %v505_v26 = vld [vmem:[#allocation5 + $0xd98] sm:$0xff]  ;;  %v478_v27 = vld [vmem:[#allocation5 + $0xcc0] sm:$0xff]  ;;  %8346 = vst [vmem:[#allocation16_spill] sm:$0xff] %v7303_v8 }
  0x60   :  { %5612 = vmatpush1.bf16.msra.mxu0 %v5611_v62  ;;  %5702 = vmatpush1.bf16.msra.mxu1 %v5701_v63  ;;  %v476_v25 = vld [vmem:[#allocation5 + $0xcb0] sm:$0xff]  ;;  %v5711_v28 = vpack.c.bf16 %v508_v21, %v479_v20  ;;  %v507_v29 = vld [vmem:[#allocation5 + $0xda8] sm:$0xff]  ;;  %v537_v32 = vld [vmem:[#allocation5 + $0xe98] sm:$0xff] }
  0x61   :  { %5614 = vmatprep.subr.bf16.mxu0 %v5613_v0  ;;  %5704 = vmatprep.subr.bf16.mxu1 %v5703_v4  ;;  %v535_v30 = vld [vmem:[#allocation5 + $0xe88] sm:$0xff]  ;;  %v564_v31 = vld [vmem:[#allocation5 + $0xf70] sm:$0xff]  ;;  %v566_v33 = vld [vmem:[#allocation5 + $0xf80] sm:$0xff]  ;;  %v5623_v34 = vpack.c.bf16 %v505_v26, %v476_v25  ;;  %v5713_v35 = vpack.c.bf16 %v507_v29, %v478_v27 }
  0x62   :  { %v5625_v36 = vpack.c.bf16 %v564_v31, %v535_v30  ;;  %v534_v37 = vld [vmem:[#allocation5 + $0xe80] sm:$0xff]  ;;  %v563_v38 = vld [vmem:[#allocation5 + $0xf68] sm:$0xff]  ;;  %v536_v39 = vld [vmem:[#allocation5 + $0xe90] sm:$0xff]  ;;  %v5715_v40 = vpack.c.bf16 %v566_v33, %v537_v32 }
  0x63   :  { %v565_v41 = vld [vmem:[#allocation5 + $0xf78] sm:$0xff]  ;;  %v622_v43 = vld [vmem:[#allocation5 + $0x1140] sm:$0xff]  ;;  %v595_v44 = vld [vmem:[#allocation5 + $0x1068] sm:$0xff]  ;;  %v5627_v47 = vpack.c.bf16 %v563_v38, %v534_v37 }
  0x64   :  { %5616 = vmatpush1.bf16.msra.mxu0 %v5615_v10  ;;  %5706 = vmatpush1.bf16.msra.mxu1 %v5705_v11  ;;  %v593_v42 = vld [vmem:[#allocation5 + $0x1058] sm:$0xff]  ;;  %v624_v45 = vld [vmem:[#allocation5 + $0x1150] sm:$0xff]  ;;  %v5717_v48 = vpack.c.bf16 %v565_v41, %v536_v39  ;;  %v594_v52 = vld [vmem:[#allocation5 + $0x1060] sm:$0xff] }
  0x65   :  { %5618 = vmatprep.subr.bf16.mxu0 %v5617_v12  ;;  %5708 = vmatprep.subr.bf16.mxu1 %v5707_v16  ;;  %v5629_v49 = vpack.c.bf16 %v622_v43, %v593_v42  ;;  %v592_v50 = vld [vmem:[#allocation5 + $0x1050] sm:$0xff]  ;;  %v621_v51 = vld [vmem:[#allocation5 + $0x1138] sm:$0xff]  ;;  %v5719_v53 = vpack.c.bf16 %v624_v45, %v595_v44  ;;  %v623_v54 = vld [vmem:[#allocation5 + $0x1148] sm:$0xff] }
  0x66   :  { %v651_v55 = vld [vmem:[#allocation5 + $0x1228] sm:$0xff]  ;;  %v680_v56 = vld [vmem:[#allocation5 + $0x1310] sm:$0xff]  ;;  %v653_v57 = vld [vmem:[#allocation5 + $0x1238] sm:$0xff]  ;;  %v5631_v60 = vpack.c.bf16 %v621_v51, %v592_v50  ;;  %v5721_v61 = vpack.c.bf16 %v623_v54, %v594_v52 }
  0x67   :  { %v682_v58 = vld [vmem:[#allocation5 + $0x1320] sm:$0xff]  ;;  %v5633_v62 = vpack.c.bf16 %v680_v56, %v651_v55  ;;  %v679_v0 = vld [vmem:[#allocation5 + $0x1308] sm:$0xff]  ;;  %v652_v1 = vld [vmem:[#allocation5 + $0x1230] sm:$0xff] }
  0x68   :  { %5620 = vmatpush1.bf16.msra.mxu0 %v5619_v22  ;;  %5710 = vmatpush1.bf16.msra.mxu1 %v5709_v23  ;;  %v650_v63 = vld [vmem:[#allocation5 + $0x1220] sm:$0xff]  ;;  %v5723_v2 = vpack.c.bf16 %v682_v58, %v653_v57  ;;  %v681_v3 = vld [vmem:[#allocation5 + $0x1318] sm:$0xff]  ;;  %v711_v6 = vld [vmem:[#allocation5 + $0x1408] sm:$0xff] }
  0x69   :  { %5622 = vmatprep.subr.bf16.mxu0 %v5621_v24  ;;  %5712 = vmatprep.subr.bf16.mxu1 %v5711_v28  ;;  %v709_v4 = vld [vmem:[#allocation5 + $0x13f8] sm:$0xff]  ;;  %v738_v5 = vld [vmem:[#allocation5 + $0x14e0] sm:$0xff]  ;;  %v740_v7 = vld [vmem:[#allocation5 + $0x14f0] sm:$0xff]  ;;  %v5635_v9 = vpack.c.bf16 %v679_v0, %v650_v63  ;;  %v5725_v11 = vpack.c.bf16 %v681_v3, %v652_v1 }
  0x6a   :  { %v708_v10 = vld [vmem:[#allocation5 + $0x13f0] sm:$0xff]  ;;  %v5637_v12 = vpack.c.bf16 %v738_v5, %v709_v4  ;;  %v737_v13 = vld [vmem:[#allocation5 + $0x14d8] sm:$0xff]  ;;  %v710_v14 = vld [vmem:[#allocation5 + $0x1400] sm:$0xff]  ;;  %v5727_v16 = vpack.c.bf16 %v740_v7, %v711_v6  ;;  %v7314_v6 = vsub.s32 0, %v7300_v59 }
  0x6b   :  { %v739_v15 = vld [vmem:[#allocation5 + $0x14e8] sm:$0xff]  ;;  %v796_v18 = vld [vmem:[#allocation5 + $0x16b0] sm:$0xff]  ;;  %v7305_v19 = vld [vmem:[#allocation2] sm:$0x7]  ;;  %v5639_v23 = vpack.c.bf16 %v737_v13, %v708_v10 }
  0x6c   :  { %5624 = vmatpush1.bf16.msra.mxu0 %v5623_v34  ;;  %5714 = vmatpush1.bf16.msra.mxu1 %v5713_v35  ;;  %v767_v17 = vld [vmem:[#allocation5 + $0x15c8] sm:$0xff]  ;;  %v769_v20 = vld [vmem:[#allocation5 + $0x15d8] sm:$0xff]  ;;  %v798_v21 = vld [vmem:[#allocation5 + $0x16c0] sm:$0xff]  ;;  %v7309_v22 = vrot.slane %v7305_v19, %v7303_v8  ;;  %v5729_v24 = vpack.c.bf16 %v739_v15, %v710_v14  ;;  %8348 = vst [vmem:[#allocation18_spill] sm:$0xff] %v7314_v6 }
  0x6d   :  { %5626 = vmatprep.subr.bf16.mxu0 %v5625_v36  ;;  %5716 = vmatprep.subr.bf16.mxu1 %v5715_v40  ;;  %v5641_v25 = vpack.c.bf16 %v796_v18, %v767_v17  ;;  %v766_v26 = vld [vmem:[#allocation5 + $0x15c0] sm:$0xff]  ;;  %v795_v27 = vld [vmem:[#allocation5 + $0x16a8] sm:$0xff]  ;;  %v768_v28 = vld [vmem:[#allocation5 + $0x15d0] sm:$0xff]  ;;  %v5731_v29 = vpack.c.bf16 %v798_v21, %v769_v20  ;;  %v7318_v21 = vrot.slane %v7305_v19, %v7314_v6 }
  0x6e   :  { %8347 = vst [vmem:[#allocation17_spill] sm:$0xff] %v7309_v22  ;;  %v797_v30 = vld [vmem:[#allocation5 + $0x16b8] sm:$0xff]  ;;  %v854_v32 = vld [vmem:[#allocation5 + $0x1880] sm:$0xff]  ;;  %1669 = vmatprep.mubr.f32.mxu0 %v7309_v22  ;;  %v827_v33 = vld [vmem:[#allocation5 + $0x17a8] sm:$0xff]  ;;  %1811 = vmatprep.mubr.f32.mxu1 %v7309_v22  ;;  %v5643_v35 = vpack.c.bf16 %v795_v27, %v766_v26 }
  0x6f   :  { %v825_v31 = vld [vmem:[#allocation5 + $0x1798] sm:$0xff]  ;;  %v856_v34 = vld [vmem:[#allocation5 + $0x1890] sm:$0xff]  ;;  %v5733_v36 = vpack.c.bf16 %v797_v30, %v768_v28  ;;  %v826_v40 = vld [vmem:[#allocation5 + $0x17a0] sm:$0xff]  ;;  %8349 = vst [vmem:[#allocation19_spill] sm:$0xff] %v7318_v21 }
  0x70   :  { %5628 = vmatpush1.bf16.msra.mxu0 %v5627_v47  ;;  %5718 = vmatpush1.bf16.msra.mxu1 %v5717_v48  ;;  %v5645_v37 = vpack.c.bf16 %v854_v32, %v825_v31  ;;  %v824_v38 = vld [vmem:[#allocation5 + $0x1790] sm:$0xff]  ;;  %v853_v39 = vld [vmem:[#allocation5 + $0x1878] sm:$0xff]  ;;  %v5735_v41 = vpack.c.bf16 %v856_v34, %v827_v33  ;;  %v855_v42 = vld [vmem:[#allocation5 + $0x1888] sm:$0xff] }
  0x71   :  { %5630 = vmatprep.subr.bf16.mxu0 %v5629_v49  ;;  %5720 = vmatprep.subr.bf16.mxu1 %v5719_v53  ;;  %v883_v43 = vld [vmem:[#allocation5 + $0x1968] sm:$0xff]  ;;  %v912_v44 = vld [vmem:[#allocation5 + $0x1a50] sm:$0xff]  ;;  %v885_v45 = vld [vmem:[#allocation5 + $0x1978] sm:$0xff]  ;;  %v5647_v47 = vpack.c.bf16 %v853_v39, %v824_v38  ;;  %v5737_v48 = vpack.c.bf16 %v855_v42, %v826_v40 }
  0x72   :  { %v914_v46 = vld [vmem:[#allocation5 + $0x1a60] sm:$0xff]  ;;  %v5649_v49 = vpack.c.bf16 %v912_v44, %v883_v43  ;;  %v911_v51 = vld [vmem:[#allocation5 + $0x1a48] sm:$0xff]  ;;  %v884_v52 = vld [vmem:[#allocation5 + $0x1970] sm:$0xff] }
  0x73   :  { %v882_v50 = vld [vmem:[#allocation5 + $0x1960] sm:$0xff]  ;;  %v5739_v53 = vpack.c.bf16 %v914_v46, %v885_v45  ;;  %v913_v54 = vld [vmem:[#allocation5 + $0x1a58] sm:$0xff]  ;;  %v943_v57 = vld [vmem:[#allocation5 + $0x1b48] sm:$0xff] }
  0x74   :  { %5632 = vmatpush1.bf16.msra.mxu0 %v5631_v60  ;;  %5722 = vmatpush1.bf16.msra.mxu1 %v5721_v61  ;;  %v941_v55 = vld [vmem:[#allocation5 + $0x1b38] sm:$0xff]  ;;  %v970_v56 = vld [vmem:[#allocation5 + $0x1c20] sm:$0xff]  ;;  %v972_v58 = vld [vmem:[#allocation5 + $0x1c30] sm:$0xff]  ;;  %v5651_v60 = vpack.c.bf16 %v911_v51, %v882_v50  ;;  %v5741_v61 = vpack.c.bf16 %v913_v54, %v884_v52 }
  0x75   :  { %5634 = vmatprep.subr.bf16.mxu0 %v5633_v62  ;;  %5724 = vmatprep.subr.bf16.mxu1 %v5723_v2  ;;  %v5653_v62 = vpack.c.bf16 %v970_v56, %v941_v55  ;;  %v940_v63 = vld [vmem:[#allocation5 + $0x1b30] sm:$0xff]  ;;  %v969_v0 = vld [vmem:[#allocation5 + $0x1c18] sm:$0xff]  ;;  %v942_v1 = vld [vmem:[#allocation5 + $0x1b40] sm:$0xff]  ;;  %v5743_v2 = vpack.c.bf16 %v972_v58, %v943_v57 }
  0x76   :  { %v971_v3 = vld [vmem:[#allocation5 + $0x1c28] sm:$0xff]  ;;  %v1028_v5 = vld [vmem:[#allocation5 + $0x1df0] sm:$0xff]  ;;  %v1001_v7 = vld [vmem:[#allocation5 + $0x1d18] sm:$0xff]  ;;  %v5655_v10 = vpack.c.bf16 %v969_v0, %v940_v63 }
  0x77   :  { %v999_v4 = vld [vmem:[#allocation5 + $0x1d08] sm:$0xff]  ;;  %v998_v13 = vld [vmem:[#allocation5 + $0x1d00] sm:$0xff]  ;;  %v1000_v15 = vld [vmem:[#allocation5 + $0x1d10] sm:$0xff] }
  0x78   :  { %5636 = vmatpush1.bf16.msra.mxu0 %v5635_v9  ;;  %5726 = vmatpush1.bf16.msra.mxu1 %v5725_v11  ;;  %v1030_v9 = vld [vmem:[#allocation5 + $0x1e00] sm:$0xff]  ;;  %v5745_v11 = vpack.c.bf16 %v971_v3, %v942_v1  ;;  %v1027_v14 = vld [vmem:[#allocation5 + $0x1de8] sm:$0xff]  ;;  %v1029_v17 = vld [vmem:[#allocation5 + $0x1df8] sm:$0xff] }
  0x79   :  { %5638 = vmatprep.subr.bf16.mxu0 %v5637_v12  ;;  %5728 = vmatprep.subr.bf16.mxu1 %v5727_v16  ;;  %v5657_v12 = vpack.c.bf16 %v1028_v5, %v999_v4  ;;  %v5747_v16 = vpack.c.bf16 %v1030_v9, %v1001_v7  ;;  %v1057_v18 = vld [vmem:[#allocation5 + $0x1ed8] sm:$0xff]  ;;  %v1086_v20 = vld [vmem:[#allocation5 + $0x1fc0] sm:$0xff]  ;;  %v5749_v26 = vpack.c.bf16 %v1029_v17, %v1000_v15  ;;  %v1056_v28 = vld [vmem:[#allocation5 + $0x1ed0] sm:$0xff] }
  0x7a   :  { %v5661_v27 = vpack.c.bf16 %v1086_v20, %v1057_v18  ;;  %v1058_v30 = vld [vmem:[#allocation5 + $0x1ee0] sm:$0xff]  ;;  %v1087_v32 = vld [vmem:[#allocation5 + $0x1fc8] sm:$0xff]  ;;  %v1144_v34 = vld [vmem:[#allocation5 + $0x2190] sm:$0xff] }
  0x7b   :  { %v1115_v33 = vld [vmem:[#allocation5 + $0x20a8] sm:$0xff]  ;;  %v5753_v38 = vpack.c.bf16 %v1087_v32, %v1058_v30  ;;  %v1114_v40 = vld [vmem:[#allocation5 + $0x20a0] sm:$0xff]  ;;  %v1116_v42 = vld [vmem:[#allocation5 + $0x20b0] sm:$0xff] }
  0x7c   :  { %5640 = vmatpush1.bf16.msra.mxu0 %v5639_v23  ;;  %5730 = vmatpush1.bf16.msra.mxu1 %v5729_v24  ;;  %v1059_v23 = vld [vmem:[#allocation5 + $0x1ee8] sm:$0xff]  ;;  %v1088_v24 = vld [vmem:[#allocation5 + $0x1fd0] sm:$0xff]  ;;  %v5665_v39 = vpack.c.bf16 %v1144_v34, %v1115_v33  ;;  %v1145_v44 = vld [vmem:[#allocation5 + $0x2198] sm:$0xff] }
  0x7d   :  { %5642 = vmatprep.subr.bf16.mxu0 %v5641_v25  ;;  %5732 = vmatprep.subr.bf16.mxu1 %v5731_v29  ;;  %v5659_v25 = vpack.c.bf16 %v1027_v14, %v998_v13  ;;  %v1085_v29 = vld [vmem:[#allocation5 + $0x1fb8] sm:$0xff]  ;;  %v5751_v31 = vpack.c.bf16 %v1088_v24, %v1059_v23  ;;  %v1202_v46 = vld [vmem:[#allocation5 + $0x2360] sm:$0xff]  ;;  %v5757_v51 = vpack.c.bf16 %v1145_v44, %v1116_v42  ;;  %v1203_v57 = vld [vmem:[#allocation5 + $0x2368] sm:$0xff] }
  0x7e   :  { %v1173_v45 = vld [vmem:[#allocation5 + $0x2278] sm:$0xff]  ;;  %v1174_v55 = vld [vmem:[#allocation5 + $0x2280] sm:$0xff]  ;;  %v1231_v58 = vld [vmem:[#allocation5 + $0x2448] sm:$0xff] }
  0x7f   :  { %v5669_v52 = vpack.c.bf16 %v1202_v46, %v1173_v45  ;;  %v1201_v54 = vld [vmem:[#allocation5 + $0x2358] sm:$0xff]  ;;  %v5761_v0 = vpack.c.bf16 %v1203_v57, %v1174_v55  ;;  %v1259_v3 = vld [vmem:[#allocation5 + $0x2528] sm:$0xff]  ;;  %v1232_v4 = vld [vmem:[#allocation5 + $0x2450] sm:$0xff] }
  0x80   :  { %5644 = vmatpush1.bf16.msra.mxu0 %v5643_v35  ;;  %5734 = vmatpush1.bf16.msra.mxu1 %v5733_v36  ;;  %v1117_v35 = vld [vmem:[#allocation5 + $0x20b8] sm:$0xff]  ;;  %v1146_v36 = vld [vmem:[#allocation5 + $0x21a0] sm:$0xff]  ;;  %vm7324_vm2 = vmpackc.low %vm1517_vm0, %vm7215_vm1 }
  0x81   :  { %5646 = vmatprep.subr.bf16.mxu0 %v5645_v37  ;;  %5736 = vmatprep.subr.bf16.mxu1 %v5735_v41  ;;  %v5663_v37 = vpack.c.bf16 %v1085_v29, %v1056_v28  ;;  %v1143_v41 = vld [vmem:[#allocation5 + $0x2188] sm:$0xff]  ;;  %v5755_v43 = vpack.c.bf16 %v1146_v36, %v1117_v35  ;;  %v1261_v7 = vld [vmem:[#allocation5 + $0x2538] sm:$0xff]  ;;  %v1288_v17 = vld [vmem:[#allocation5 + $0x2610] sm:$0xff] }
  0x82   :  { %v5667_v50 = vpack.c.bf16 %v1143_v41, %v1114_v40  ;;  %v1289_v9 = vld [vmem:[#allocation5 + $0x2618] sm:$0xff]  ;;  %v5765_v15 = vpack.c.bf16 %v1261_v7, %v1232_v4  ;;  %v1290_v20 = vld [vmem:[#allocation5 + $0x2620] sm:$0xff]  ;;  %v1319_v24 = vld [vmem:[#allocation5 + $0x2708] sm:$0xf] }
  0x83   :  { %v1317_v18 = vld [vmem:[#allocation5 + $0x26f8] sm:$0xf]  ;;  %v106_v29 = vld [vmem:[#allocation5 + $0x120] sm:$0xff]  ;;  %v103_v34 = vld [vmem:[#allocation5 + $0x108] sm:$0xff] }
  0x84   :  { %5648 = vmatpush1.bf16.msra.mxu0 %v5647_v47  ;;  %5738 = vmatpush1.bf16.msra.mxu1 %v5737_v48  ;;  %v8304_v47 = vmov 0.0   ;;  %v1175_v48 = vld [vmem:[#allocation5 + $0x2288] sm:$0xff]  ;;  %v77_v28 = vld [vmem:[#allocation5 + $0x38] sm:$0xff]  ;;  %v5680_v30 = vpack.c.bf16 %v1317_v18, %v1288_v17  ;;  %v74_v33 = vld [vmem:[#allocation5 + $0x20] sm:$0xff] }
  0x85   :  { %5650 = vmatprep.subr.bf16.mxu0 %v5649_v49  ;;  %5740 = vmatprep.subr.bf16.mxu1 %v5739_v53  ;;  %v1204_v49 = vld [vmem:[#allocation5 + $0x2370] sm:$0xff]  ;;  %v5863_v36 = vpack.c.bf16 %v106_v29, %v77_v28  ;;  %v135_v41 = vld [vmem:[#allocation5 + $0x208] sm:$0xff]  ;;  %v309_v17 = vld [vmem:[#allocation5 + $0x778] sm:$0xff] }
  0x86   :  { %v1172_v53 = vld [vmem:[#allocation5 + $0x2270] sm:$0xff]  ;;  %v5759_v56 = vpack.c.bf16 %v1204_v49, %v1175_v48  ;;  %v161_v48 = vld [vmem:[#allocation5 + $0x2d8] sm:$0xff]  ;;  %v134_v49 = vld [vmem:[#allocation5 + $0x200] sm:$0xff] }
  0x87   :  { %v5671_v63 = vpack.c.bf16 %v1201_v54, %v1172_v53  ;;  %v76_v35 = vld [vmem:[#allocation5 + $0x30] sm:$0xff]  ;;  %v193_v53 = vld [vmem:[#allocation5 + $0x3d8] sm:$0xff]  ;;  %v222_v54 = vld [vmem:[#allocation5 + $0x4c0] sm:$0xff] }
  0x88   :  { %5652 = vmatpush1.bf16.msra.mxu0 %v5651_v60  ;;  %5742 = vmatpush1.bf16.msra.mxu1 %v5741_v61  ;;  %v1260_v60 = vld [vmem:[#allocation5 + $0x2530] sm:$0xff]  ;;  %v1233_v61 = vld [vmem:[#allocation5 + $0x2458] sm:$0xff]  ;;  %v338_v18 = vld [vmem:[#allocation5 + $0x860] sm:$0xff] }
  0x89   :  { %5654 = vmatprep.subr.bf16.mxu0 %v5653_v62  ;;  %5744 = vmatprep.subr.bf16.mxu1 %v5743_v2  ;;  %v1262_v62 = vld [vmem:[#allocation5 + $0x2540] sm:$0xff]  ;;  %v5673_v1 = vpack.c.bf16 %v1260_v60, %v1231_v58  ;;  %v164_v42 = vld [vmem:[#allocation5 + $0x2f0] sm:$0xff]  ;;  %v219_v60 = vld [vmem:[#allocation5 + $0x4a8] sm:$0xff]  ;;  %v5879_v29 = vpack.c.bf16 %v338_v18, %v309_v17 }
  0x8a   :  { %v1230_v2 = vld [vmem:[#allocation5 + $0x2440] sm:$0xff]  ;;  %v5763_v5 = vpack.c.bf16 %v1262_v62, %v1233_v61  ;;  %v132_v46 = vld [vmem:[#allocation5 + $0x1f0] sm:$0xff]  ;;  %v5871_v62 = vpack.c.bf16 %v222_v54, %v193_v53  ;;  %vm7517_vm8 = vmand %vm5164_vm4, %vm5165_vm5 }
  0x8b   :  { %v5675_v13 = vpack.c.bf16 %v1259_v3, %v1230_v2  ;;  %v5779_v55 = vpack.c.bf16 %v161_v48, %v132_v46  ;;  %v190_v58 = vld [vmem:[#allocation5 + $0x3c0] sm:$0xff]  ;;  %v192_v61 = vld [vmem:[#allocation5 + $0x3d0] sm:$0xff]  ;;  %v251_v2 = vld [vmem:[#allocation5 + $0x5a8] sm:$0xff] }
  0x8c   :  { %5656 = vmatpush1.bf16.msra.mxu0 %v5655_v10  ;;  %5746 = vmatpush1.bf16.msra.mxu1 %v5745_v11  ;;  %v1318_v10 = vld [vmem:[#allocation5 + $0x2700] sm:$0xf]  ;;  %v1291_v11 = vld [vmem:[#allocation5 + $0x2628] sm:$0xff]  ;;  %v280_v3 = vld [vmem:[#allocation5 + $0x690] sm:$0xff]  ;;  %v5783_v4 = vpack.c.bf16 %v219_v60, %v190_v58 }
  0x8d   :  { %5658 = vmatprep.subr.bf16.mxu0 %v5657_v12  ;;  %5748 = vmatprep.subr.bf16.mxu1 %v5747_v16  ;;  %v1320_v12 = vld [vmem:[#allocation5 + $0x2710] sm:$0xf]  ;;  %v5677_v16 = vpack.c.bf16 %v1318_v10, %v1289_v9  ;;  %v277_v10 = vld [vmem:[#allocation5 + $0x678] sm:$0xff]  ;;  %v454_v48 = vld [vmem:[#allocation5 + $0xc00] sm:$0xff] }
  0x8e   :  { %v5767_v23 = vpack.c.bf16 %v1320_v12, %v1291_v11  ;;  %v248_v9 = vld [vmem:[#allocation5 + $0x590] sm:$0xff]  ;;  %v250_v11 = vld [vmem:[#allocation5 + $0x5a0] sm:$0xff]  ;;  %v5875_v12 = vpack.c.bf16 %v280_v3, %v251_v2  ;;  %v425_v46 = vld [vmem:[#allocation5 + $0xb18] sm:$0xff] }
  0x8f   :  { %1670 = vmatmul.mubr.f32.vlgmr.msra.gmra.mrb[0].mxu0 %v7318_v21  ;;  %1812 = vmatmul.mubr.f32.vlgmr.msra.gmra.mrb[0].mxu1 %v7318_v21  ;;  %v308_v28 = vld [vmem:[#allocation5 + $0x770] sm:$0xff]  ;;  %v5887_v54 = vpack.c.bf16 %v454_v48, %v425_v46  ;;  %v483_v58 = vld [vmem:[#allocation5 + $0xce8] sm:$0xff]  ;;  %v482_v2 = vld [vmem:[#allocation5 + $0xce0] sm:$0xff] }
  0x90   :  { %5660 = vmatpush1.bf16.msra.mxu0 %v5659_v25  ;;  %5750 = vmatpush1.bf16.msra.mxu1 %v5749_v26  ;;  %v75_v25 = vld [vmem:[#allocation5 + $0x28] sm:$0xff]  ;;  %v104_v26 = vld [vmem:[#allocation5 + $0x110] sm:$0xff]  ;;  %vm7533_vm9 = vmand %vm5167_vm6, %vm5168_vm7 }
  0x91   :  { %5662 = vmatprep.subr.bf16.mxu0 %v5661_v27  ;;  %5752 = vmatprep.subr.bf16.mxu1 %v5751_v31  ;;  %v7329_v27 = vsub.s32 2, %v7300_v59  ;;  %v5770_v31 = vpack.c.bf16 %v1319_v24, %v1290_v20  ;;  %v5773_v32 = vpack.c.bf16 %v104_v26, %v75_v25  ;;  %v5787_v20 = vpack.c.bf16 %v277_v10, %v248_v9  ;;  %v306_v25 = vld [vmem:[#allocation5 + $0x760] sm:$0xff]  ;;  %v335_v26 = vld [vmem:[#allocation5 + $0x848] sm:$0xff]  ;;  %v424_v53 = vld [vmem:[#allocation5 + $0xb10] sm:$0xff] }
  0x92   :  { %1740 = vmatprep.mubr.f32.mxu0 %v8304_v47  ;;  %1882 = vmatprep.mubr.f32.mxu1 %v8304_v47  ;;  %v512_v60 = vld [vmem:[#allocation5 + $0xdd0] sm:$0xff]  ;;  %v541_v9 = vld [vmem:[#allocation5 + $0xeb8] sm:$0xff]  ;;  %v570_v10 = vld [vmem:[#allocation5 + $0xfa0] sm:$0xff] }
  0x93   :  { %8352 = vst [vmem:[#allocation20_spill] sm:$0xff] %v7329_v27  ;;  %v7337_v40 = vrot.slane %v7305_v19, %v7329_v27  ;;  %v163_v19 = vld [vmem:[#allocation5 + $0x2e8] sm:$0xff]  ;;  %v5891_v3 = vpack.c.bf16 %v512_v60, %v483_v58  ;;  %v540_v17 = vld [vmem:[#allocation5 + $0xeb0] sm:$0xff]  ;;  %v5895_v18 = vpack.c.bf16 %v570_v10, %v541_v9  ;;  %v714_v58 = vld [vmem:[#allocation5 + $0x1420] sm:$0xff] }
  0x94   :  { %5664 = vmatpush1.bf16.msra.mxu0 %v5663_v37  ;;  %5754 = vmatpush1.bf16.msra.mxu1 %v5753_v38  ;;  %v105_v37 = vld [vmem:[#allocation5 + $0x118] sm:$0xff]  ;;  %v656_v46 = vld [vmem:[#allocation5 + $0x1250] sm:$0xff]  ;;  %vm7546_vm10 = vmor %vm7533_vm9, %vm7517_vm8 }
  0x95   :  { %5666 = vmatprep.subr.bf16.mxu0 %v5665_v39  ;;  %5756 = vmatprep.subr.bf16.mxu1 %v5755_v43  ;;  %v133_v38 = vld [vmem:[#allocation5 + $0x1f8] sm:$0xff]  ;;  %v162_v39 = vld [vmem:[#allocation5 + $0x2e0] sm:$0xff]  ;;  %8353 = vst [vmem:[#allocation21_spill] sm:$0xff] %v7337_v40  ;;  %v5775_v43 = vpack.c.bf16 %v103_v34, %v74_v33  ;;  %v5865_v44 = vpack.c.bf16 %v105_v37, %v76_v35  ;;  %v367_v33 = vld [vmem:[#allocation5 + $0x948] sm:$0xff] }
  0x96   :  { %v5777_v45 = vpack.c.bf16 %v162_v39, %v133_v38  ;;  %v396_v34 = vld [vmem:[#allocation5 + $0xa30] sm:$0xff]  ;;  %v5791_v35 = vpack.c.bf16 %v335_v26, %v306_v25  ;;  %v393_v39 = vld [vmem:[#allocation5 + $0xa18] sm:$0xff]  ;;  %v599_v25 = vld [vmem:[#allocation5 + $0x1088] sm:$0xff] }
  0x97   :  { %v364_v38 = vld [vmem:[#allocation5 + $0x930] sm:$0xff] }
  0x98   :  { %5668 = vmatpush1.bf16.msra.mxu0 %v5667_v50  ;;  %5758 = vmatpush1.bf16.msra.mxu1 %v5757_v51  ;;  %v5867_v50 = vpack.c.bf16 %v164_v42, %v135_v41  ;;  %v191_v51 = vld [vmem:[#allocation5 + $0x3c8] sm:$0xff]  ;;  %v366_v41 = vld [vmem:[#allocation5 + $0x940] sm:$0xff]  ;;  %v5883_v42 = vpack.c.bf16 %v396_v34, %v367_v33  ;;  %v628_v26 = vld [vmem:[#allocation5 + $0x1170] sm:$0xff] }
  0x99   :  { %5670 = vmatprep.subr.bf16.mxu0 %v5669_v52  ;;  %5760 = vmatprep.subr.bf16.mxu1 %v5759_v56  ;;  %v220_v52 = vld [vmem:[#allocation5 + $0x4b0] sm:$0xff]  ;;  %v5869_v56 = vpack.c.bf16 %v163_v19, %v134_v49  ;;  %v5795_v49 = vpack.c.bf16 %v393_v39, %v364_v38  ;;  %v598_v33 = vld [vmem:[#allocation5 + $0x1080] sm:$0xff]  ;;  %v5899_v34 = vpack.c.bf16 %v628_v26, %v599_v25  ;;  %v657_v38 = vld [vmem:[#allocation5 + $0x1258] sm:$0xff] }
  0x9a   :  { %v5781_v57 = vpack.c.bf16 %v220_v52, %v191_v51  ;;  %v422_v51 = vld [vmem:[#allocation5 + $0xb00] sm:$0xff]  ;;  %v451_v52 = vld [vmem:[#allocation5 + $0xbe8] sm:$0xff]  ;;  %v772_v9 = vld [vmem:[#allocation5 + $0x15f0] sm:$0xff] }
  0x9b   :  { %v686_v39 = vld [vmem:[#allocation5 + $0x1340] sm:$0xff] }
  0x9c   :  { %5672 = vmatpush1.bf16.msra.mxu0 %v5671_v63  ;;  %5762 = vmatpush1.bf16.msra.mxu1 %v5761_v0  ;;  %v221_v63 = vld [vmem:[#allocation5 + $0x4b8] sm:$0xff]  ;;  %v5903_v48 = vpack.c.bf16 %v686_v39, %v657_v38  ;;  %v830_v25 = vld [vmem:[#allocation5 + $0x17c0] sm:$0xff]  ;;  %v888_v38 = vld [vmem:[#allocation5 + $0x1990] sm:$0xff] }
  0x9d   :  { %5674 = vmatprep.subr.bf16.mxu0 %v5673_v1  ;;  %5764 = vmatprep.subr.bf16.mxu1 %v5763_v5  ;;  %v249_v0 = vld [vmem:[#allocation5 + $0x598] sm:$0xff]  ;;  %v278_v1 = vld [vmem:[#allocation5 + $0x680] sm:$0xff]  ;;  %v5873_v5 = vpack.c.bf16 %v221_v63, %v192_v61  ;;  %v5799_v61 = vpack.c.bf16 %v451_v52, %v422_v51  ;;  %v715_v51 = vld [vmem:[#allocation5 + $0x1428] sm:$0xff] }
  0x9e   :  { %v5785_v7 = vpack.c.bf16 %v278_v1, %v249_v0  ;;  %v480_v0 = vld [vmem:[#allocation5 + $0xcd0] sm:$0xff]  ;;  %v509_v1 = vld [vmem:[#allocation5 + $0xdb8] sm:$0xff] }
  0x9f   :  { %v744_v52 = vld [vmem:[#allocation5 + $0x1510] sm:$0xff] }
  0xa0   :  { %5676 = vmatpush1.bf16.msra.mxu0 %v5675_v13  ;;  %5766 = vmatpush1.bf16.msra.mxu1 %v5765_v15  ;;  %v279_v13 = vld [vmem:[#allocation5 + $0x688] sm:$0xff]  ;;  %v5907_v60 = vpack.c.bf16 %v744_v52, %v715_v51  ;;  %v946_v51 = vld [vmem:[#allocation5 + $0x1b60] sm:$0xff] }
  0xa1   :  { %5679 = vmatprep.subr.msk.bf16.mxu0 %vm7324_vm2, %v5677_v16  ;;  %5769 = vmatprep.subr.msk.bf16.mxu1 %vm7324_vm2, %v5767_v23  ;;  %v307_v15 = vld [vmem:[#allocation5 + $0x768] sm:$0xff]  ;;  %v336_v16 = vld [vmem:[#allocation5 + $0x850] sm:$0xff]  ;;  %v5877_v23 = vpack.c.bf16 %v279_v13, %v250_v11  ;;  %v5803_v11 = vpack.c.bf16 %v509_v1, %v480_v0  ;;  %v773_v0 = vld [vmem:[#allocation5 + $0x15f8] sm:$0xff] }
  0xa2   :  { %v5789_v24 = vpack.c.bf16 %v336_v16, %v307_v15  ;;  %v538_v15 = vld [vmem:[#allocation5 + $0xea0] sm:$0xff]  ;;  %v567_v16 = vld [vmem:[#allocation5 + $0xf88] sm:$0xff] }
  0xa3   :  { %v802_v1 = vld [vmem:[#allocation5 + $0x16e0] sm:$0xff] }
  0xa4   :  { %5682 = vmatpush1.bf16.msk.msra.mxu0 %vm7324_vm2, %v5680_v30  ;;  %5772 = vmatpush1.bf16.msk.msra.mxu1 %vm7324_vm2, %v5770_v31  ;;  %v337_v30 = vld [vmem:[#allocation5 + $0x858] sm:$0xff]  ;;  %v5911_v10 = vpack.c.bf16 %v802_v1, %v773_v0  ;;  %v1004_v0 = vld [vmem:[#allocation5 + $0x1d30] sm:$0xff] }
  0xa5   :  { %5774 = vmatprep.subr.bf16.mxu0 %v5773_v32  ;;  %5864 = vmatprep.subr.bf16.mxu1 %v5863_v36  ;;  %v365_v31 = vld [vmem:[#allocation5 + $0x938] sm:$0xff]  ;;  %v394_v32 = vld [vmem:[#allocation5 + $0xa20] sm:$0xff]  ;;  %v5881_v36 = vpack.c.bf16 %v337_v30, %v308_v28  ;;  %v5807_v28 = vpack.c.bf16 %v567_v16, %v538_v15  ;;  %v831_v15 = vld [vmem:[#allocation5 + $0x17c8] sm:$0xff] }
  0xa6   :  { %v5793_v37 = vpack.c.bf16 %v394_v32, %v365_v31  ;;  %v596_v31 = vld [vmem:[#allocation5 + $0x1070] sm:$0xff]  ;;  %v625_v32 = vld [vmem:[#allocation5 + $0x1158] sm:$0xff] }
  0xa7   :  { %5237 = vmatmul.mubr.msk.f32.vlgmr.msra.gmra.mrb[0].mxu0 %vm1514_vm3, %v7337_v40  ;;  %5240 = vmatmul.mubr.msk.f32.vlgmr.msra.gmra.mrb[0].mxu1 %vm1514_vm3, %v7337_v40  ;;  %v860_v16 = vld [vmem:[#allocation5 + $0x18b0] sm:$0xff] }
  0xa8   :  { %5776 = vmatpush1.bf16.msra.mxu0 %v5775_v43  ;;  %5866 = vmatpush1.bf16.msra.mxu1 %v5865_v44  ;;  %v395_v43 = vld [vmem:[#allocation5 + $0xa28] sm:$0xff]  ;;  %v5915_v26 = vpack.c.bf16 %v860_v16, %v831_v15  ;;  %v1062_v15 = vld [vmem:[#allocation5 + $0x1f00] sm:$0xff] }
  0xa9   :  { %5778 = vmatprep.subr.bf16.mxu0 %v5777_v45  ;;  %5868 = vmatprep.subr.bf16.mxu1 %v5867_v50  ;;  %v423_v44 = vld [vmem:[#allocation5 + $0xb08] sm:$0xff]  ;;  %v452_v45 = vld [vmem:[#allocation5 + $0xbf0] sm:$0xff]  ;;  %v5885_v50 = vpack.c.bf16 %v395_v43, %v366_v41  ;;  %v5811_v41 = vpack.c.bf16 %v625_v32, %v596_v31  ;;  %v889_v31 = vld [vmem:[#allocation5 + $0x1998] sm:$0xff] }
  0xaa   :  { %1953 = vmatprep.mubr.f32.mxu0 %v7309_v22  ;;  %2095 = vmatprep.mubr.f32.mxu1 %v7309_v22  ;;  %v5797_v19 = vpack.c.bf16 %v452_v45, %v423_v44  ;;  %v654_v44 = vld [vmem:[#allocation5 + $0x1240] sm:$0xff]  ;;  %v683_v45 = vld [vmem:[#allocation5 + $0x1328] sm:$0xff] }
  0xab   :  { %v918_v32 = vld [vmem:[#allocation5 + $0x1a80] sm:$0xff] }
  0xac   :  { %5780 = vmatpush1.bf16.msra.mxu0 %v5779_v55  ;;  %5870 = vmatpush1.bf16.msra.mxu1 %v5869_v56  ;;  %v453_v55 = vld [vmem:[#allocation5 + $0xbf8] sm:$0xff]  ;;  %v5919_v39 = vpack.c.bf16 %v918_v32, %v889_v31  ;;  %v1120_v31 = vld [vmem:[#allocation5 + $0x20d0] sm:$0xff] }
  0xad   :  { %5782 = vmatprep.subr.bf16.mxu0 %v5781_v57  ;;  %5872 = vmatprep.subr.bf16.mxu1 %v5871_v62  ;;  %v481_v56 = vld [vmem:[#allocation5 + $0xcd8] sm:$0xff]  ;;  %v510_v57 = vld [vmem:[#allocation5 + $0xdc0] sm:$0xff]  ;;  %v5889_v62 = vpack.c.bf16 %v453_v55, %v424_v53  ;;  %v5815_v53 = vpack.c.bf16 %v683_v45, %v654_v44  ;;  %v947_v44 = vld [vmem:[#allocation5 + $0x1b68] sm:$0xff] }
  0xae   :  { %v5801_v63 = vpack.c.bf16 %v510_v57, %v481_v56  ;;  %v712_v56 = vld [vmem:[#allocation5 + $0x1410] sm:$0xff]  ;;  %v741_v57 = vld [vmem:[#allocation5 + $0x14f8] sm:$0xff] }
  0xaf   :  { %v976_v45 = vld [vmem:[#allocation5 + $0x1c50] sm:$0xff] }
  0xb0   :  { %5784 = vmatpush1.bf16.msra.mxu0 %v5783_v4  ;;  %5874 = vmatpush1.bf16.msra.mxu1 %v5873_v5  ;;  %v511_v4 = vld [vmem:[#allocation5 + $0xdc8] sm:$0xff]  ;;  %v5923_v52 = vpack.c.bf16 %v976_v45, %v947_v44  ;;  %v1178_v44 = vld [vmem:[#allocation5 + $0x22a0] sm:$0xff] }
  0xb1   :  { %5786 = vmatprep.subr.bf16.mxu0 %v5785_v7  ;;  %5876 = vmatprep.subr.bf16.mxu1 %v5875_v12  ;;  %v539_v5 = vld [vmem:[#allocation5 + $0xea8] sm:$0xff]  ;;  %v568_v7 = vld [vmem:[#allocation5 + $0xf90] sm:$0xff]  ;;  %v5893_v12 = vpack.c.bf16 %v511_v4, %v482_v2  ;;  %v5819_v2 = vpack.c.bf16 %v741_v57, %v712_v56  ;;  %v1005_v56 = vld [vmem:[#allocation5 + $0x1d38] sm:$0xff] }
  0xb2   :  { %v5805_v13 = vpack.c.bf16 %v568_v7, %v539_v5  ;;  %v770_v5 = vld [vmem:[#allocation5 + $0x15e0] sm:$0xff]  ;;  %v799_v7 = vld [vmem:[#allocation5 + $0x16c8] sm:$0xff] }
  0xb3   :  { %v1034_v57 = vld [vmem:[#allocation5 + $0x1e20] sm:$0xff] }
  0xb4   :  { %5788 = vmatpush1.bf16.msra.mxu0 %v5787_v20  ;;  %5878 = vmatpush1.bf16.msra.mxu1 %v5877_v23  ;;  %v569_v20 = vld [vmem:[#allocation5 + $0xf98] sm:$0xff]  ;;  %v5927_v1 = vpack.c.bf16 %v1034_v57, %v1005_v56  ;;  %v1236_v56 = vld [vmem:[#allocation5 + $0x2470] sm:$0xff] }
  0xb5   :  { %5790 = vmatprep.subr.bf16.mxu0 %v5789_v24  ;;  %5880 = vmatprep.subr.bf16.mxu1 %v5879_v29  ;;  %v597_v23 = vld [vmem:[#allocation5 + $0x1078] sm:$0xff]  ;;  %v626_v24 = vld [vmem:[#allocation5 + $0x1160] sm:$0xff]  ;;  %v5897_v29 = vpack.c.bf16 %v569_v20, %v540_v17  ;;  %v5823_v17 = vpack.c.bf16 %v799_v7, %v770_v5  ;;  %v1063_v5 = vld [vmem:[#allocation5 + $0x1f08] sm:$0xff] }
  0xb6   :  { %v5809_v30 = vpack.c.bf16 %v626_v24, %v597_v23  ;;  %v828_v23 = vld [vmem:[#allocation5 + $0x17b0] sm:$0xff]  ;;  %v857_v24 = vld [vmem:[#allocation5 + $0x1898] sm:$0xff] }
  0xb7   :  { %v1092_v7 = vld [vmem:[#allocation5 + $0x1ff0] sm:$0xff] }
  0xb8   :  { %5792 = vmatpush1.bf16.msra.mxu0 %v5791_v35  ;;  %5882 = vmatpush1.bf16.msra.mxu1 %v5881_v36  ;;  %v627_v35 = vld [vmem:[#allocation5 + $0x1168] sm:$0xff]  ;;  %v5931_v16 = vpack.c.bf16 %v1092_v7, %v1063_v5  ;;  %v1294_v5 = vld [vmem:[#allocation5 + $0x2640] sm:$0xff] }
  0xb9   :  { %5794 = vmatprep.subr.bf16.mxu0 %v5793_v37  ;;  %5884 = vmatprep.subr.bf16.mxu1 %v5883_v42  ;;  %v655_v36 = vld [vmem:[#allocation5 + $0x1248] sm:$0xff]  ;;  %v684_v37 = vld [vmem:[#allocation5 + $0x1330] sm:$0xff]  ;;  %v5901_v42 = vpack.c.bf16 %v627_v35, %v598_v33  ;;  %v5827_v33 = vpack.c.bf16 %v857_v24, %v828_v23  ;;  %v1121_v23 = vld [vmem:[#allocation5 + $0x20d8] sm:$0xff] }
  0xba   :  { %v5813_v43 = vpack.c.bf16 %v684_v37, %v655_v36  ;;  %v886_v36 = vld [vmem:[#allocation5 + $0x1980] sm:$0xff]  ;;  %v915_v37 = vld [vmem:[#allocation5 + $0x1a68] sm:$0xff] }
  0xbb   :  { %v1150_v24 = vld [vmem:[#allocation5 + $0x21c0] sm:$0xff] }
  0xbc   :  { %5796 = vmatpush1.bf16.msra.mxu0 %v5795_v49  ;;  %5886 = vmatpush1.bf16.msra.mxu1 %v5885_v50  ;;  %v685_v49 = vld [vmem:[#allocation5 + $0x1338] sm:$0xff]  ;;  %v5935_v32 = vpack.c.bf16 %v1150_v24, %v1121_v23  ;;  %v80_v23 = vld [vmem:[#allocation5 + $0x50] sm:$0xff] }
  0xbd   :  { %5798 = vmatprep.subr.bf16.mxu0 %v5797_v19  ;;  %5888 = vmatprep.subr.bf16.mxu1 %v5887_v54  ;;  %v713_v50 = vld [vmem:[#allocation5 + $0x1418] sm:$0xff]  ;;  %v742_v19 = vld [vmem:[#allocation5 + $0x1500] sm:$0xff]  ;;  %v5905_v54 = vpack.c.bf16 %v685_v49, %v656_v46  ;;  %v5831_v46 = vpack.c.bf16 %v915_v37, %v886_v36  ;;  %v1179_v36 = vld [vmem:[#allocation5 + $0x22a8] sm:$0xff] }
  0xbe   :  { %v5817_v55 = vpack.c.bf16 %v742_v19, %v713_v50  ;;  %v944_v50 = vld [vmem:[#allocation5 + $0x1b50] sm:$0xff]  ;;  %v973_v19 = vld [vmem:[#allocation5 + $0x1c38] sm:$0xff] }
  0xbf   :  { %v1208_v37 = vld [vmem:[#allocation5 + $0x2390] sm:$0xff] }
  0xc0   :  { %5800 = vmatpush1.bf16.msra.mxu0 %v5799_v61  ;;  %5890 = vmatpush1.bf16.msra.mxu1 %v5889_v62  ;;  %v743_v61 = vld [vmem:[#allocation5 + $0x1508] sm:$0xff]  ;;  %v5939_v45 = vpack.c.bf16 %v1208_v37, %v1179_v36  ;;  %v138_v36 = vld [vmem:[#allocation5 + $0x220] sm:$0xff] }
  0xc1   :  { %5802 = vmatprep.subr.bf16.mxu0 %v5801_v63  ;;  %5892 = vmatprep.subr.bf16.mxu1 %v5891_v3  ;;  %v771_v62 = vld [vmem:[#allocation5 + $0x15e8] sm:$0xff]  ;;  %v800_v63 = vld [vmem:[#allocation5 + $0x16d0] sm:$0xff]  ;;  %v5909_v3 = vpack.c.bf16 %v743_v61, %v714_v58  ;;  %v5835_v58 = vpack.c.bf16 %v973_v19, %v944_v50  ;;  %v1237_v50 = vld [vmem:[#allocation5 + $0x2478] sm:$0xff] }
  0xc2   :  { %v5821_v4 = vpack.c.bf16 %v800_v63, %v771_v62  ;;  %v1002_v62 = vld [vmem:[#allocation5 + $0x1d20] sm:$0xff]  ;;  %v1031_v63 = vld [vmem:[#allocation5 + $0x1e08] sm:$0xff] }
  0xc3   :  { %v1266_v19 = vld [vmem:[#allocation5 + $0x2560] sm:$0xff] }
  0xc4   :  { %5804 = vmatpush1.bf16.msra.mxu0 %v5803_v11  ;;  %5894 = vmatpush1.bf16.msra.mxu1 %v5893_v12  ;;  %v801_v11 = vld [vmem:[#allocation5 + $0x16d8] sm:$0xff]  ;;  %v5943_v57 = vpack.c.bf16 %v1266_v19, %v1237_v50  ;;  %v196_v50 = vld [vmem:[#allocation5 + $0x3f0] sm:$0xff] }
  0xc5   :  { %5806 = vmatprep.subr.bf16.mxu0 %v5805_v13  ;;  %5896 = vmatprep.subr.bf16.mxu1 %v5895_v18  ;;  %v829_v12 = vld [vmem:[#allocation5 + $0x17b8] sm:$0xff]  ;;  %v858_v13 = vld [vmem:[#allocation5 + $0x18a0] sm:$0xff]  ;;  %v5913_v18 = vpack.c.bf16 %v801_v11, %v772_v9  ;;  %v5839_v9 = vpack.c.bf16 %v1031_v63, %v1002_v62  ;;  %v1295_v62 = vld [vmem:[#allocation5 + $0x2648] sm:$0xff] }
  0xc6   :  { %v5825_v20 = vpack.c.bf16 %v858_v13, %v829_v12  ;;  %v1060_v12 = vld [vmem:[#allocation5 + $0x1ef0] sm:$0xff]  ;;  %v1089_v13 = vld [vmem:[#allocation5 + $0x1fd8] sm:$0xff] }
  0xc7   :  { %v1324_v63 = vld [vmem:[#allocation5 + $0x2730] sm:$0xf] }
  0xc8   :  { %5808 = vmatpush1.bf16.msra.mxu0 %v5807_v28  ;;  %5898 = vmatpush1.bf16.msra.mxu1 %v5897_v29  ;;  %v859_v28 = vld [vmem:[#allocation5 + $0x18a8] sm:$0xff]  ;;  %v5947_v7 = vpack.c.bf16 %v1324_v63, %v1295_v62  ;;  %v254_v62 = vld [vmem:[#allocation5 + $0x5c0] sm:$0xff] }
  0xc9   :  { %5810 = vmatprep.subr.bf16.mxu0 %v5809_v30  ;;  %5900 = vmatprep.subr.bf16.mxu1 %v5899_v34  ;;  %v887_v29 = vld [vmem:[#allocation5 + $0x1988] sm:$0xff]  ;;  %v916_v30 = vld [vmem:[#allocation5 + $0x1a70] sm:$0xff]  ;;  %v5917_v34 = vpack.c.bf16 %v859_v28, %v830_v25  ;;  %v5843_v25 = vpack.c.bf16 %v1089_v13, %v1060_v12  ;;  %v81_v12 = vld [vmem:[#allocation5 + $0x58] sm:$0xff] }
  0xca   :  { %v5829_v35 = vpack.c.bf16 %v916_v30, %v887_v29  ;;  %v1118_v29 = vld [vmem:[#allocation5 + $0x20c0] sm:$0xff]  ;;  %v1147_v30 = vld [vmem:[#allocation5 + $0x21a8] sm:$0xff] }
  0xcb   :  { %v110_v13 = vld [vmem:[#allocation5 + $0x140] sm:$0xff] }
  0xcc   :  { %5812 = vmatpush1.bf16.msra.mxu0 %v5811_v41  ;;  %5902 = vmatpush1.bf16.msra.mxu1 %v5901_v42  ;;  %v917_v41 = vld [vmem:[#allocation5 + $0x1a78] sm:$0xff]  ;;  %v6043_v24 = vpack.c.bf16 %v110_v13, %v81_v12  ;;  %v312_v12 = vld [vmem:[#allocation5 + $0x790] sm:$0xff] }
  0xcd   :  { %5814 = vmatprep.subr.bf16.mxu0 %v5813_v43  ;;  %5904 = vmatprep.subr.bf16.mxu1 %v5903_v48  ;;  %v945_v42 = vld [vmem:[#allocation5 + $0x1b58] sm:$0xff]  ;;  %v974_v43 = vld [vmem:[#allocation5 + $0x1c40] sm:$0xff]  ;;  %v5921_v48 = vpack.c.bf16 %v917_v41, %v888_v38  ;;  %v5847_v38 = vpack.c.bf16 %v1147_v30, %v1118_v29  ;;  %v139_v29 = vld [vmem:[#allocation5 + $0x228] sm:$0xff] }
  0xce   :  { %v5833_v49 = vpack.c.bf16 %v974_v43, %v945_v42  ;;  %v1176_v42 = vld [vmem:[#allocation5 + $0x2290] sm:$0xff]  ;;  %v1205_v43 = vld [vmem:[#allocation5 + $0x2378] sm:$0xff] }
  0xcf   :  { %v168_v30 = vld [vmem:[#allocation5 + $0x310] sm:$0xff] }
  0xd0   :  { %5816 = vmatpush1.bf16.msra.mxu0 %v5815_v53  ;;  %5906 = vmatpush1.bf16.msra.mxu1 %v5905_v54  ;;  %v975_v53 = vld [vmem:[#allocation5 + $0x1c48] sm:$0xff]  ;;  %v6047_v37 = vpack.c.bf16 %v168_v30, %v139_v29  ;;  %v370_v29 = vld [vmem:[#allocation5 + $0x960] sm:$0xff] }
  0xd1   :  { %5818 = vmatprep.subr.bf16.mxu0 %v5817_v55  ;;  %5908 = vmatprep.subr.bf16.mxu1 %v5907_v60  ;;  %v1003_v54 = vld [vmem:[#allocation5 + $0x1d28] sm:$0xff]  ;;  %v1032_v55 = vld [vmem:[#allocation5 + $0x1e10] sm:$0xff]  ;;  %v5925_v60 = vpack.c.bf16 %v975_v53, %v946_v51  ;;  %v5851_v51 = vpack.c.bf16 %v1205_v43, %v1176_v42  ;;  %v197_v42 = vld [vmem:[#allocation5 + $0x3f8] sm:$0xff] }
  0xd2   :  { %v5837_v61 = vpack.c.bf16 %v1032_v55, %v1003_v54  ;;  %v1234_v54 = vld [vmem:[#allocation5 + $0x2460] sm:$0xff]  ;;  %v1263_v55 = vld [vmem:[#allocation5 + $0x2548] sm:$0xff] }
  0xd3   :  { %v226_v43 = vld [vmem:[#allocation5 + $0x4e0] sm:$0xff] }
  0xd4   :  { %5820 = vmatpush1.bf16.msra.mxu0 %v5819_v2  ;;  %5910 = vmatpush1.bf16.msra.mxu1 %v5909_v3  ;;  %v1033_v2 = vld [vmem:[#allocation5 + $0x1e18] sm:$0xff]  ;;  %v6051_v19 = vpack.c.bf16 %v226_v43, %v197_v42  ;;  %v428_v42 = vld [vmem:[#allocation5 + $0xb30] sm:$0xff] }
  0xd5   :  { %5822 = vmatprep.subr.bf16.mxu0 %v5821_v4  ;;  %5912 = vmatprep.subr.bf16.mxu1 %v5911_v10  ;;  %v1061_v3 = vld [vmem:[#allocation5 + $0x1ef8] sm:$0xff]  ;;  %v1090_v4 = vld [vmem:[#allocation5 + $0x1fe0] sm:$0xff]  ;;  %v5929_v10 = vpack.c.bf16 %v1033_v2, %v1004_v0  ;;  %v5855_v0 = vpack.c.bf16 %v1263_v55, %v1234_v54  ;;  %v255_v54 = vld [vmem:[#allocation5 + $0x5c8] sm:$0xff] }
  0xd6   :  { %v5841_v11 = vpack.c.bf16 %v1090_v4, %v1061_v3  ;;  %v1292_v3 = vld [vmem:[#allocation5 + $0x2630] sm:$0xff]  ;;  %v1321_v4 = vld [vmem:[#allocation5 + $0x2718] sm:$0xf] }
  0xd7   :  { %v284_v55 = vld [vmem:[#allocation5 + $0x6b0] sm:$0xff] }
  0xd8   :  { %5824 = vmatpush1.bf16.msra.mxu0 %v5823_v17  ;;  %5914 = vmatpush1.bf16.msra.mxu1 %v5913_v18  ;;  %v1091_v17 = vld [vmem:[#allocation5 + $0x1fe8] sm:$0xff]  ;;  %v6055_v63 = vpack.c.bf16 %v284_v55, %v255_v54  ;;  %v486_v54 = vld [vmem:[#allocation5 + $0xd00] sm:$0xff] }
  0xd9   :  { %5826 = vmatprep.subr.bf16.mxu0 %v5825_v20  ;;  %5916 = vmatprep.subr.bf16.mxu1 %v5915_v26  ;;  %v1119_v18 = vld [vmem:[#allocation5 + $0x20c8] sm:$0xff]  ;;  %v1148_v20 = vld [vmem:[#allocation5 + $0x21b0] sm:$0xff]  ;;  %v5933_v26 = vpack.c.bf16 %v1091_v17, %v1062_v15  ;;  %v5860_v15 = vpack.c.bf16 %v1321_v4, %v1292_v3  ;;  %v313_v3 = vld [vmem:[#allocation5 + $0x798] sm:$0xff] }
  0xda   :  { %v5845_v28 = vpack.c.bf16 %v1148_v20, %v1119_v18  ;;  %v78_v18 = vld [vmem:[#allocation5 + $0x40] sm:$0xff]  ;;  %v107_v20 = vld [vmem:[#allocation5 + $0x128] sm:$0xff] }
  0xdb   :  { %v342_v4 = vld [vmem:[#allocation5 + $0x880] sm:$0xff] }
  0xdc   :  { %5828 = vmatpush1.bf16.msra.mxu0 %v5827_v33  ;;  %5918 = vmatpush1.bf16.msra.mxu1 %v5917_v34  ;;  %v1149_v33 = vld [vmem:[#allocation5 + $0x21b8] sm:$0xff]  ;;  %v6059_v13 = vpack.c.bf16 %v342_v4, %v313_v3  ;;  %v544_v3 = vld [vmem:[#allocation5 + $0xed0] sm:$0xff] }
  0xdd   :  { %5830 = vmatprep.subr.bf16.mxu0 %v5829_v35  ;;  %5920 = vmatprep.subr.bf16.mxu1 %v5919_v39  ;;  %v1177_v34 = vld [vmem:[#allocation5 + $0x2298] sm:$0xff]  ;;  %v1206_v35 = vld [vmem:[#allocation5 + $0x2380] sm:$0xff]  ;;  %v5937_v39 = vpack.c.bf16 %v1149_v33, %v1120_v31  ;;  %v5955_v31 = vpack.c.bf16 %v107_v20, %v78_v18  ;;  %v371_v18 = vld [vmem:[#allocation5 + $0x968] sm:$0xff] }
  0xde   :  { %v5849_v41 = vpack.c.bf16 %v1206_v35, %v1177_v34  ;;  %v136_v34 = vld [vmem:[#allocation5 + $0x210] sm:$0xff]  ;;  %v165_v35 = vld [vmem:[#allocation5 + $0x2f8] sm:$0xff] }
  0xdf   :  { %v400_v20 = vld [vmem:[#allocation5 + $0xa50] sm:$0xff] }
  0xe0   :  { %5832 = vmatpush1.bf16.msra.mxu0 %v5831_v46  ;;  %5922 = vmatpush1.bf16.msra.mxu1 %v5921_v48  ;;  %v1207_v46 = vld [vmem:[#allocation5 + $0x2388] sm:$0xff]  ;;  %v6063_v30 = vpack.c.bf16 %v400_v20, %v371_v18  ;;  %v602_v18 = vld [vmem:[#allocation5 + $0x10a0] sm:$0xff] }
  0xe1   :  { %5834 = vmatprep.subr.bf16.mxu0 %v5833_v49  ;;  %5924 = vmatprep.subr.bf16.mxu1 %v5923_v52  ;;  %v1235_v48 = vld [vmem:[#allocation5 + $0x2468] sm:$0xff]  ;;  %v1264_v49 = vld [vmem:[#allocation5 + $0x2550] sm:$0xff]  ;;  %v5941_v52 = vpack.c.bf16 %v1207_v46, %v1178_v44  ;;  %v5959_v44 = vpack.c.bf16 %v165_v35, %v136_v34  ;;  %v429_v34 = vld [vmem:[#allocation5 + $0xb38] sm:$0xff] }
  0xe2   :  { %v5853_v53 = vpack.c.bf16 %v1264_v49, %v1235_v48  ;;  %v194_v48 = vld [vmem:[#allocation5 + $0x3e0] sm:$0xff]  ;;  %v223_v49 = vld [vmem:[#allocation5 + $0x4c8] sm:$0xff] }
  0xe3   :  { %v458_v35 = vld [vmem:[#allocation5 + $0xc20] sm:$0xff] }
  0xe4   :  { %5836 = vmatpush1.bf16.msra.mxu0 %v5835_v58  ;;  %5926 = vmatpush1.bf16.msra.mxu1 %v5925_v60  ;;  %v1265_v58 = vld [vmem:[#allocation5 + $0x2558] sm:$0xff]  ;;  %v6067_v43 = vpack.c.bf16 %v458_v35, %v429_v34  ;;  %v660_v34 = vld [vmem:[#allocation5 + $0x1270] sm:$0xff] }
  0xe5   :  { %5838 = vmatprep.subr.bf16.mxu0 %v5837_v61  ;;  %5928 = vmatprep.subr.bf16.mxu1 %v5927_v1  ;;  %v1293_v60 = vld [vmem:[#allocation5 + $0x2638] sm:$0xff]  ;;  %v1322_v61 = vld [vmem:[#allocation5 + $0x2720] sm:$0xf]  ;;  %v5945_v1 = vpack.c.bf16 %v1265_v58, %v1236_v56  ;;  %v5963_v56 = vpack.c.bf16 %v223_v49, %v194_v48  ;;  %v487_v48 = vld [vmem:[#allocation5 + $0xd08] sm:$0xff] }
  0xe6   :  { %v5857_v2 = vpack.c.bf16 %v1322_v61, %v1293_v60  ;;  %v252_v60 = vld [vmem:[#allocation5 + $0x5b0] sm:$0xff]  ;;  %v281_v61 = vld [vmem:[#allocation5 + $0x698] sm:$0xff] }
  0xe7   :  { %1954 = vmatmul.mubr.f32.vlgmr.msra.gmra.mrb[2].mxu0 %v7318_v21  ;;  %2096 = vmatmul.mubr.f32.vlgmr.msra.gmra.mrb[2].mxu1 %v7318_v21  ;;  %v516_v49 = vld [vmem:[#allocation5 + $0xdf0] sm:$0xff] }
  0xe8   :  { %5840 = vmatpush1.bf16.msra.mxu0 %v5839_v9  ;;  %5930 = vmatpush1.bf16.msra.mxu1 %v5929_v10  ;;  %v1323_v9 = vld [vmem:[#allocation5 + $0x2728] sm:$0xf]  ;;  %v6071_v55 = vpack.c.bf16 %v516_v49, %v487_v48  ;;  %v718_v48 = vld [vmem:[#allocation5 + $0x1440] sm:$0xff] }
  0xe9   :  { %5842 = vmatprep.subr.bf16.mxu0 %v5841_v11  ;;  %5932 = vmatprep.subr.bf16.mxu1 %v5931_v16  ;;  %v79_v10 = vld [vmem:[#allocation5 + $0x48] sm:$0xff]  ;;  %v108_v11 = vld [vmem:[#allocation5 + $0x130] sm:$0xff]  ;;  %v5950_v16 = vpack.c.bf16 %v1323_v9, %v1294_v5  ;;  %v5967_v5 = vpack.c.bf16 %v281_v61, %v252_v60  ;;  %v545_v60 = vld [vmem:[#allocation5 + $0xed8] sm:$0xff] }
  0xea   :  { %2024 = vmatprep.mubr.f32.mxu0 %v8304_v47  ;;  %2166 = vmatprep.mubr.f32.mxu1 %v8304_v47  ;;  %v5953_v17 = vpack.c.bf16 %v108_v11, %v79_v10  ;;  %v310_v10 = vld [vmem:[#allocation5 + $0x780] sm:$0xff]  ;;  %v339_v11 = vld [vmem:[#allocation5 + $0x868] sm:$0xff] }
  0xeb   :  { %v574_v61 = vld [vmem:[#allocation5 + $0xfc0] sm:$0xff] }
  0xec   :  { %5844 = vmatpush1.bf16.msra.mxu0 %v5843_v25  ;;  %5934 = vmatpush1.bf16.msra.mxu1 %v5933_v26  ;;  %v109_v25 = vld [vmem:[#allocation5 + $0x138] sm:$0xff]  ;;  %v6075_v4 = vpack.c.bf16 %v574_v61, %v545_v60  ;;  %v776_v60 = vld [vmem:[#allocation5 + $0x1610] sm:$0xff] }
  0xed   :  { %5846 = vmatprep.subr.bf16.mxu0 %v5845_v28  ;;  %5936 = vmatprep.subr.bf16.mxu1 %v5935_v32  ;;  %v137_v26 = vld [vmem:[#allocation5 + $0x218] sm:$0xff]  ;;  %v166_v28 = vld [vmem:[#allocation5 + $0x300] sm:$0xff]  ;;  %v6045_v32 = vpack.c.bf16 %v109_v25, %v80_v23  ;;  %v5971_v23 = vpack.c.bf16 %v339_v11, %v310_v10  ;;  %v603_v10 = vld [vmem:[#allocation5 + $0x10a8] sm:$0xff] }
  0xee   :  { %v5957_v33 = vpack.c.bf16 %v166_v28, %v137_v26  ;;  %v368_v26 = vld [vmem:[#allocation5 + $0x950] sm:$0xff]  ;;  %v397_v28 = vld [vmem:[#allocation5 + $0xa38] sm:$0xff] }
  0xef   :  { %v632_v11 = vld [vmem:[#allocation5 + $0x1190] sm:$0xff] }
  0xf0   :  { %5848 = vmatpush1.bf16.msra.mxu0 %v5847_v38  ;;  %5938 = vmatpush1.bf16.msra.mxu1 %v5937_v39  ;;  %v167_v38 = vld [vmem:[#allocation5 + $0x308] sm:$0xff]  ;;  %v6079_v20 = vpack.c.bf16 %v632_v11, %v603_v10  ;;  %v834_v10 = vld [vmem:[#allocation5 + $0x17e0] sm:$0xff] }
  0xf1   :  { %5850 = vmatprep.subr.bf16.mxu0 %v5849_v41  ;;  %5940 = vmatprep.subr.bf16.mxu1 %v5939_v45  ;;  %v195_v39 = vld [vmem:[#allocation5 + $0x3e8] sm:$0xff]  ;;  %v224_v41 = vld [vmem:[#allocation5 + $0x4d0] sm:$0xff]  ;;  %v6049_v45 = vpack.c.bf16 %v167_v38, %v138_v36  ;;  %v5975_v36 = vpack.c.bf16 %v397_v28, %v368_v26  ;;  %v661_v26 = vld [vmem:[#allocation5 + $0x1278] sm:$0xff] }
  0xf2   :  { %v5961_v46 = vpack.c.bf16 %v224_v41, %v195_v39  ;;  %v426_v39 = vld [vmem:[#allocation5 + $0xb20] sm:$0xff]  ;;  %v455_v41 = vld [vmem:[#allocation5 + $0xc08] sm:$0xff] }
  0xf3   :  { %v690_v28 = vld [vmem:[#allocation5 + $0x1360] sm:$0xff] }
  0xf4   :  { %5852 = vmatpush1.bf16.msra.mxu0 %v5851_v51  ;;  %5942 = vmatpush1.bf16.msra.mxu1 %v5941_v52  ;;  %v225_v51 = vld [vmem:[#allocation5 + $0x4d8] sm:$0xff]  ;;  %v6083_v35 = vpack.c.bf16 %v690_v28, %v661_v26  ;;  %v892_v26 = vld [vmem:[#allocation5 + $0x19b0] sm:$0xff] }
  0xf5   :  { %5854 = vmatprep.subr.bf16.mxu0 %v5853_v53  ;;  %5944 = vmatprep.subr.bf16.mxu1 %v5943_v57  ;;  %v253_v52 = vld [vmem:[#allocation5 + $0x5b8] sm:$0xff]  ;;  %v282_v53 = vld [vmem:[#allocation5 + $0x6a0] sm:$0xff]  ;;  %v6053_v57 = vpack.c.bf16 %v225_v51, %v196_v50  ;;  %v5979_v50 = vpack.c.bf16 %v455_v41, %v426_v39  ;;  %v719_v39 = vld [vmem:[#allocation5 + $0x1448] sm:$0xff] }
  0xf6   :  { %v5965_v58 = vpack.c.bf16 %v282_v53, %v253_v52  ;;  %v484_v52 = vld [vmem:[#allocation5 + $0xcf0] sm:$0xff]  ;;  %v513_v53 = vld [vmem:[#allocation5 + $0xdd8] sm:$0xff] }
  0xf7   :  { %v748_v41 = vld [vmem:[#allocation5 + $0x1530] sm:$0xff] }
  0xf8   :  { %5856 = vmatpush1.bf16.msra.mxu0 %v5855_v0  ;;  %5946 = vmatpush1.bf16.msra.mxu1 %v5945_v1  ;;  %v283_v0 = vld [vmem:[#allocation5 + $0x6a8] sm:$0xff]  ;;  %v6087_v49 = vpack.c.bf16 %v748_v41, %v719_v39  ;;  %v950_v39 = vld [vmem:[#allocation5 + $0x1b80] sm:$0xff] }
  0xf9   :  { %5859 = vmatprep.subr.msk.bf16.mxu0 %vm7324_vm2, %v5857_v2  ;;  %5949 = vmatprep.subr.msk.bf16.mxu1 %vm7324_vm2, %v5947_v7  ;;  %v311_v1 = vld [vmem:[#allocation5 + $0x788] sm:$0xff]  ;;  %v340_v2 = vld [vmem:[#allocation5 + $0x870] sm:$0xff]  ;;  %v6057_v7 = vpack.c.bf16 %v283_v0, %v254_v62  ;;  %v5983_v62 = vpack.c.bf16 %v513_v53, %v484_v52  ;;  %v777_v52 = vld [vmem:[#allocation5 + $0x1618] sm:$0xff] }
  0xfa   :  { %v5969_v9 = vpack.c.bf16 %v340_v2, %v311_v1  ;;  %v542_v1 = vld [vmem:[#allocation5 + $0xec0] sm:$0xff]  ;;  %v571_v2 = vld [vmem:[#allocation5 + $0xfa8] sm:$0xff] }
  0xfb   :  { %v806_v53 = vld [vmem:[#allocation5 + $0x1700] sm:$0xff] }
  0xfc   :  { %5862 = vmatpush1.bf16.msk.msra.mxu0 %vm7324_vm2, %v5860_v15  ;;  %5952 = vmatpush1.bf16.msk.msra.mxu1 %vm7324_vm2, %v5950_v16  ;;  %v341_v15 = vld [vmem:[#allocation5 + $0x878] sm:$0xff]  ;;  %v6091_v61 = vpack.c.bf16 %v806_v53, %v777_v52  ;;  %v1008_v52 = vld [vmem:[#allocation5 + $0x1d50] sm:$0xff] }
  0xfd   :  { %5954 = vmatprep.subr.bf16.mxu0 %v5953_v17  ;;  %6044 = vmatprep.subr.bf16.mxu1 %v6043_v24  ;;  %v369_v16 = vld [vmem:[#allocation5 + $0x958] sm:$0xff]  ;;  %v398_v17 = vld [vmem:[#allocation5 + $0xa40] sm:$0xff]  ;;  %v6061_v24 = vpack.c.bf16 %v341_v15, %v312_v12  ;;  %v5987_v12 = vpack.c.bf16 %v571_v2, %v542_v1  ;;  %v835_v1 = vld [vmem:[#allocation5 + $0x17e8] sm:$0xff] }
  0xfe   :  { %v5973_v25 = vpack.c.bf16 %v398_v17, %v369_v16  ;;  %v600_v16 = vld [vmem:[#allocation5 + $0x1090] sm:$0xff]  ;;  %v629_v17 = vld [vmem:[#allocation5 + $0x1178] sm:$0xff] }
  0xff   :  { %5243 = vmatmul.mubr.msk.f32.vlgmr.msra.gmra.mrb[2].mxu0 %vm1514_vm3, %v7337_v40  ;;  %5246 = vmatmul.mubr.msk.f32.vlgmr.msra.gmra.mrb[2].mxu1 %vm1514_vm3, %v7337_v40  ;;  %v864_v2 = vld [vmem:[#allocation5 + $0x18d0] sm:$0xff] }
 0x100   :  { %5956 = vmatpush1.bf16.msra.mxu0 %v5955_v31  ;;  %6046 = vmatpush1.bf16.msra.mxu1 %v6045_v32  ;;  %v399_v31 = vld [vmem:[#allocation5 + $0xa48] sm:$0xff]  ;;  %v6095_v11 = vpack.c.bf16 %v864_v2, %v835_v1  ;;  %v1066_v1 = vld [vmem:[#allocation5 + $0x1f20] sm:$0xff] }
 0x101   :  { %5958 = vmatprep.subr.bf16.mxu0 %v5957_v33  ;;  %6048 = vmatprep.subr.bf16.mxu1 %v6047_v37  ;;  %v427_v32 = vld [vmem:[#allocation5 + $0xb28] sm:$0xff]  ;;  %v456_v33 = vld [vmem:[#allocation5 + $0xc10] sm:$0xff]  ;;  %v6065_v37 = vpack.c.bf16 %v399_v31, %v370_v29  ;;  %v5991_v29 = vpack.c.bf16 %v629_v17, %v600_v16  ;;  %v893_v16 = vld [vmem:[#allocation5 + $0x19b8] sm:$0xff] }
 0x102   :  { %2237 = vmatprep.mubr.f32.mxu0 %v7309_v22  ;;  %2379 = vmatprep.mubr.f32.mxu1 %v7309_v22  ;;  %v5977_v38 = vpack.c.bf16 %v456_v33, %v427_v32  ;;  %v658_v32 = vld [vmem:[#allocation5 + $0x1260] sm:$0xff]  ;;  %v687_v33 = vld [vmem:[#allocation5 + $0x1348] sm:$0xff] }
 0x103   :  { %v922_v17 = vld [vmem:[#allocation5 + $0x1aa0] sm:$0xff] }
 0x104   :  { %5960 = vmatpush1.bf16.msra.mxu0 %v5959_v44  ;;  %6050 = vmatpush1.bf16.msra.mxu1 %v6049_v45  ;;  %v457_v44 = vld [vmem:[#allocation5 + $0xc18] sm:$0xff]  ;;  %v6099_v28 = vpack.c.bf16 %v922_v17, %v893_v16  ;;  %v1124_v16 = vld [vmem:[#allocation5 + $0x20f0] sm:$0xff] }
 0x105   :  { %5962 = vmatprep.subr.bf16.mxu0 %v5961_v46  ;;  %6052 = vmatprep.subr.bf16.mxu1 %v6051_v19  ;;  %v485_v45 = vld [vmem:[#allocation5 + $0xcf8] sm:$0xff]  ;;  %v514_v46 = vld [vmem:[#allocation5 + $0xde0] sm:$0xff]  ;;  %v6069_v19 = vpack.c.bf16 %v457_v44, %v428_v42  ;;  %v5995_v42 = vpack.c.bf16 %v687_v33, %v658_v32  ;;  %v951_v32 = vld [vmem:[#allocation5 + $0x1b88] sm:$0xff] }
 0x106   :  { %v5981_v51 = vpack.c.bf16 %v514_v46, %v485_v45  ;;  %v716_v45 = vld [vmem:[#allocation5 + $0x1430] sm:$0xff]  ;;  %v745_v46 = vld [vmem:[#allocation5 + $0x1518] sm:$0xff] }
 0x107   :  { %v980_v33 = vld [vmem:[#allocation5 + $0x1c70] sm:$0xff] }
 0x108   :  { %5964 = vmatpush1.bf16.msra.mxu0 %v5963_v56  ;;  %6054 = vmatpush1.bf16.msra.mxu1 %v6053_v57  ;;  %v515_v56 = vld [vmem:[#allocation5 + $0xde8] sm:$0xff]  ;;  %v6103_v41 = vpack.c.bf16 %v980_v33, %v951_v32  ;;  %v1182_v32 = vld [vmem:[#allocation5 + $0x22c0] sm:$0xff] }
 0x109   :  { %5966 = vmatprep.subr.bf16.mxu0 %v5965_v58  ;;  %6056 = vmatprep.subr.bf16.mxu1 %v6055_v63  ;;  %v543_v57 = vld [vmem:[#allocation5 + $0xec8] sm:$0xff]  ;;  %v572_v58 = vld [vmem:[#allocation5 + $0xfb0] sm:$0xff]  ;;  %v6073_v63 = vpack.c.bf16 %v515_v56, %v486_v54  ;;  %v5999_v54 = vpack.c.bf16 %v745_v46, %v716_v45  ;;  %v1009_v45 = vld [vmem:[#allocation5 + $0x1d58] sm:$0xff] }
 0x10a   :  { %v5985_v0 = vpack.c.bf16 %v572_v58, %v543_v57  ;;  %v774_v57 = vld [vmem:[#allocation5 + $0x1600] sm:$0xff]  ;;  %v803_v58 = vld [vmem:[#allocation5 + $0x16e8] sm:$0xff] }
 0x10b   :  { %v1038_v46 = vld [vmem:[#allocation5 + $0x1e40] sm:$0xff] }
 0x10c   :  { %5968 = vmatpush1.bf16.msra.mxu0 %v5967_v5  ;;  %6058 = vmatpush1.bf16.msra.mxu1 %v6057_v7  ;;  %v573_v5 = vld [vmem:[#allocation5 + $0xfb8] sm:$0xff]  ;;  %v6107_v53 = vpack.c.bf16 %v1038_v46, %v1009_v45  ;;  %v1240_v45 = vld [vmem:[#allocation5 + $0x2490] sm:$0xff] }
 0x10d   :  { %5970 = vmatprep.subr.bf16.mxu0 %v5969_v9  ;;  %6060 = vmatprep.subr.bf16.mxu1 %v6059_v13  ;;  %v601_v7 = vld [vmem:[#allocation5 + $0x1098] sm:$0xff]  ;;  %v630_v9 = vld [vmem:[#allocation5 + $0x1180] sm:$0xff]  ;;  %v6077_v13 = vpack.c.bf16 %v573_v5, %v544_v3  ;;  %v6003_v3 = vpack.c.bf16 %v803_v58, %v774_v57  ;;  %v1067_v57 = vld [vmem:[#allocation5 + $0x1f28] sm:$0xff] }
 0x10e   :  { %v5989_v15 = vpack.c.bf16 %v630_v9, %v601_v7  ;;  %v832_v7 = vld [vmem:[#allocation5 + $0x17d0] sm:$0xff]  ;;  %v861_v9 = vld [vmem:[#allocation5 + $0x18b8] sm:$0xff] }
 0x10f   :  { %v1096_v58 = vld [vmem:[#allocation5 + $0x2010] sm:$0xff] }
 0x110   :  { %5972 = vmatpush1.bf16.msra.mxu0 %v5971_v23  ;;  %6062 = vmatpush1.bf16.msra.mxu1 %v6061_v24  ;;  %v631_v23 = vld [vmem:[#allocation5 + $0x1188] sm:$0xff]  ;;  %v6111_v2 = vpack.c.bf16 %v1096_v58, %v1067_v57  ;;  %v1298_v57 = vld [vmem:[#allocation5 + $0x2660] sm:$0xff] }
 0x111   :  { %5974 = vmatprep.subr.bf16.mxu0 %v5973_v25  ;;  %6064 = vmatprep.subr.bf16.mxu1 %v6063_v30  ;;  %v659_v24 = vld [vmem:[#allocation5 + $0x1268] sm:$0xff]  ;;  %v688_v25 = vld [vmem:[#allocation5 + $0x1350] sm:$0xff]  ;;  %v6081_v30 = vpack.c.bf16 %v631_v23, %v602_v18  ;;  %v6007_v18 = vpack.c.bf16 %v861_v9, %v832_v7  ;;  %v1125_v7 = vld [vmem:[#allocation5 + $0x20f8] sm:$0xff] }
 0x112   :  { %v5993_v31 = vpack.c.bf16 %v688_v25, %v659_v24  ;;  %v890_v24 = vld [vmem:[#allocation5 + $0x19a0] sm:$0xff]  ;;  %v919_v25 = vld [vmem:[#allocation5 + $0x1a88] sm:$0xff] }
 0x113   :  { %v1154_v9 = vld [vmem:[#allocation5 + $0x21e0] sm:$0xff] }
 0x114   :  { %5976 = vmatpush1.bf16.msra.mxu0 %v5975_v36  ;;  %6066 = vmatpush1.bf16.msra.mxu1 %v6065_v37  ;;  %v689_v36 = vld [vmem:[#allocation5 + $0x1358] sm:$0xff]  ;;  %v6115_v17 = vpack.c.bf16 %v1154_v9, %v1125_v7  ;;  %v84_v7 = vld [vmem:[#allocation5 + $0x70] sm:$0xff] }
 0x115   :  { %5978 = vmatprep.subr.bf16.mxu0 %v5977_v38  ;;  %6068 = vmatprep.subr.bf16.mxu1 %v6067_v43  ;;  %v717_v37 = vld [vmem:[#allocation5 + $0x1438] sm:$0xff]  ;;  %v746_v38 = vld [vmem:[#allocation5 + $0x1520] sm:$0xff]  ;;  %v6085_v43 = vpack.c.bf16 %v689_v36, %v660_v34  ;;  %v6011_v34 = vpack.c.bf16 %v919_v25, %v890_v24  ;;  %v1183_v24 = vld [vmem:[#allocation5 + $0x22c8] sm:$0xff] }
 0x116   :  { %v5997_v44 = vpack.c.bf16 %v746_v38, %v717_v37  ;;  %v948_v37 = vld [vmem:[#allocation5 + $0x1b70] sm:$0xff]  ;;  %v977_v38 = vld [vmem:[#allocation5 + $0x1c58] sm:$0xff] }
 0x117   :  { %v1212_v25 = vld [vmem:[#allocation5 + $0x23b0] sm:$0xff] }
 0x118   :  { %5980 = vmatpush1.bf16.msra.mxu0 %v5979_v50  ;;  %6070 = vmatpush1.bf16.msra.mxu1 %v6069_v19  ;;  %v747_v50 = vld [vmem:[#allocation5 + $0x1528] sm:$0xff]  ;;  %v6119_v33 = vpack.c.bf16 %v1212_v25, %v1183_v24  ;;  %v142_v24 = vld [vmem:[#allocation5 + $0x240] sm:$0xff] }
 0x119   :  { %5982 = vmatprep.subr.bf16.mxu0 %v5981_v51  ;;  %6072 = vmatprep.subr.bf16.mxu1 %v6071_v55  ;;  %v775_v19 = vld [vmem:[#allocation5 + $0x1608] sm:$0xff]  ;;  %v804_v51 = vld [vmem:[#allocation5 + $0x16f0] sm:$0xff]  ;;  %v6089_v55 = vpack.c.bf16 %v747_v50, %v718_v48  ;;  %v6015_v48 = vpack.c.bf16 %v977_v38, %v948_v37  ;;  %v1241_v37 = vld [vmem:[#allocation5 + $0x2498] sm:$0xff] }
 0x11a   :  { %v6001_v56 = vpack.c.bf16 %v804_v51, %v775_v19  ;;  %v1006_v19 = vld [vmem:[#allocation5 + $0x1d40] sm:$0xff]  ;;  %v1035_v51 = vld [vmem:[#allocation5 + $0x1e28] sm:$0xff] }
 0x11b   :  { %v1270_v38 = vld [vmem:[#allocation5 + $0x2580] sm:$0xff] }
 0x11c   :  { %5984 = vmatpush1.bf16.msra.mxu0 %v5983_v62  ;;  %6074 = vmatpush1.bf16.msra.mxu1 %v6073_v63  ;;  %v805_v62 = vld [vmem:[#allocation5 + $0x16f8] sm:$0xff]  ;;  %v6123_v46 = vpack.c.bf16 %v1270_v38, %v1241_v37  ;;  %v200_v37 = vld [vmem:[#allocation5 + $0x410] sm:$0xff] }
 0x11d   :  { %5986 = vmatprep.subr.bf16.mxu0 %v5985_v0  ;;  %6076 = vmatprep.subr.bf16.mxu1 %v6075_v4  ;;  %v833_v63 = vld [vmem:[#allocation5 + $0x17d8] sm:$0xff]  ;;  %v862_v0 = vld [vmem:[#allocation5 + $0x18c0] sm:$0xff]  ;;  %v6093_v4 = vpack.c.bf16 %v805_v62, %v776_v60  ;;  %v6019_v60 = vpack.c.bf16 %v1035_v51, %v1006_v19  ;;  %v1299_v19 = vld [vmem:[#allocation5 + $0x2668] sm:$0xff] }
 0x11e   :  { %v6005_v5 = vpack.c.bf16 %v862_v0, %v833_v63  ;;  %v1064_v63 = vld [vmem:[#allocation5 + $0x1f10] sm:$0xff]  ;;  %v1093_v0 = vld [vmem:[#allocation5 + $0x1ff8] sm:$0xff] }
 0x11f   :  { %v1328_v51 = vld [vmem:[#allocation5 + $0x2750] sm:$0xf] }
 0x120   :  { %5988 = vmatpush1.bf16.msra.mxu0 %v5987_v12  ;;  %6078 = vmatpush1.bf16.msra.mxu1 %v6077_v13  ;;  %v863_v12 = vld [vmem:[#allocation5 + $0x18c8] sm:$0xff]  ;;  %v6127_v58 = vpack.c.bf16 %v1328_v51, %v1299_v19  ;;  %v258_v19 = vld [vmem:[#allocation5 + $0x5e0] sm:$0xff] }
 0x121   :  { %5990 = vmatprep.subr.bf16.mxu0 %v5989_v15  ;;  %6080 = vmatprep.subr.bf16.mxu1 %v6079_v20  ;;  %v891_v13 = vld [vmem:[#allocation5 + $0x19a8] sm:$0xff]  ;;  %v920_v15 = vld [vmem:[#allocation5 + $0x1a90] sm:$0xff]  ;;  %v6097_v20 = vpack.c.bf16 %v863_v12, %v834_v10  ;;  %v6023_v10 = vpack.c.bf16 %v1093_v0, %v1064_v63  ;;  %v85_v63 = vld [vmem:[#allocation5 + $0x78] sm:$0xff] }
 0x122   :  { %v6009_v23 = vpack.c.bf16 %v920_v15, %v891_v13  ;;  %v1122_v13 = vld [vmem:[#allocation5 + $0x20e0] sm:$0xff]  ;;  %v1151_v15 = vld [vmem:[#allocation5 + $0x21c8] sm:$0xff] }
 0x123   :  { %v114_v0 = vld [vmem:[#allocation5 + $0x160] sm:$0xff] }
 0x124   :  { %5992 = vmatpush1.bf16.msra.mxu0 %v5991_v29  ;;  %6082 = vmatpush1.bf16.msra.mxu1 %v6081_v30  ;;  %v921_v29 = vld [vmem:[#allocation5 + $0x1a98] sm:$0xff]  ;;  %v6223_v9 = vpack.c.bf16 %v114_v0, %v85_v63  ;;  %v316_v63 = vld [vmem:[#allocation5 + $0x7b0] sm:$0xff] }
 0x125   :  { %5994 = vmatprep.subr.bf16.mxu0 %v5993_v31  ;;  %6084 = vmatprep.subr.bf16.mxu1 %v6083_v35  ;;  %v949_v30 = vld [vmem:[#allocation5 + $0x1b78] sm:$0xff]  ;;  %v978_v31 = vld [vmem:[#allocation5 + $0x1c60] sm:$0xff]  ;;  %v6101_v35 = vpack.c.bf16 %v921_v29, %v892_v26  ;;  %v6027_v26 = vpack.c.bf16 %v1151_v15, %v1122_v13  ;;  %v143_v13 = vld [vmem:[#allocation5 + $0x248] sm:$0xff] }
 0x126   :  { %v6013_v36 = vpack.c.bf16 %v978_v31, %v949_v30  ;;  %v1180_v30 = vld [vmem:[#allocation5 + $0x22b0] sm:$0xff]  ;;  %v1209_v31 = vld [vmem:[#allocation5 + $0x2398] sm:$0xff] }
 0x127   :  { %v172_v15 = vld [vmem:[#allocation5 + $0x330] sm:$0xff] }
 0x128   :  { %5996 = vmatpush1.bf16.msra.mxu0 %v5995_v42  ;;  %6086 = vmatpush1.bf16.msra.mxu1 %v6085_v43  ;;  %v979_v42 = vld [vmem:[#allocation5 + $0x1c68] sm:$0xff]  ;;  %v6227_v25 = vpack.c.bf16 %v172_v15, %v143_v13  ;;  %v374_v13 = vld [vmem:[#allocation5 + $0x980] sm:$0xff] }
 0x129   :  { %5998 = vmatprep.subr.bf16.mxu0 %v5997_v44  ;;  %6088 = vmatprep.subr.bf16.mxu1 %v6087_v49  ;;  %v1007_v43 = vld [vmem:[#allocation5 + $0x1d48] sm:$0xff]  ;;  %v1036_v44 = vld [vmem:[#allocation5 + $0x1e30] sm:$0xff]  ;;  %v6105_v49 = vpack.c.bf16 %v979_v42, %v950_v39  ;;  %v6031_v39 = vpack.c.bf16 %v1209_v31, %v1180_v30  ;;  %v201_v30 = vld [vmem:[#allocation5 + $0x418] sm:$0xff] }
 0x12a   :  { %v6017_v50 = vpack.c.bf16 %v1036_v44, %v1007_v43  ;;  %v1238_v43 = vld [vmem:[#allocation5 + $0x2480] sm:$0xff]  ;;  %v1267_v44 = vld [vmem:[#allocation5 + $0x2568] sm:$0xff] }
 0x12b   :  { %v230_v31 = vld [vmem:[#allocation5 + $0x500] sm:$0xff] }
 0x12c   :  { %6000 = vmatpush1.bf16.msra.mxu0 %v5999_v54  ;;  %6090 = vmatpush1.bf16.msra.mxu1 %v6089_v55  ;;  %v1037_v54 = vld [vmem:[#allocation5 + $0x1e38] sm:$0xff]  ;;  %v6231_v38 = vpack.c.bf16 %v230_v31, %v201_v30  ;;  %v432_v30 = vld [vmem:[#allocation5 + $0xb50] sm:$0xff] }
 0x12d   :  { %6002 = vmatprep.subr.bf16.mxu0 %v6001_v56  ;;  %6092 = vmatprep.subr.bf16.mxu1 %v6091_v61  ;;  %v1065_v55 = vld [vmem:[#allocation5 + $0x1f18] sm:$0xff]  ;;  %v1094_v56 = vld [vmem:[#allocation5 + $0x2000] sm:$0xff]  ;;  %v6109_v61 = vpack.c.bf16 %v1037_v54, %v1008_v52  ;;  %v6035_v52 = vpack.c.bf16 %v1267_v44, %v1238_v43  ;;  %v259_v43 = vld [vmem:[#allocation5 + $0x5e8] sm:$0xff] }
 0x12e   :  { %v6021_v62 = vpack.c.bf16 %v1094_v56, %v1065_v55  ;;  %v1296_v55 = vld [vmem:[#allocation5 + $0x2650] sm:$0xff]  ;;  %v1325_v56 = vld [vmem:[#allocation5 + $0x2738] sm:$0xf] }
 0x12f   :  { %v288_v44 = vld [vmem:[#allocation5 + $0x6d0] sm:$0xff] }
 0x130   :  { %6004 = vmatpush1.bf16.msra.mxu0 %v6003_v3  ;;  %6094 = vmatpush1.bf16.msra.mxu1 %v6093_v4  ;;  %v1095_v3 = vld [vmem:[#allocation5 + $0x2008] sm:$0xff]  ;;  %v6235_v51 = vpack.c.bf16 %v288_v44, %v259_v43  ;;  %v490_v43 = vld [vmem:[#allocation5 + $0xd20] sm:$0xff] }
 0x131   :  { %6006 = vmatprep.subr.bf16.mxu0 %v6005_v5  ;;  %6096 = vmatprep.subr.bf16.mxu1 %v6095_v11  ;;  %v1123_v4 = vld [vmem:[#allocation5 + $0x20e8] sm:$0xff]  ;;  %v1152_v5 = vld [vmem:[#allocation5 + $0x21d0] sm:$0xff]  ;;  %v6113_v11 = vpack.c.bf16 %v1095_v3, %v1066_v1  ;;  %v6040_v1 = vpack.c.bf16 %v1325_v56, %v1296_v55  ;;  %v317_v55 = vld [vmem:[#allocation5 + $0x7b8] sm:$0xff] }
 0x132   :  { %v6025_v12 = vpack.c.bf16 %v1152_v5, %v1123_v4  ;;  %v82_v4 = vld [vmem:[#allocation5 + $0x60] sm:$0xff]  ;;  %v111_v5 = vld [vmem:[#allocation5 + $0x148] sm:$0xff] }
 0x133   :  { %v346_v56 = vld [vmem:[#allocation5 + $0x8a0] sm:$0xff] }
 0x134   :  { %6008 = vmatpush1.bf16.msra.mxu0 %v6007_v18  ;;  %6098 = vmatpush1.bf16.msra.mxu1 %v6097_v20  ;;  %v1153_v18 = vld [vmem:[#allocation5 + $0x21d8] sm:$0xff]  ;;  %v6239_v0 = vpack.c.bf16 %v346_v56, %v317_v55  ;;  %v548_v55 = vld [vmem:[#allocation5 + $0xef0] sm:$0xff] }
 0x135   :  { %6010 = vmatprep.subr.bf16.mxu0 %v6009_v23  ;;  %6100 = vmatprep.subr.bf16.mxu1 %v6099_v28  ;;  %v1181_v20 = vld [vmem:[#allocation5 + $0x22b8] sm:$0xff]  ;;  %v1210_v23 = vld [vmem:[#allocation5 + $0x23a0] sm:$0xff]  ;;  %v6117_v28 = vpack.c.bf16 %v1153_v18, %v1124_v16  ;;  %v6135_v16 = vpack.c.bf16 %v111_v5, %v82_v4  ;;  %v375_v4 = vld [vmem:[#allocation5 + $0x988] sm:$0xff] }
 0x136   :  { %v6029_v29 = vpack.c.bf16 %v1210_v23, %v1181_v20  ;;  %v140_v20 = vld [vmem:[#allocation5 + $0x230] sm:$0xff]  ;;  %v169_v23 = vld [vmem:[#allocation5 + $0x318] sm:$0xff] }
 0x137   :  { %v404_v5 = vld [vmem:[#allocation5 + $0xa70] sm:$0xff] }
 0x138   :  { %6012 = vmatpush1.bf16.msra.mxu0 %v6011_v34  ;;  %6102 = vmatpush1.bf16.msra.mxu1 %v6101_v35  ;;  %v1211_v34 = vld [vmem:[#allocation5 + $0x23a8] sm:$0xff]  ;;  %v6243_v15 = vpack.c.bf16 %v404_v5, %v375_v4  ;;  %v604_v4 = vld [vmem:[#allocation5 + $0x10b0] sm:$0xff]  ;;  %v633_v5 = vld [vmem:[#allocation5 + $0x1198] sm:$0xff] }
 0x139   :  { %6014 = vmatprep.subr.bf16.mxu0 %v6013_v36  ;;  %6104 = vmatprep.subr.bf16.mxu1 %v6103_v41  ;;  %v1239_v35 = vld [vmem:[#allocation5 + $0x2488] sm:$0xff]  ;;  %v1268_v36 = vld [vmem:[#allocation5 + $0x2570] sm:$0xff]  ;;  %v6121_v41 = vpack.c.bf16 %v1211_v34, %v1182_v32  ;;  %v6139_v32 = vpack.c.bf16 %v169_v23, %v140_v20  ;;  %v433_v20 = vld [vmem:[#allocation5 + $0xb58] sm:$0xff] }
 0x13a   :  { %v6033_v42 = vpack.c.bf16 %v1268_v36, %v1239_v35  ;;  %v198_v35 = vld [vmem:[#allocation5 + $0x400] sm:$0xff]  ;;  %v227_v36 = vld [vmem:[#allocation5 + $0x4e8] sm:$0xff] }
 0x13b   :  { %v462_v23 = vld [vmem:[#allocation5 + $0xc40] sm:$0xff] }
 0x13c   :  { %6016 = vmatpush1.bf16.msra.mxu0 %v6015_v48  ;;  %6106 = vmatpush1.bf16.msra.mxu1 %v6105_v49  ;;  %v1269_v48 = vld [vmem:[#allocation5 + $0x2578] sm:$0xff]  ;;  %v6247_v31 = vpack.c.bf16 %v462_v23, %v433_v20  ;;  %v6171_v20 = vpack.c.bf16 %v633_v5, %v604_v4  ;;  %v780_v4 = vld [vmem:[#allocation5 + $0x1630] sm:$0xff] }
 0x13d   :  { %6018 = vmatprep.subr.bf16.mxu0 %v6017_v50  ;;  %6108 = vmatprep.subr.bf16.mxu1 %v6107_v53  ;;  %v1297_v49 = vld [vmem:[#allocation5 + $0x2658] sm:$0xff]  ;;  %v1326_v50 = vld [vmem:[#allocation5 + $0x2740] sm:$0xf]  ;;  %v6125_v53 = vpack.c.bf16 %v1269_v48, %v1240_v45  ;;  %v6143_v45 = vpack.c.bf16 %v227_v36, %v198_v35  ;;  %v491_v35 = vld [vmem:[#allocation5 + $0xd28] sm:$0xff] }
 0x13e   :  { %v6037_v54 = vpack.c.bf16 %v1326_v50, %v1297_v49  ;;  %v256_v49 = vld [vmem:[#allocation5 + $0x5d0] sm:$0xff]  ;;  %v285_v50 = vld [vmem:[#allocation5 + $0x6b8] sm:$0xff] }
 0x13f   :  { %2238 = vmatmul.mubr.f32.vlgmr.msra.gmra.mrb[4].mxu0 %v7318_v21  ;;  %2380 = vmatmul.mubr.f32.vlgmr.msra.gmra.mrb[4].mxu1 %v7318_v21  ;;  %v520_v36 = vld [vmem:[#allocation5 + $0xe10] sm:$0xff] }
 0x140   :  { %6020 = vmatpush1.bf16.msra.mxu0 %v6019_v60  ;;  %6110 = vmatpush1.bf16.msra.mxu1 %v6109_v61  ;;  %v1327_v60 = vld [vmem:[#allocation5 + $0x2748] sm:$0xf]  ;;  %v6251_v44 = vpack.c.bf16 %v520_v36, %v491_v35 }
 0x141   :  { %6022 = vmatprep.subr.bf16.mxu0 %v6021_v62  ;;  %6112 = vmatprep.subr.bf16.mxu1 %v6111_v2  ;;  %v83_v61 = vld [vmem:[#allocation5 + $0x68] sm:$0xff]  ;;  %v112_v62 = vld [vmem:[#allocation5 + $0x150] sm:$0xff]  ;;  %v6130_v2 = vpack.c.bf16 %v1327_v60, %v1298_v57  ;;  %v6147_v57 = vpack.c.bf16 %v285_v50, %v256_v49  ;;  %v549_v49 = vld [vmem:[#allocation5 + $0xef8] sm:$0xff] }
 0x142   :  { %2308 = vmatprep.mubr.f32.mxu0 %v8304_v47  ;;  %2450 = vmatprep.mubr.f32.mxu1 %v8304_v47  ;;  %v6133_v3 = vpack.c.bf16 %v112_v62, %v83_v61  ;;  %v314_v61 = vld [vmem:[#allocation5 + $0x7a0] sm:$0xff]  ;;  %v343_v62 = vld [vmem:[#allocation5 + $0x888] sm:$0xff] }
 0x143   :  { %v578_v50 = vld [vmem:[#allocation5 + $0xfe0] sm:$0xff] }
 0x144   :  { %6024 = vmatpush1.bf16.msra.mxu0 %v6023_v10  ;;  %6114 = vmatpush1.bf16.msra.mxu1 %v6113_v11  ;;  %v113_v10 = vld [vmem:[#allocation5 + $0x158] sm:$0xff]  ;;  %v6255_v56 = vpack.c.bf16 %v578_v50, %v549_v49 }
 0x145   :  { %6026 = vmatprep.subr.bf16.mxu0 %v6025_v12  ;;  %6116 = vmatprep.subr.bf16.mxu1 %v6115_v17  ;;  %v141_v11 = vld [vmem:[#allocation5 + $0x238] sm:$0xff]  ;;  %v170_v12 = vld [vmem:[#allocation5 + $0x320] sm:$0xff]  ;;  %v6225_v17 = vpack.c.bf16 %v113_v10, %v84_v7  ;;  %v6151_v7 = vpack.c.bf16 %v343_v62, %v314_v61  ;;  %v607_v61 = vld [vmem:[#allocation5 + $0x10c8] sm:$0xff] }
 0x146   :  { %v6137_v18 = vpack.c.bf16 %v170_v12, %v141_v11  ;;  %v372_v11 = vld [vmem:[#allocation5 + $0x970] sm:$0xff]  ;;  %v401_v12 = vld [vmem:[#allocation5 + $0xa58] sm:$0xff] }
 0x147   :  { %v636_v62 = vld [vmem:[#allocation5 + $0x11b0] sm:$0xff] }
 0x148   :  { %6028 = vmatpush1.bf16.msra.mxu0 %v6027_v26  ;;  %6118 = vmatpush1.bf16.msra.mxu1 %v6117_v28  ;;  %v171_v26 = vld [vmem:[#allocation5 + $0x328] sm:$0xff] }
 0x149   :  { %6030 = vmatprep.subr.bf16.mxu0 %v6029_v29  ;;  %6120 = vmatprep.subr.bf16.mxu1 %v6119_v33  ;;  %v199_v28 = vld [vmem:[#allocation5 + $0x408] sm:$0xff]  ;;  %v228_v29 = vld [vmem:[#allocation5 + $0x4f0] sm:$0xff]  ;;  %v6229_v33 = vpack.c.bf16 %v171_v26, %v142_v24  ;;  %v6155_v24 = vpack.c.bf16 %v401_v12, %v372_v11 }
 0x14a   :  { %v6141_v34 = vpack.c.bf16 %v228_v29, %v199_v28  ;;  %v430_v28 = vld [vmem:[#allocation5 + $0xb40] sm:$0xff]  ;;  %v459_v29 = vld [vmem:[#allocation5 + $0xc28] sm:$0xff]  ;;  %v692_v12 = vld [vmem:[#allocation5 + $0x1370] sm:$0xff] }
 0x14b   :  { %v663_v11 = vld [vmem:[#allocation5 + $0x1288] sm:$0xff] }
 0x14c   :  { %6032 = vmatpush1.bf16.msra.mxu0 %v6031_v39  ;;  %6122 = vmatpush1.bf16.msra.mxu1 %v6121_v41  ;;  %v229_v39 = vld [vmem:[#allocation5 + $0x4f8] sm:$0xff] }
 0x14d   :  { %6034 = vmatprep.subr.bf16.mxu0 %v6033_v42  ;;  %6124 = vmatprep.subr.bf16.mxu1 %v6123_v46  ;;  %v257_v41 = vld [vmem:[#allocation5 + $0x5d8] sm:$0xff]  ;;  %v286_v42 = vld [vmem:[#allocation5 + $0x6c0] sm:$0xff]  ;;  %v6233_v46 = vpack.c.bf16 %v229_v39, %v200_v37  ;;  %v6159_v37 = vpack.c.bf16 %v459_v29, %v430_v28  ;;  %v691_v28 = vld [vmem:[#allocation5 + $0x1368] sm:$0xff] }
 0x14e   :  { %v6145_v48 = vpack.c.bf16 %v286_v42, %v257_v41  ;;  %v488_v41 = vld [vmem:[#allocation5 + $0xd10] sm:$0xff]  ;;  %v517_v42 = vld [vmem:[#allocation5 + $0xdf8] sm:$0xff] }
 0x14f   :  { %v664_v29 = vld [vmem:[#allocation5 + $0x1290] sm:$0xff] }
 0x150   :  { %6036 = vmatpush1.bf16.msra.mxu0 %v6035_v52  ;;  %6126 = vmatpush1.bf16.msra.mxu1 %v6125_v53  ;;  %v287_v52 = vld [vmem:[#allocation5 + $0x6c8] sm:$0xff] }
 0x151   :  { %6039 = vmatprep.subr.msk.bf16.mxu0 %vm7324_vm2, %v6037_v54  ;;  %6129 = vmatprep.subr.msk.bf16.mxu1 %vm7324_vm2, %v6127_v58  ;;  %v315_v53 = vld [vmem:[#allocation5 + $0x7a8] sm:$0xff]  ;;  %v344_v54 = vld [vmem:[#allocation5 + $0x890] sm:$0xff]  ;;  %v6237_v58 = vpack.c.bf16 %v287_v52, %v258_v19  ;;  %v6163_v19 = vpack.c.bf16 %v517_v42, %v488_v41 }
 0x152   :  { %v6149_v60 = vpack.c.bf16 %v344_v54, %v315_v53  ;;  %v546_v53 = vld [vmem:[#allocation5 + $0xee0] sm:$0xff]  ;;  %v575_v54 = vld [vmem:[#allocation5 + $0xfc8] sm:$0xff] }
 0x154   :  { %6042 = vmatpush1.bf16.msk.msra.mxu0 %vm7324_vm2, %v6040_v1  ;;  %6132 = vmatpush1.bf16.msk.msra.mxu1 %vm7324_vm2, %v6130_v2  ;;  %v345_v1 = vld [vmem:[#allocation5 + $0x898] sm:$0xff] }
 0x155   :  { %6134 = vmatprep.subr.bf16.mxu0 %v6133_v3  ;;  %6224 = vmatprep.subr.bf16.mxu1 %v6223_v9  ;;  %v373_v2 = vld [vmem:[#allocation5 + $0x978] sm:$0xff]  ;;  %v402_v3 = vld [vmem:[#allocation5 + $0xa60] sm:$0xff]  ;;  %v6241_v9 = vpack.c.bf16 %v345_v1, %v316_v63  ;;  %v6167_v63 = vpack.c.bf16 %v575_v54, %v546_v53 }
 0x156   :  { %v6153_v10 = vpack.c.bf16 %v402_v3, %v373_v2  ;;  %v7386_v2 = vsub.s32 3, %v7300_v59  ;;  %v4055_v59 = vld [vmem:[#allocation8 + $0x4a0] sm:$0xff] }
 0x157   :  { %5249 = vmatmul.mubr.msk.f32.vlgmr.msra.gmra.mrb[4].mxu0 %vm1514_vm3, %v7337_v40  ;;  %5252 = vmatmul.mubr.msk.f32.vlgmr.msra.gmra.mrb[4].mxu1 %vm1514_vm3, %v7337_v40  ;;  %v8362_v40 = vmov 0.0  }
 0x158   :  { %6136 = vmatpush1.bf16.msra.mxu0 %v6135_v16  ;;  %6226 = vmatpush1.bf16.msra.mxu1 %v6225_v17  ;;  %v403_v16 = vld [vmem:[#allocation5 + $0xa68] sm:$0xff]  ;;  %8354 = vst [vmem:[#allocation22_spill] sm:$0xff] %v7386_v2 }
 0x159   :  { %6138 = vmatprep.subr.bf16.mxu0 %v6137_v18  ;;  %6228 = vmatprep.subr.bf16.mxu1 %v6227_v25  ;;  %v431_v17 = vld [vmem:[#allocation5 + $0xb48] sm:$0xff]  ;;  %v460_v18 = vld [vmem:[#allocation5 + $0xc30] sm:$0xff]  ;;  %v6245_v25 = vpack.c.bf16 %v403_v16, %v374_v13  ;;  %v694_v16 = vld [vmem:[#allocation5 + $0x1380] sm:$0xff] }
 0x15a   :  { %2521 = vmatprep.mubr.f32.mxu0 %v7309_v22  ;;  %2663 = vmatprep.mubr.f32.mxu1 %v7309_v22  ;;  %v6157_v26 = vpack.c.bf16 %v460_v18, %v431_v17 }
 0x15c   :  { %6140 = vmatpush1.bf16.msra.mxu0 %v6139_v32  ;;  %6230 = vmatpush1.bf16.msra.mxu1 %v6229_v33  ;;  %v461_v32 = vld [vmem:[#allocation5 + $0xc38] sm:$0xff] }
 0x15d   :  { %6142 = vmatprep.subr.bf16.mxu0 %v6141_v34  ;;  %6232 = vmatprep.subr.bf16.mxu1 %v6231_v38  ;;  %v489_v33 = vld [vmem:[#allocation5 + $0xd18] sm:$0xff]  ;;  %v518_v34 = vld [vmem:[#allocation5 + $0xe00] sm:$0xff]  ;;  %v6249_v38 = vpack.c.bf16 %v461_v32, %v432_v30 }
 0x15e   :  { %v6161_v39 = vpack.c.bf16 %v518_v34, %v489_v33  ;;  %v693_v32 = vld [vmem:[#allocation5 + $0x1378] sm:$0xff]  ;;  %v750_v34 = vld [vmem:[#allocation5 + $0x1540] sm:$0xff] }
 0x15f   :  { %v721_v33 = vld [vmem:[#allocation5 + $0x1458] sm:$0xff]  ;;  %v6265_v49 = vpack.c.bf16 %v693_v32, %v664_v29  ;;  %v926_v29 = vld [vmem:[#allocation5 + $0x1ac0] sm:$0xff] }
 0x160   :  { %6144 = vmatpush1.bf16.msra.mxu0 %v6143_v45  ;;  %6234 = vmatpush1.bf16.msra.mxu1 %v6233_v46  ;;  %v519_v45 = vld [vmem:[#allocation5 + $0xe08] sm:$0xff]  ;;  %v6177_v50 = vpack.c.bf16 %v750_v34, %v721_v33  ;;  %v894_v34 = vld [vmem:[#allocation5 + $0x19c0] sm:$0xff] }
 0x161   :  { %6146 = vmatprep.subr.bf16.mxu0 %v6145_v48  ;;  %6236 = vmatprep.subr.bf16.mxu1 %v6235_v51  ;;  %v547_v46 = vld [vmem:[#allocation5 + $0xee8] sm:$0xff]  ;;  %v576_v48 = vld [vmem:[#allocation5 + $0xfd0] sm:$0xff]  ;;  %v6253_v51 = vpack.c.bf16 %v519_v45, %v490_v43 }
 0x162   :  { %v6165_v52 = vpack.c.bf16 %v576_v48, %v547_v46  ;;  %v720_v45 = vld [vmem:[#allocation5 + $0x1450] sm:$0xff] }
 0x164   :  { %6148 = vmatpush1.bf16.msra.mxu0 %v6147_v57  ;;  %6238 = vmatpush1.bf16.msra.mxu1 %v6237_v58  ;;  %v577_v57 = vld [vmem:[#allocation5 + $0xfd8] sm:$0xff] }
 0x165   :  { %6150 = vmatprep.subr.bf16.mxu0 %v6149_v60  ;;  %6240 = vmatprep.subr.bf16.mxu1 %v6239_v0  ;;  %v605_v58 = vld [vmem:[#allocation5 + $0x10b8] sm:$0xff]  ;;  %v634_v60 = vld [vmem:[#allocation5 + $0x11a0] sm:$0xff]  ;;  %v6257_v1 = vpack.c.bf16 %v577_v57, %v548_v55  ;;  %v808_v57 = vld [vmem:[#allocation5 + $0x1710] sm:$0xff] }
 0x166   :  { %v1346_v0 = vld [vmem:[#allocation7] sm:$0xff]  ;;  %v6169_v3 = vpack.c.bf16 %v634_v60, %v605_v58  ;;  %v781_v60 = vld [vmem:[#allocation5 + $0x1638] sm:$0xff] }
 0x167   :  { %v1372_v13 = vrot.slane %v1346_v0, %v7314_v6  ;;  %v1380_v17 = vrot.slane %v1346_v0, %v7329_v27  ;;  %v1376_v18 = vrot.slane %v1346_v0, %v7303_v8  ;;  %v1384_v23 = vrot.slane %v1346_v0, %v7386_v2  ;;  %v4024_v27 = vld [vmem:[#allocation8 + $0x3a8] sm:$0xff] }
 0x168   :  { %6152 = vmatpush1.bf16.msra.mxu0 %v6151_v7  ;;  %6242 = vmatpush1.bf16.msra.mxu1 %v6241_v9  ;;  %v606_v7 = vld [vmem:[#allocation5 + $0x10c0] sm:$0xff]  ;;  %v6259_v9 = vpack.c.bf16 %v636_v62, %v607_v61 }
 0x169   :  { %6154 = vmatprep.subr.bf16.mxu0 %v6153_v10  ;;  %6244 = vmatprep.subr.bf16.mxu1 %v6243_v15  ;;  %v635_v10 = vld [vmem:[#allocation5 + $0x11a8] sm:$0xff]  ;;  %v665_v15 = vld [vmem:[#allocation5 + $0x1298] sm:$0xff]  ;;  %v810_v61 = vld [vmem:[#allocation5 + $0x1720] sm:$0xff] }
 0x16a   :  { %v6271_v5 = vpack.c.bf16 %v810_v61, %v781_v60  ;;  %v1040_v61 = vld [vmem:[#allocation5 + $0x1e50] sm:$0xff] }
 0x16c   :  { %6156 = vmatpush1.bf16.msra.mxu0 %v6155_v24  ;;  %6246 = vmatpush1.bf16.msra.mxu1 %v6245_v25  ;;  %v6261_v24 = vpack.c.bf16 %v635_v10, %v606_v7  ;;  %v6173_v25 = vpack.c.bf16 %v692_v12, %v663_v11  ;;  %v809_v7 = vld [vmem:[#allocation5 + $0x1718] sm:$0xff]  ;;  %v866_v10 = vld [vmem:[#allocation5 + $0x18e0] sm:$0xff]  ;;  %v839_v11 = vld [vmem:[#allocation5 + $0x1808] sm:$0xff] }
 0x16d   :  { %6158 = vmatprep.subr.bf16.mxu0 %v6157_v26  ;;  %6248 = vmatprep.subr.bf16.mxu1 %v6247_v31  ;;  %v662_v26 = vld [vmem:[#allocation5 + $0x1280] sm:$0xff]  ;;  %v6263_v31 = vpack.c.bf16 %v694_v16, %v665_v15  ;;  %v868_v12 = vld [vmem:[#allocation5 + $0x18f0] sm:$0xff]  ;;  %v6273_v15 = vpack.c.bf16 %v809_v7, %v780_v4  ;;  %v7398_v4 = vld [vmem:[#allocation5 + $0x1e58] sm:$0xff] }
 0x16e   :  { %v7400_v7 = vld [vmem:[#allocation5 + $0x1f38] sm:$0xff] }
 0x170   :  { %6160 = vmatpush1.bf16.msra.mxu0 %v6159_v37  ;;  %6250 = vmatpush1.bf16.msra.mxu1 %v6249_v38  ;;  %v723_v38 = vld [vmem:[#allocation5 + $0x1468] sm:$0xff] }
 0x171   :  { %6162 = vmatprep.subr.bf16.mxu0 %v6161_v39  ;;  %6252 = vmatprep.subr.bf16.mxu1 %v6251_v44  ;;  %v752_v39 = vld [vmem:[#allocation5 + $0x1550] sm:$0xff]  ;;  %v6175_v44 = vpack.c.bf16 %v691_v28, %v662_v26  ;;  %v897_v28 = vld [vmem:[#allocation5 + $0x19d8] sm:$0xff] }
 0x172   :  { %v6267_v55 = vpack.c.bf16 %v752_v39, %v723_v38  ;;  %v924_v26 = vld [vmem:[#allocation5 + $0x1ab0] sm:$0xff]  ;;  %v6279_v39 = vpack.c.bf16 %v926_v29, %v897_v28  ;;  %v7426_v28 = vld [vmem:[#allocation5 + $0x21e8] sm:$0xff] }
 0x174   :  { %6164 = vmatpush1.bf16.msra.mxu0 %v6163_v19  ;;  %6254 = vmatpush1.bf16.msra.mxu1 %v6253_v51  ;;  %v749_v19 = vld [vmem:[#allocation5 + $0x1538] sm:$0xff]  ;;  %v722_v51 = vld [vmem:[#allocation5 + $0x1460] sm:$0xff] }
 0x175   :  { %6166 = vmatprep.subr.bf16.mxu0 %v6165_v52  ;;  %6256 = vmatprep.subr.bf16.mxu1 %v6255_v56  ;;  %v751_v52 = vld [vmem:[#allocation5 + $0x1548] sm:$0xff]  ;;  %v6179_v62 = vpack.c.bf16 %v749_v19, %v720_v45 }
 0x176   :  { %v779_v56 = vld [vmem:[#allocation5 + $0x1628] sm:$0xff] }
 0x177   :  { %v6181_v0 = vpack.c.bf16 %v808_v57, %v779_v56  ;;  %v954_v56 = vld [vmem:[#allocation5 + $0x1ba0] sm:$0xff]  ;;  %v983_v57 = vld [vmem:[#allocation5 + $0x1c88] sm:$0xff] }
 0x178   :  { %6168 = vmatpush1.bf16.msra.mxu0 %v6167_v63  ;;  %6258 = vmatpush1.bf16.msra.mxu1 %v6257_v1  ;;  %v6269_v63 = vpack.c.bf16 %v751_v52, %v722_v51  ;;  %v778_v1 = vld [vmem:[#allocation5 + $0x1620] sm:$0xff]  ;;  %v952_v51 = vld [vmem:[#allocation5 + $0x1b90] sm:$0xff]  ;;  %v981_v52 = vld [vmem:[#allocation5 + $0x1c78] sm:$0xff] }
 0x179   :  { %6170 = vmatprep.subr.bf16.mxu0 %v6169_v3  ;;  %6260 = vmatprep.subr.bf16.mxu1 %v6259_v9  ;;  %v807_v3 = vld [vmem:[#allocation5 + $0x1708] sm:$0xff]  ;;  %v837_v9 = vld [vmem:[#allocation5 + $0x17f8] sm:$0xff] }
 0x17a   :  { %v1742_v30 = vpop.f32.mrb[0].mxu0  ;;  %v1884_v36 = vpop.f32.mrb[0].mxu1  ;;  %v6185_v16 = vpack.c.bf16 %v866_v10, %v837_v9  ;;  %v7402_v9 = vld [vmem:[#allocation5 + $0x2020] sm:$0xff]  ;;  %v7404_v10 = vld [vmem:[#allocation5 + $0x1f48] sm:$0xff] }
 0x17b   :  { %v6904_v35 = vadd.f32 %v1742_v30, %v1372_v13  ;;  %v1744_v37 = vpop.f32.mrb[1].mxu0  ;;  %v6906_v41 = vadd.f32 %v1884_v36, %v1380_v17  ;;  %v1886_v43 = vpop.f32.mrb[1].mxu1  ;;  %v6183_v13 = vpack.c.bf16 %v807_v3, %v778_v1  ;;  %v836_v17 = vld [vmem:[#allocation5 + $0x17f0] sm:$0xff]  ;;  %v7394_v1 = vld [vmem:[#allocation5 + $0x1e48] sm:$0xff] }
 0x17c   :  { %v6905_v42 = vadd.f32 %v1744_v37, %v1376_v18  ;;  %6172 = vmatpush1.bf16.msra.mxu0 %v6171_v20  ;;  %v6907_v48 = vadd.f32 %v1886_v43, %v1384_v23  ;;  %6262 = vmatpush1.bf16.msra.mxu1 %v6261_v24  ;;  %v865_v18 = vld [vmem:[#allocation5 + $0x18d8] sm:$0xff]  ;;  %v838_v20 = vld [vmem:[#allocation5 + $0x1800] sm:$0xff]  ;;  %v6275_v23 = vpack.c.bf16 %v868_v12, %v839_v11  ;;  %v867_v24 = vld [vmem:[#allocation5 + $0x18e8] sm:$0xff] }
 0x17d   :  { %v5279_v46 = vmul.f32 -1.442695, %v6904_v35  ;;  %6174 = vmatprep.subr.bf16.mxu0 %v6173_v25  ;;  %v5281_v53 = vmul.f32 -1.442695, %v6906_v41  ;;  %6264 = vmatprep.subr.bf16.mxu1 %v6263_v31  ;;  %v895_v25 = vld [vmem:[#allocation5 + $0x19c8] sm:$0xff]  ;;  %v6187_v30 = vpack.c.bf16 %v865_v18, %v836_v17  ;;  %v6277_v32 = vpack.c.bf16 %v867_v24, %v838_v20  ;;  %v896_v36 = vld [vmem:[#allocation5 + $0x19d0] sm:$0xff] }
 0x17e   :  { %v5280_v54 = vmul.f32 -1.442695, %v6905_v42  ;;  %v5282_v58 = vmul.f32 -1.442695, %v6907_v48  ;;  %v6189_v33 = vpack.c.bf16 %v924_v26, %v895_v25  ;;  %v923_v35 = vld [vmem:[#allocation5 + $0x1aa8] sm:$0xff]  ;;  %v925_v41 = vld [vmem:[#allocation5 + $0x1ab8] sm:$0xff] }
 0x17f   :  { %6973 = vpow2.f32 %v5279_v46  ;;  %v953_v42 = vld [vmem:[#allocation5 + $0x1b98] sm:$0xff]  ;;  %v982_v43 = vld [vmem:[#allocation5 + $0x1c80] sm:$0xff]  ;;  %v955_v46 = vld [vmem:[#allocation5 + $0x1ba8] sm:$0xff]  ;;  %v6191_v19 = vpack.c.bf16 %v923_v35, %v894_v34 }
 0x180   :  { %6975 = vpow2.f32 %v5281_v53  ;;  %6176 = vmatpush1.bf16.msra.mxu0 %v6175_v44  ;;  %6266 = vmatpush1.bf16.msra.mxu1 %v6265_v49  ;;  %v984_v48 = vld [vmem:[#allocation5 + $0x1c90] sm:$0xff]  ;;  %v7412_v17 = vld [vmem:[#allocation5 + $0x1f40] sm:$0xff]  ;;  %v7414_v18 = vld [vmem:[#allocation5 + $0x2028] sm:$0xff] }
 0x181   :  { %6977 = vpow2.f32 %v5280_v54  ;;  %6178 = vmatprep.subr.bf16.mxu0 %v6177_v50  ;;  %6268 = vmatprep.subr.bf16.mxu1 %v6267_v55  ;;  %v6281_v54 = vpack.c.bf16 %v925_v41, %v896_v36  ;;  %v6193_v55 = vpack.c.bf16 %v982_v43, %v953_v42  ;;  %v6283_v60 = vpack.c.bf16 %v984_v48, %v955_v46  ;;  %v7396_v3 = vld [vmem:[#allocation5 + $0x1d70] sm:$0xff]  ;;  %v7416_v20 = vld [vmem:[#allocation5 + $0x2108] sm:$0xff]  ;;  %v7420_v24 = vld [vmem:[#allocation5 + $0x2118] sm:$0xff] }
 0x182   :  { %6979 = vpow2.f32 %v5282_v58  ;;  %v1011_v58 = vld [vmem:[#allocation5 + $0x1d68] sm:$0xff]  ;;  %v7406_v11 = vld [vmem:[#allocation5 + $0x2030] sm:$0xff]  ;;  %v7422_v25 = vld [vmem:[#allocation5 + $0x2200] sm:$0xff] }
 0x183   :  { %v7408_v12 = vld [vmem:[#allocation5 + $0x1f30] sm:$0xff]  ;;  %v7424_v26 = vld [vmem:[#allocation5 + $0x2100] sm:$0xff]  ;;  %v7436_v34 = vld [vmem:[#allocation5 + $0x22e8] sm:$0xff] }
 0x184   :  { %6180 = vmatpush1.bf16.msra.mxu0 %v6179_v62  ;;  %6270 = vmatpush1.bf16.msra.mxu1 %v6269_v63  ;;  %v1013_v62 = vld [vmem:[#allocation5 + $0x1d78] sm:$0xff]  ;;  %v1042_v63 = vld [vmem:[#allocation5 + $0x1e60] sm:$0xff]  ;;  %v7438_v35 = vld [vmem:[#allocation5 + $0x23d0] sm:$0xff] }
 0x185   :  { %6182 = vmatprep.subr.bf16.mxu0 %v6181_v0  ;;  %6272 = vmatprep.subr.bf16.mxu1 %v6271_v5  ;;  %v7392_v0 = vld [vmem:[#allocation5 + $0x1d60] sm:$0xff]  ;;  %v6195_v5 = vpack.c.bf16 %v981_v52, %v952_v51  ;;  %v6287_v29 = vpack.c.bf16 %v1042_v63, %v1013_v62  ;;  %v7440_v36 = vld [vmem:[#allocation5 + $0x22d0] sm:$0xff]  ;;  %v7446_v41 = vld [vmem:[#allocation5 + $0x23b8] sm:$0xff] }
 0x186   :  { %v7448_v42 = vld [vmem:[#allocation5 + $0x22e0] sm:$0xff]  ;;  %v7450_v43 = vld [vmem:[#allocation5 + $0x23c8] sm:$0xff]  ;;  %v3994_v46 = vld [vmem:[#allocation8 + $0x2b8] sm:$0xff] }
 0x187   :  { %v4023_v48 = vld [vmem:[#allocation8 + $0x3a0] sm:$0xff]  ;;  %v7458_v51 = vld [vmem:[#allocation5 + $0x24a8] sm:$0xff]  ;;  %v7460_v52 = vld [vmem:[#allocation5 + $0x2590] sm:$0xff] }
 0x188   :  { %6184 = vmatpush1.bf16.msra.mxu0 %v6183_v13  ;;  %6274 = vmatpush1.bf16.msra.mxu1 %v6273_v15  ;;  %v7410_v13 = vld [vmem:[#allocation5 + $0x2018] sm:$0xff]  ;;  %v6285_v15 = vpack.c.bf16 %v983_v57, %v954_v56  ;;  %v7476_v62 = vld [vmem:[#allocation5 + $0x2588] sm:$0xff] }
 0x189   :  { %v6974_v31 = vpop.eup %6973  ;;  %6186 = vmatprep.subr.bf16.mxu0 %v6185_v16  ;;  %6276 = vmatprep.subr.bf16.mxu1 %v6275_v23  ;;  %v6197_v16 = vpack.c.bf16 %v1040_v61, %v1011_v58  ;;  %v7418_v23 = vld [vmem:[#allocation5 + $0x21f0] sm:$0xff]  ;;  %v7474_v61 = vld [vmem:[#allocation5 + $0x24a0] sm:$0xff] }
 0x18a   :  { %v6976_v37 = vpop.eup %6975  ;;  %v3820_v38 = vadd.f32 1.0, %v6974_v31  ;;  %v7430_v31 = vld [vmem:[#allocation5 + $0x21f8] sm:$0xff]  ;;  %v6205_v56 = vpack.c.bf16 %v7418_v23, %v7416_v20  ;;  %v3937_v57 = vld [vmem:[#allocation8 + $0xf0] sm:$0xff] }
 0x18b   :  { %v6978_v44 = vpop.eup %6977  ;;  %v3822_v45 = vadd.f32 1.0, %v6976_v37  ;;  %v3907_v37 = vld [vmem:[#allocation8] sm:$0xff] }
 0x18c   :  { %v6980_v49 = vpop.eup %6979  ;;  %6981 = vrcp.f32 %v3820_v38  ;;  %v3821_v50 = vadd.f32 1.0, %v6978_v44  ;;  %6188 = vmatpush1.bf16.msra.mxu0 %v6187_v30  ;;  %6278 = vmatpush1.bf16.msra.mxu1 %v6277_v32  ;;  %v7428_v30 = vld [vmem:[#allocation5 + $0x2110] sm:$0xff]  ;;  %v7432_v32 = vld [vmem:[#allocation5 + $0x22d8] sm:$0xff]  ;;  %v6199_v38 = vpack.c.bf16 %v7394_v1, %v7392_v0  ;;  %v3936_v44 = vld [vmem:[#allocation8 + $0xe8] sm:$0xff] }
 0x18d   :  { %6983 = vrcp.f32 %v3822_v45  ;;  %v3823_v53 = vadd.f32 1.0, %v6980_v49  ;;  %6190 = vmatprep.subr.bf16.mxu0 %v6189_v33  ;;  %6280 = vmatprep.subr.bf16.mxu1 %v6279_v39  ;;  %v7434_v33 = vld [vmem:[#allocation5 + $0x23c0] sm:$0xff]  ;;  %v6289_v39 = vpack.c.bf16 %v7398_v4, %v7396_v3  ;;  %v3965_v45 = vld [vmem:[#allocation8 + $0x1d0] sm:$0xff]  ;;  %v6201_v49 = vpack.c.bf16 %v7402_v9, %v7400_v7  ;;  %v4054_v9 = vld [vmem:[#allocation8 + $0x498] sm:$0xff] }
 0x18e   :  { %6985 = vrcp.f32 %v3821_v50  ;;  %v6291_v50 = vpack.c.bf16 %v7406_v11, %v7404_v10  ;;  %v4052_v0 = vld [vmem:[#allocation8 + $0x488] sm:$0xff]  ;;  %v4081_v1 = vld [vmem:[#allocation8 + $0x570] sm:$0x1]  ;;  %v3938_v11 = vld [vmem:[#allocation8 + $0xf8] sm:$0xff] }
 0x18f   :  { %6987 = vrcp.f32 %v3823_v53  ;;  %v7462_v53 = vld [vmem:[#allocation5 + $0x24b8] sm:$0xff]  ;;  %v3909_v4 = vld [vmem:[#allocation8 + $0x10] sm:$0xff] }
 0x190   :  { %6192 = vmatpush1.bf16.msra.mxu0 %v6191_v19  ;;  %6282 = vmatpush1.bf16.msra.mxu1 %v6281_v54  ;;  %v4083_v7 = vld [vmem:[#allocation8 + $0x580] sm:$0x1]  ;;  %v3966_v19 = vld [vmem:[#allocation8 + $0x1d8] sm:$0xff] }
 0x191   :  { %6194 = vmatprep.subr.bf16.mxu0 %v6193_v55  ;;  %6284 = vmatprep.subr.bf16.mxu1 %v6283_v60  ;;  %v6293_v55 = vpack.c.bf16 %v7414_v18, %v7412_v17  ;;  %v7472_v60 = vld [vmem:[#allocation5 + $0x25a0] sm:$0xff] }
 0x194   :  { %6196 = vmatpush1.bf16.msra.mxu0 %v6195_v5  ;;  %6286 = vmatpush1.bf16.msra.mxu1 %v6285_v15  ;;  %v3967_v15 = vld [vmem:[#allocation8 + $0x1e0] sm:$0xff]  ;;  %v4053_v5 = vld [vmem:[#allocation8 + $0x490] sm:$0xff] }
 0x195   :  { %6198 = vmatprep.subr.bf16.mxu0 %v6197_v16  ;;  %6288 = vmatprep.subr.bf16.mxu1 %v6287_v29  ;;  %v3996_v16 = vld [vmem:[#allocation8 + $0x2c8] sm:$0xff] }
 0x196   :  { %v6982_v54 = vpop.eup %6981 }
 0x197   :  { %v6984_v63 = vpop.eup %6983  ;;  %v4113_v3 = vrot.slane %v6982_v54, %v7314_v6  ;;  %2522 = vmatmul.mubr.f32.vlgmr.msra.gmra.mrb[6].mxu0 %v7318_v21  ;;  %2664 = vmatmul.mubr.f32.vlgmr.msra.gmra.mrb[6].mxu1 %v7318_v21  ;;  %v4025_v54 = vld [vmem:[#allocation8 + $0x3b0] sm:$0xff] }
 0x198   :  { %v6986_v10 = vpop.eup %6985  ;;  %v4121_v17 = vrot.slane %v6984_v63, %v7314_v6  ;;  %6200 = vmatpush1.bf16.msra.mxu0 %v6199_v38  ;;  %6290 = vmatpush1.bf16.msra.mxu1 %v6289_v39  ;;  %v3995_v38 = vld [vmem:[#allocation8 + $0x2c0] sm:$0xff] }
 0x199   :  { %v6988_v23 = vpop.eup %6987  ;;  %v7492_v29 = vmul.f32 %v4113_v3, %v3907_v37  ;;  %v4255_v18 = vmul.f32 %v4113_v3, %v3936_v44  ;;  %v4284_v58 = vmul.f32 %v4113_v3, %v3965_v45  ;;  %v4313_v47 = vmul.f32 %v4113_v3, %v3994_v46  ;;  %v3908_v37 = vld [vmem:[#allocation8 + $0x8] sm:$0xff]  ;;  %6202 = vmatprep.subr.bf16.mxu0 %v6201_v49  ;;  %v4082_v46 = vld [vmem:[#allocation8 + $0x578] sm:$0x1] }
 0x19a   :  { %v7500_v20 = vmul.f32 %v4113_v3, %v4023_v48  ;;  %v7502_v2 = vmul.f32 %v4113_v3, %v4052_v0  ;;  %v7504_v39 = vmul.f32 %v4113_v3, %v4081_v1  ;;  %v7506_v63 = vmul.f32 %v4121_v17, %v3909_v4  ;;  %6292 = vmatprep.subr.bf16.mxu1 %v6291_v50  ;;  %v3910_v0 = vld [vmem:[#allocation8 + $0x18] sm:$0xff] }
 0x19b   :  { %v7508_v8 = vmul.f32 %v4121_v17, %v3938_v11  ;;  %v7510_v44 = vmul.f32 %v4121_v17, %v3967_v15  ;;  %v7512_v45 = vmul.f32 %v4121_v17, %v3996_v16  ;;  %v4117_v48 = vrot.slane %v6986_v10, %v7314_v6  ;;  %2592 = vmatprep.mubr.f32.mxu0 %v8362_v40 }
 0x19c   :  { %v8355_v49 = vmov 0  ;;  %v4125_v1 = vrot.slane %v6988_v23, %v7314_v6  ;;  %v8358_v3 = vpack.c.bf16 %v7410_v13, %v7408_v12  ;;  %v7525_v50 = vmul.f32 %v4121_v17, %v4025_v54  ;;  %6294 = vmatpush1.bf16.msra.mxu1 %v6293_v55  ;;  %v3939_v12 = vld [vmem:[#allocation8 + $0x100] sm:$0xff]  ;;  %v3968_v13 = vld [vmem:[#allocation8 + $0x1e8] sm:$0xff]  ;;  %v4026_v6 = vld [vmem:[#allocation8 + $0x3b8] sm:$0xff]  ;;  %2734 = vmatprep.mubr.f32.mxu1 %v8362_v40 }
 0x19d   :  { %v8356_v49 = vsel %vm7517_vm8, 4294967295, %v8355_v49  ;;  %v7527_v4 = vmul.f32 %v4121_v17, %v4054_v9  ;;  %v7529_v11 = vmul.f32 %v4121_v17, %v4083_v7  ;;  %v4227_v15 = vmul.f32 %v4117_v48, %v3908_v37 }
 0x19e   :  { %8357 = vst [vmem:[#allocation23_spill] sm:$0xff] %v8356_v49  ;;  %6204 = vmatpush1.bf16.msra.mxu0 %v8358_v3  ;;  %v4256_v16 = vmul.f32 %v4117_v48, %v3937_v57  ;;  %v4285_v23 = vmul.f32 %v4117_v48, %v3966_v19  ;;  %v4314_v21 = vmul.f32 %v4117_v48, %v3995_v38  ;;  %v3997_v3 = vld [vmem:[#allocation8 + $0x2d0] sm:$0xff]  ;;  %v3912_v49 = vld [vmem:[#allocation8 + $0x28] sm:$0xff] }
 0x19f   :  { %6206 = vmatprep.subr.bf16.mxu0 %v6205_v56  ;;  %v8361_v9 = vpack.c.bf16 %v7422_v25, %v7420_v24  ;;  %v4343_v7 = vmul.f32 %v4117_v48, %v4024_v27  ;;  %v4372_v17 = vmul.f32 %v4117_v48, %v4053_v5  ;;  %v4401_v54 = vmul.f32 %v4117_v48, %v4082_v46  ;;  %v5171_v27 = vld [vmem:[#allocation10 + $0x2b8] sm:$0x11]  ;;  %v4084_v25 = vld [vmem:[#allocation8 + $0x588] sm:$0x1]  ;;  %v1330_v48 = vld [vmem:[#allocation5 + $0x2760] sm:$0xf] }
 0x1a0   :  { %v4229_v22 = vmul.f32 %v4125_v1, %v3910_v0  ;;  %v5413_v55 = vpack.c.bf16 %v4227_v15, %v7492_v29  ;;  %v5428_v56 = vpack.c.bf16 %v4256_v16, %v4255_v18  ;;  %v5443_v19 = vpack.c.bf16 %v4285_v23, %v4284_v58  ;;  %v1244_v29 = vld [vmem:[#allocation5 + $0x24b0] sm:$0xff] }
 0x1a1   :  { %6296 = vmatprep.subr.bf16.mxu1 %v8361_v9  ;;  %v5458_v57 = vpack.c.bf16 %v4314_v21, %v4313_v47  ;;  %v8365_v5 = vpack.c.bf16 %v7426_v28, %v7424_v26  ;;  %v5473_v38 = vpack.c.bf16 %v4343_v7, %v7500_v20  ;;  %v5488_v18 = vpack.c.bf16 %v4372_v17, %v7502_v2  ;;  %v1273_v2 = vld [vmem:[#allocation5 + $0x2598] sm:$0xff]  ;;  %v86_v7 = vld [vmem:[#allocation5 + $0x80] sm:$0xff]  ;;  %v115_v17 = vld [vmem:[#allocation5 + $0x168] sm:$0xff] }
 0x1a2   :  { %v5503_v21 = vpack.c.bf16 %v4401_v54, %v7504_v39  ;;  %v4258_v47 = vmul.f32 %v4125_v1, %v3939_v12  ;;  %v8366_v58 = vpack.c.bf16 %v7430_v31, %v7428_v30  ;;  %5074 = vst [vmem:[#allocation10] sm:$0xff] %v5413_v55  ;;  %5089 = vst [vmem:[#allocation10 + $0x74] sm:$0xff] %v5428_v56  ;;  %v1301_v39 = vld [vmem:[#allocation5 + $0x2678] sm:$0xff]  ;;  %v118_v12 = vld [vmem:[#allocation5 + $0x180] sm:$0xff] }
 0x1a3   :  { %6208 = vmatpush1.bf16.msra.mxu0 %v8365_v5  ;;  %5104 = vst [vmem:[#allocation10 + $0xe8] sm:$0xff] %v5443_v19  ;;  %5119 = vst [vmem:[#allocation10 + $0x15c] sm:$0xff] %v5458_v57  ;;  %v4287_v37 = vmul.f32 %v4125_v1, %v3968_v13  ;;  %v4316_v46 = vmul.f32 %v4125_v1, %v3997_v3  ;;  %v4345_v26 = vmul.f32 %v4125_v1, %v4026_v6  ;;  %v1303_v6 = vld [vmem:[#allocation5 + $0x2688] sm:$0xff]  ;;  %v88_v54 = vld [vmem:[#allocation5 + $0x90] sm:$0xff] }
 0x1a4   :  { %6298 = vmatpush1.bf16.msra.mxu1 %v8366_v58  ;;  %v4374_v28 = vmul.f32 %v4125_v1, %v4055_v59  ;;  %v8367_v20 = vpack.c.bf16 %v7434_v33, %v7432_v32  ;;  %5134 = vst [vmem:[#allocation10 + $0x1d0] sm:$0xff] %v5473_v38  ;;  %5149 = vst [vmem:[#allocation10 + $0x244] sm:$0xff] %v5488_v18  ;;  %v5172_v30 = vsel %vm7546_vm10, %v5503_v21, %v5171_v27  ;;  %v1332_v32 = vld [vmem:[#allocation5 + $0x2770] sm:$0xf]  ;;  %v117_v55 = vld [vmem:[#allocation5 + $0x178] sm:$0xff] }
 0x1a5   :  { %v4403_v31 = vmul.f32 %v4125_v1, %v4084_v25  ;;  %v5414_v0 = vpack.c.bf16 %v4229_v22, %v7506_v63  ;;  %v5429_v10 = vpack.c.bf16 %v4258_v47, %v7508_v8  ;;  %v8368_v59 = vpack.c.bf16 %v7438_v35, %v7436_v34  ;;  %5173 = vst [vmem:[#allocation10 + $0x2b8] sm:$0x11] %v5172_v30  ;;  %v5174_v1 = vld [vmem:[#allocation10 + $0x2c0] sm:$0x11]  ;;  %v174_v19 = vld [vmem:[#allocation5 + $0x340] sm:$0xff]  ;;  %v147_v57 = vld [vmem:[#allocation5 + $0x268] sm:$0xff] }
 0x1a6   :  { %6210 = vmatprep.subr.bf16.mxu0 %v8367_v20  ;;  %v5444_v33 = vpack.c.bf16 %v4287_v37, %v7510_v44  ;;  %v5459_v15 = vpack.c.bf16 %v4316_v46, %v7512_v45  ;;  %v5474_v16 = vpack.c.bf16 %v4345_v26, %v7525_v50  ;;  %v5489_v23 = vpack.c.bf16 %v4374_v28, %v7527_v4  ;;  %v1300_v45 = vld [vmem:[#allocation5 + $0x2670] sm:$0xff]  ;;  %v1329_v50 = vld [vmem:[#allocation5 + $0x2758] sm:$0xf]  ;;  %v1302_v4 = vld [vmem:[#allocation5 + $0x2680] sm:$0xff] }
 0x1a7   :  { %6300 = vmatprep.subr.bf16.mxu1 %v8368_v59  ;;  %v8369_v22 = vpack.c.bf16 %v7446_v41, %v7440_v36  ;;  %v5504_v8 = vpack.c.bf16 %v4403_v31, %v7529_v11  ;;  %5075 = vst [vmem:[#allocation10 + $0x8] sm:$0xff] %v5414_v0  ;;  %5090 = vst [vmem:[#allocation10 + $0x7c] sm:$0xff] %v5429_v10  ;;  %v8370_v34 = vpack.c.bf16 %v7450_v43, %v7448_v42  ;;  %v1331_v42 = vld [vmem:[#allocation5 + $0x2768] sm:$0xf]  ;;  %v89_v11 = vld [vmem:[#allocation5 + $0x98] sm:$0xff] }
 0x1a8   :  { %v8371_v35 = vpack.c.bf16 %v7460_v52, %v7458_v51  ;;  %v6305_v63 = vpack.c.bf16 %v1273_v2, %v1244_v29  ;;  %v6217_v44 = vpack.c.bf16 %v1330_v48, %v1301_v39  ;;  %5105 = vst [vmem:[#allocation10 + $0xf0] sm:$0xff] %v5444_v33  ;;  %5120 = vst [vmem:[#allocation10 + $0x164] sm:$0xff] %v5459_v15  ;;  %v87_v43 = vld [vmem:[#allocation5 + $0x88] sm:$0xff]  ;;  %v116_v51 = vld [vmem:[#allocation5 + $0x170] sm:$0xff] }
 0x1a9   :  { %6212 = vmatpush1.bf16.msra.mxu0 %v8369_v22  ;;  %6302 = vmatpush1.bf16.msra.mxu1 %v8370_v34  ;;  %5135 = vst [vmem:[#allocation10 + $0x1d8] sm:$0xff] %v5474_v16  ;;  %5150 = vst [vmem:[#allocation10 + $0x24c] sm:$0xff] %v5489_v23  ;;  %v8372_v36 = vpack.c.bf16 %v7472_v60, %v7462_v53  ;;  %v6307_v41 = vpack.c.bf16 %v1332_v32, %v1303_v6  ;;  %v145_v56 = vld [vmem:[#allocation5 + $0x258] sm:$0xff]  ;;  %v144_v5 = vld [vmem:[#allocation5 + $0x250] sm:$0xff] }
 0x1aa   :  { %6214 = vmatprep.subr.bf16.mxu0 %v8371_v35  ;;  %v5175_v52 = vsel %vm7546_vm10, %v5504_v8, %v5174_v1  ;;  %v8373_v13 = vpack.c.bf16 %v7476_v62, %v7474_v61  ;;  %v6220_v9 = vpack.c.bf16 %v1329_v50, %v1300_v45  ;;  %v6310_v53 = vpack.c.bf16 %v1331_v42, %v1302_v4  ;;  %v176_v61 = vld [vmem:[#allocation5 + $0x350] sm:$0xff]  ;;  %v173_v38 = vld [vmem:[#allocation5 + $0x338] sm:$0xff]  ;;  %v146_v18 = vld [vmem:[#allocation5 + $0x260] sm:$0xff] }
 0x1ab   :  { %6304 = vmatprep.subr.bf16.mxu1 %v8372_v36  ;;  %5176 = vst [vmem:[#allocation10 + $0x2c0] sm:$0x11] %v5175_v52  ;;  %v6313_v60 = vpack.c.bf16 %v116_v51, %v87_v43  ;;  %v6403_v3 = vpack.c.bf16 %v118_v12, %v89_v11  ;;  %v6315_v62 = vpack.c.bf16 %v115_v17, %v86_v7  ;;  %v175_v47 = vld [vmem:[#allocation5 + $0x348] sm:$0xff]  ;;  %v232_v29 = vld [vmem:[#allocation5 + $0x510] sm:$0xff]  ;;  %v205_v46 = vld [vmem:[#allocation5 + $0x438] sm:$0xff] }
 0x1ac   :  { %v6405_v27 = vpack.c.bf16 %v117_v55, %v88_v54  ;;  %v6317_v25 = vpack.c.bf16 %v174_v19, %v145_v56  ;;  %v6407_v21 = vpack.c.bf16 %v176_v61, %v147_v57  ;;  %v203_v58 = vld [vmem:[#allocation5 + $0x428] sm:$0xff]  ;;  %v8374_v37 = vld [vmem:[#allocation21_spill] sm:$0xff]  ;;  %v234_v26 = vld [vmem:[#allocation5 + $0x520] sm:$0xff]  ;;  %v6319_v28 = vpack.c.bf16 %v173_v38, %v144_v5 }
 0x1ad   :  { %6216 = vmatpush1.bf16.msra.mxu0 %v8373_v13  ;;  %6306 = vmatpush1.bf16.msra.mxu1 %v6305_v63  ;;  %v6409_v20 = vpack.c.bf16 %v175_v47, %v146_v18  ;;  %v6321_v2 = vpack.c.bf16 %v232_v29, %v203_v58  ;;  %v202_v39 = vld [vmem:[#allocation5 + $0x420] sm:$0xff]  ;;  %v231_v48 = vld [vmem:[#allocation5 + $0x508] sm:$0xff]  ;;  %v204_v30 = vld [vmem:[#allocation5 + $0x430] sm:$0xff]  ;;  %v6411_v31 = vpack.c.bf16 %v234_v26, %v205_v46 }
 0x1ae   :  { %6219 = vmatprep.subr.msk.bf16.mxu0 %vm7324_vm2, %v6217_v44  ;;  %6309 = vmatprep.subr.msk.bf16.mxu1 %vm7324_vm2, %v6307_v41  ;;  %v233_v0 = vld [vmem:[#allocation5 + $0x518] sm:$0xff]  ;;  %v290_v59 = vld [vmem:[#allocation5 + $0x6e0] sm:$0xff]  ;;  %v263_v32 = vld [vmem:[#allocation5 + $0x608] sm:$0xff]  ;;  %v6323_v15 = vpack.c.bf16 %v231_v48, %v202_v39 }
 0x1af   :  { %v261_v10 = vld [vmem:[#allocation5 + $0x5f8] sm:$0xff]  ;;  %v292_v33 = vld [vmem:[#allocation5 + $0x6f0] sm:$0xff]  ;;  %v6413_v16 = vpack.c.bf16 %v233_v0, %v204_v30  ;;  %v262_v8 = vld [vmem:[#allocation5 + $0x600] sm:$0xff] }
 0x1b0   :  { %v8375_v6 = vld [vmem:[#allocation17_spill] sm:$0xff]  ;;  %v6325_v23 = vpack.c.bf16 %v290_v59, %v261_v10  ;;  %v6415_v34 = vpack.c.bf16 %v292_v33, %v263_v32  ;;  %v291_v35 = vld [vmem:[#allocation5 + $0x6e8] sm:$0xff]  ;;  %v350_v50 = vld [vmem:[#allocation5 + $0x8c0] sm:$0xff] }
 0x1b1   :  { %6222 = vmatpush1.bf16.msk.msra.mxu0 %vm7324_vm2, %v6220_v9  ;;  %6312 = vmatpush1.bf16.msk.msra.mxu1 %vm7324_vm2, %v6310_v53  ;;  %v260_v1 = vld [vmem:[#allocation5 + $0x5f0] sm:$0xff]  ;;  %v289_v22 = vld [vmem:[#allocation5 + $0x6d8] sm:$0xff]  ;;  %v319_v63 = vld [vmem:[#allocation5 + $0x7c8] sm:$0xff]  ;;  %v6417_v36 = vpack.c.bf16 %v291_v35, %v262_v8 }
 0x1b2   :  { %6314 = vmatprep.subr.bf16.mxu0 %v6313_v60  ;;  %6404 = vmatprep.subr.bf16.mxu1 %v6403_v3  ;;  %v348_v44 = vld [vmem:[#allocation5 + $0x8b0] sm:$0xff]  ;;  %v321_v45 = vld [vmem:[#allocation5 + $0x7d8] sm:$0xff]  ;;  %v6327_v4 = vpack.c.bf16 %v289_v22, %v260_v1  ;;  %v318_v42 = vld [vmem:[#allocation5 + $0x7c0] sm:$0xff] }
 0x1b3   :  { %v6329_v41 = vpack.c.bf16 %v348_v44, %v319_v63  ;;  %v347_v43 = vld [vmem:[#allocation5 + $0x8a8] sm:$0xff]  ;;  %v320_v51 = vld [vmem:[#allocation5 + $0x7d0] sm:$0xff]  ;;  %v6419_v52 = vpack.c.bf16 %v350_v50, %v321_v45  ;;  %v349_v11 = vld [vmem:[#allocation5 + $0x8b8] sm:$0xff] }
 0x1b4   :  { %5255 = vmatmul.mubr.msk.f32.vlgmr.msra.gmra.mrb[6].mxu0 %vm1514_vm3, %v8374_v37  ;;  %5258 = vmatmul.mubr.msk.f32.vlgmr.msra.gmra.mrb[6].mxu1 %vm1514_vm3, %v8374_v37  ;;  %v377_v12 = vld [vmem:[#allocation5 + $0x998] sm:$0xff]  ;;  %v406_v13 = vld [vmem:[#allocation5 + $0xa80] sm:$0xff]  ;;  %v379_v9 = vld [vmem:[#allocation5 + $0x9a8] sm:$0xff]  ;;  %v6331_v60 = vpack.c.bf16 %v347_v43, %v318_v42  ;;  %v6421_v7 = vpack.c.bf16 %v349_v11, %v320_v51 }
 0x1b5   :  { %6316 = vmatpush1.bf16.msra.mxu0 %v6315_v62  ;;  %6406 = vmatpush1.bf16.msra.mxu1 %v6405_v27  ;;  %v408_v53 = vld [vmem:[#allocation5 + $0xa90] sm:$0xff]  ;;  %v6333_v17 = vpack.c.bf16 %v406_v13, %v377_v12  ;;  %v405_v3 = vld [vmem:[#allocation5 + $0xa78] sm:$0xff]  ;;  %v378_v55 = vld [vmem:[#allocation5 + $0x9a0] sm:$0xff] }
 0x1b6   :  { %6318 = vmatprep.subr.bf16.mxu0 %v6317_v25  ;;  %6408 = vmatprep.subr.bf16.mxu1 %v6407_v21  ;;  %v376_v54 = vld [vmem:[#allocation5 + $0x990] sm:$0xff]  ;;  %v6423_v56 = vpack.c.bf16 %v408_v53, %v379_v9  ;;  %v407_v19 = vld [vmem:[#allocation5 + $0xa88] sm:$0xff]  ;;  %v437_v62 = vld [vmem:[#allocation5 + $0xb78] sm:$0xff] }
 0x1b7   :  { %2805 = vmatprep.mubr.f32.mxu0 %v8375_v6  ;;  %2947 = vmatprep.mubr.f32.mxu1 %v8375_v6  ;;  %v435_v57 = vld [vmem:[#allocation5 + $0xb68] sm:$0xff]  ;;  %v464_v61 = vld [vmem:[#allocation5 + $0xc50] sm:$0xff]  ;;  %v466_v27 = vld [vmem:[#allocation5 + $0xc60] sm:$0xff]  ;;  %v6335_v25 = vpack.c.bf16 %v405_v3, %v376_v54  ;;  %v6425_v5 = vpack.c.bf16 %v407_v19, %v378_v55 }
 0x1b8   :  { %v6337_v38 = vpack.c.bf16 %v464_v61, %v435_v57  ;;  %v434_v18 = vld [vmem:[#allocation5 + $0xb60] sm:$0xff]  ;;  %v463_v21 = vld [vmem:[#allocation5 + $0xc48] sm:$0xff]  ;;  %v436_v47 = vld [vmem:[#allocation5 + $0xb70] sm:$0xff]  ;;  %v6427_v58 = vpack.c.bf16 %v466_v27, %v437_v62 }
 0x1b9   :  { %6320 = vmatpush1.bf16.msra.mxu0 %v6319_v28  ;;  %6410 = vmatpush1.bf16.msra.mxu1 %v6409_v20  ;;  %v465_v29 = vld [vmem:[#allocation5 + $0xc58] sm:$0xff]  ;;  %v522_v26 = vld [vmem:[#allocation5 + $0xe20] sm:$0xff]  ;;  %v495_v28 = vld [vmem:[#allocation5 + $0xd48] sm:$0xff] }
 0x1ba   :  { %6322 = vmatprep.subr.bf16.mxu0 %v6321_v2  ;;  %6412 = vmatprep.subr.bf16.mxu1 %v6411_v31  ;;  %v493_v46 = vld [vmem:[#allocation5 + $0xd38] sm:$0xff]  ;;  %v524_v20 = vld [vmem:[#allocation5 + $0xe30] sm:$0xff]  ;;  %v6339_v2 = vpack.c.bf16 %v463_v21, %v434_v18  ;;  %v6429_v39 = vpack.c.bf16 %v465_v29, %v436_v47  ;;  %v494_v0 = vld [vmem:[#allocation5 + $0xd40] sm:$0xff] }
 0x1bb   :  { %v6341_v48 = vpack.c.bf16 %v522_v26, %v493_v46  ;;  %v492_v30 = vld [vmem:[#allocation5 + $0xd30] sm:$0xff]  ;;  %v521_v31 = vld [vmem:[#allocation5 + $0xe18] sm:$0xff]  ;;  %v6431_v10 = vpack.c.bf16 %v524_v20, %v495_v28  ;;  %v523_v59 = vld [vmem:[#allocation5 + $0xe28] sm:$0xff] }
 0x1bc   :  { %v551_v32 = vld [vmem:[#allocation5 + $0xf08] sm:$0xff]  ;;  %v580_v33 = vld [vmem:[#allocation5 + $0xff0] sm:$0xff]  ;;  %v6433_v1 = vpack.c.bf16 %v523_v59, %v494_v0  ;;  %v550_v8 = vld [vmem:[#allocation5 + $0xf00] sm:$0xff] }
 0x1bd   :  { %6324 = vmatpush1.bf16.msra.mxu0 %v6323_v15  ;;  %6414 = vmatpush1.bf16.msra.mxu1 %v6413_v16  ;;  %v553_v15 = vld [vmem:[#allocation5 + $0xf18] sm:$0xff]  ;;  %v582_v16 = vld [vmem:[#allocation5 + $0x1000] sm:$0xff]  ;;  %v6345_v22 = vpack.c.bf16 %v580_v33, %v551_v32  ;;  %v552_v35 = vld [vmem:[#allocation5 + $0xf10] sm:$0xff] }
 0x1be   :  { %6326 = vmatprep.subr.bf16.mxu0 %v6325_v23  ;;  %6416 = vmatprep.subr.bf16.mxu1 %v6415_v34  ;;  %v6343_v23 = vpack.c.bf16 %v521_v31, %v492_v30  ;;  %v579_v34 = vld [vmem:[#allocation5 + $0xfe8] sm:$0xff]  ;;  %v6435_v63 = vpack.c.bf16 %v582_v16, %v553_v15  ;;  %v581_v44 = vld [vmem:[#allocation5 + $0xff8] sm:$0xff]  ;;  %v638_v50 = vld [vmem:[#allocation5 + $0x11c0] sm:$0xff] }
 0x1bf   :  { %v609_v45 = vld [vmem:[#allocation5 + $0x10d8] sm:$0xff]  ;;  %v640_v42 = vld [vmem:[#allocation5 + $0x11d0] sm:$0xff]  ;;  %v6347_v43 = vpack.c.bf16 %v579_v34, %v550_v8  ;;  %v6437_v11 = vpack.c.bf16 %v581_v44, %v552_v35  ;;  %v667_v54 = vld [vmem:[#allocation5 + $0x12a8] sm:$0xff] }
 0x1c0   :  { %v6349_v13 = vpack.c.bf16 %v638_v50, %v609_v45  ;;  %v608_v9 = vld [vmem:[#allocation5 + $0x10d0] sm:$0xff]  ;;  %v637_v53 = vld [vmem:[#allocation5 + $0x11b8] sm:$0xff]  ;;  %v7089_v55 = vld [vmem:[#allocation7] sm:$0xff] }
 0x1c1   :  { %6328 = vmatpush1.bf16.msra.mxu0 %v6327_v4  ;;  %6418 = vmatpush1.bf16.msra.mxu1 %v6417_v36  ;;  %v8376_v4 = vld [vmem:[#allocation15_spill] sm:$0xff]  ;;  %v696_v3 = vld [vmem:[#allocation5 + $0x1390] sm:$0xff]  ;;  %v669_v19 = vld [vmem:[#allocation5 + $0x12b8] sm:$0xff]  ;;  %v6351_v27 = vpack.c.bf16 %v637_v53, %v608_v9 }
 0x1c2   :  { %6330 = vmatprep.subr.bf16.mxu0 %v6329_v41  ;;  %6420 = vmatprep.subr.bf16.mxu1 %v6419_v52  ;;  %v7607_v36 = vsub.s32 4, %v8376_v4  ;;  %v611_v41 = vld [vmem:[#allocation5 + $0x10e8] sm:$0xff]  ;;  %v7610_v51 = vsub.s32 6, %v8376_v4  ;;  %v7613_v52 = vsub.s32 5, %v8376_v4  ;;  %v7616_v12 = vsub.s32 7, %v8376_v4  ;;  %v698_v57 = vld [vmem:[#allocation5 + $0x13a0] sm:$0xff] }
 0x1c3   :  { %v666_v18 = vld [vmem:[#allocation5 + $0x12a0] sm:$0xff]  ;;  %v695_v21 = vld [vmem:[#allocation5 + $0x1388] sm:$0xff]  ;;  %v668_v47 = vld [vmem:[#allocation5 + $0x12b0] sm:$0xff]  ;;  %v6443_v29 = vpack.c.bf16 %v698_v57, %v669_v19 }
 0x1c4   :  { %8377 = vst [vmem:[#allocation15_spill] sm:$0xff] %v7607_v36  ;;  %8378 = vst [vmem:[#allocation24_spill] sm:$0xff] %v7610_v51  ;;  %v1396_v61 = vrot.slane %v7089_v55, %v7610_v51  ;;  %v1392_v62 = vrot.slane %v7089_v55, %v7613_v52  ;;  %v697_v46 = vld [vmem:[#allocation5 + $0x1398] sm:$0xff]  ;;  %v754_v28 = vld [vmem:[#allocation5 + $0x1560] sm:$0xff]  ;;  %v6355_v59 = vpack.c.bf16 %v695_v21, %v666_v18 }
 0x1c5   :  { %6332 = vmatpush1.bf16.msra.mxu0 %v6331_v60  ;;  %6422 = vmatpush1.bf16.msra.mxu1 %v6421_v7  ;;  %8379 = vst [vmem:[#allocation25_spill] sm:$0xff] %v7613_v52  ;;  %8380 = vst [vmem:[#allocation26_spill] sm:$0xff] %v7616_v12  ;;  %v610_v60 = vld [vmem:[#allocation5 + $0x10e0] sm:$0xff]  ;;  %v6439_v7 = vpack.c.bf16 %v640_v42, %v611_v41  ;;  %v725_v26 = vld [vmem:[#allocation5 + $0x1478] sm:$0xff]  ;;  %v6445_v16 = vpack.c.bf16 %v697_v46, %v668_v47 }
 0x1c6   :  { %6334 = vmatprep.subr.bf16.mxu0 %v6333_v17  ;;  %6424 = vmatprep.subr.bf16.mxu1 %v6423_v56  ;;  %v639_v17 = vld [vmem:[#allocation5 + $0x11c8] sm:$0xff]  ;;  %v1388_v56 = vrot.slane %v7089_v55, %v7607_v36  ;;  %v756_v30 = vld [vmem:[#allocation5 + $0x1570] sm:$0xff]  ;;  %v785_v4 = vld [vmem:[#allocation5 + $0x1658] sm:$0xff] }
 0x1c7   :  { %v724_v32 = vld [vmem:[#allocation5 + $0x1470] sm:$0xff]  ;;  %v755_v8 = vld [vmem:[#allocation5 + $0x1568] sm:$0xff]  ;;  %v814_v41 = vld [vmem:[#allocation5 + $0x1740] sm:$0xff] }
 0x1c8   :  { %v783_v44 = vld [vmem:[#allocation5 + $0x1648] sm:$0xff]  ;;  %v812_v45 = vld [vmem:[#allocation5 + $0x1730] sm:$0xff]  ;;  %v901_v21 = vld [vmem:[#allocation5 + $0x19f8] sm:$0xff] }
 0x1c9   :  { %6336 = vmatpush1.bf16.msra.mxu0 %v6335_v25  ;;  %6426 = vmatpush1.bf16.msra.mxu1 %v6425_v5  ;;  %v1400_v25 = vrot.slane %v7089_v55, %v7616_v12  ;;  %v6441_v5 = vpack.c.bf16 %v639_v17, %v610_v60  ;;  %v811_v9 = vld [vmem:[#allocation5 + $0x1728] sm:$0xff]  ;;  %v784_v53 = vld [vmem:[#allocation5 + $0x1650] sm:$0xff]  ;;  %v6451_v60 = vpack.c.bf16 %v814_v41, %v785_v4  ;;  %v841_v17 = vld [vmem:[#allocation5 + $0x1818] sm:$0xff] }
 0x1ca   :  { %6338 = vmatprep.subr.bf16.mxu0 %v6337_v38  ;;  %6428 = vmatprep.subr.bf16.mxu1 %v6427_v58  ;;  %v6353_v38 = vpack.c.bf16 %v696_v3, %v667_v54  ;;  %v870_v54 = vld [vmem:[#allocation5 + $0x1900] sm:$0xff]  ;;  %v843_v3 = vld [vmem:[#allocation5 + $0x1828] sm:$0xff]  ;;  %v872_v55 = vld [vmem:[#allocation5 + $0x1910] sm:$0xff] }
 0x1cb   :  { %v6365_v57 = vpack.c.bf16 %v870_v54, %v841_v17  ;;  %v928_v18 = vld [vmem:[#allocation5 + $0x1ad0] sm:$0xff]  ;;  %v930_v47 = vld [vmem:[#allocation5 + $0x1ae0] sm:$0xff]  ;;  %v7634_v54 = vld [vmem:[#allocation5 + $0x1f68] sm:$0xff] }
 0x1cc   :  { %v1044_v41 = vld [vmem:[#allocation5 + $0x1e70] sm:$0xff]  ;;  %v7632_v17 = vld [vmem:[#allocation5 + $0x2040] sm:$0xff] }
 0x1cd   :  { %6340 = vmatpush1.bf16.msra.mxu0 %v6339_v2  ;;  %6430 = vmatpush1.bf16.msra.mxu1 %v6429_v39  ;;  %v3941_v12 = vld [vmem:[#allocation8 + $0x110] sm:$0xff]  ;;  %v3999_v36 = vld [vmem:[#allocation8 + $0x2e0] sm:$0xff]  ;;  %v3972_v37 = vld [vmem:[#allocation8 + $0x208] sm:$0xff] }
 0x1ce   :  { %6342 = vmatprep.subr.bf16.mxu0 %v6341_v48  ;;  %6432 = vmatprep.subr.bf16.mxu1 %v6431_v10  ;;  %v727_v48 = vld [vmem:[#allocation5 + $0x1488] sm:$0xff] }
 0x1d1   :  { %6344 = vmatpush1.bf16.msra.mxu0 %v6343_v23  ;;  %6434 = vmatpush1.bf16.msra.mxu1 %v6433_v1  ;;  %v6357_v23 = vpack.c.bf16 %v754_v28, %v725_v26  ;;  %v753_v1 = vld [vmem:[#allocation5 + $0x1558] sm:$0xff]  ;;  %v898_v28 = vld [vmem:[#allocation5 + $0x19e0] sm:$0xff] }
 0x1d2   :  { %6346 = vmatprep.subr.bf16.mxu0 %v6345_v22  ;;  %6436 = vmatprep.subr.bf16.mxu1 %v6435_v63  ;;  %v2026_v58 = vpop.f32.mrb[2].mxu0  ;;  %v2168_v2 = vpop.f32.mrb[2].mxu1  ;;  %v726_v22 = vld [vmem:[#allocation5 + $0x1480] sm:$0xff]  ;;  %v6447_v63 = vpack.c.bf16 %v756_v30, %v727_v48  ;;  %v6359_v42 = vpack.c.bf16 %v753_v1, %v724_v32  ;;  %v6459_v30 = vpack.c.bf16 %v930_v47, %v901_v21  ;;  %v7656_v21 = vld [vmem:[#allocation5 + $0x2208] sm:$0xff] }
 0x1d3   :  { %v6908_v20 = vadd.f32 %v2026_v58, %v1388_v56  ;;  %v2028_v39 = vpop.f32.mrb[3].mxu0  ;;  %v6910_v31 = vadd.f32 %v2168_v2, %v1396_v61  ;;  %v2170_v10 = vpop.f32.mrb[3].mxu1  ;;  %v840_v61 = vld [vmem:[#allocation5 + $0x1810] sm:$0xff] }
 0x1d4   :  { %v6909_v0 = vadd.f32 %v2028_v39, %v1392_v62  ;;  %v6911_v15 = vadd.f32 %v2170_v10, %v1400_v25  ;;  %v869_v62 = vld [vmem:[#allocation5 + $0x18f8] sm:$0xff]  ;;  %v6455_v25 = vpack.c.bf16 %v872_v55, %v843_v3  ;;  %v900_v2 = vld [vmem:[#allocation5 + $0x19f0] sm:$0xff]  ;;  %v986_v10 = vld [vmem:[#allocation5 + $0x1ca0] sm:$0xff] }
 0x1d5   :  { %6348 = vmatpush1.bf16.msra.mxu0 %v6347_v43  ;;  %6438 = vmatpush1.bf16.msra.mxu1 %v6437_v11  ;;  %v5283_v33 = vmul.f32 -1.442695, %v6908_v20  ;;  %v5285_v34 = vmul.f32 -1.442695, %v6910_v31  ;;  %v6449_v43 = vpack.c.bf16 %v755_v8, %v726_v22  ;;  %v6361_v11 = vpack.c.bf16 %v812_v45, %v783_v44  ;;  %v927_v20 = vld [vmem:[#allocation5 + $0x1ac8] sm:$0xff]  ;;  %v929_v31 = vld [vmem:[#allocation5 + $0x1ad8] sm:$0xff] }
 0x1d6   :  { %6350 = vmatprep.subr.bf16.mxu0 %v6349_v13  ;;  %6440 = vmatprep.subr.bf16.mxu1 %v6439_v7  ;;  %v5284_v35 = vmul.f32 -1.442695, %v6909_v0  ;;  %v5286_v50 = vmul.f32 -1.442695, %v6911_v15  ;;  %v782_v13 = vld [vmem:[#allocation5 + $0x1640] sm:$0xff]  ;;  %v813_v7 = vld [vmem:[#allocation5 + $0x1738] sm:$0xff]  ;;  %v6367_v58 = vpack.c.bf16 %v869_v62, %v840_v61  ;;  %v6371_v1 = vpack.c.bf16 %v927_v20, %v898_v28 }
 0x1d7   :  { %6989 = vpow2.f32 %v5283_v33  ;;  %v6363_v56 = vpack.c.bf16 %v811_v9, %v782_v13  ;;  %v6453_v19 = vpack.c.bf16 %v813_v7, %v784_v53  ;;  %v957_v0 = vld [vmem:[#allocation5 + $0x1bb8] sm:$0xff]  ;;  %v959_v33 = vld [vmem:[#allocation5 + $0x1bc8] sm:$0xff]  ;;  %v988_v15 = vld [vmem:[#allocation5 + $0x1cb0] sm:$0xff] }
 0x1d8   :  { %6991 = vpow2.f32 %v5285_v34  ;;  %v956_v22 = vld [vmem:[#allocation5 + $0x1bb0] sm:$0xff]  ;;  %v985_v8 = vld [vmem:[#allocation5 + $0x1c98] sm:$0xff]  ;;  %v958_v44 = vld [vmem:[#allocation5 + $0x1bc0] sm:$0xff]  ;;  %v6463_v4 = vpack.c.bf16 %v988_v15, %v959_v33 }
 0x1d9   :  { %6352 = vmatpush1.bf16.msra.mxu0 %v6351_v27  ;;  %6442 = vmatpush1.bf16.msra.mxu1 %v6441_v5  ;;  %6993 = vpow2.f32 %v5284_v35  ;;  %v842_v27 = vld [vmem:[#allocation5 + $0x1820] sm:$0xff]  ;;  %v871_v5 = vld [vmem:[#allocation5 + $0x1908] sm:$0xff]  ;;  %v6461_v35 = vpack.c.bf16 %v929_v31, %v900_v2  ;;  %v7626_v9 = vld [vmem:[#allocation5 + $0x1d90] sm:$0xff] }
 0x1da   :  { %6354 = vmatprep.subr.bf16.mxu0 %v6353_v38  ;;  %6444 = vmatprep.subr.bf16.mxu1 %v6443_v29  ;;  %6995 = vpow2.f32 %v5286_v50  ;;  %v899_v38 = vld [vmem:[#allocation5 + $0x19e8] sm:$0xff]  ;;  %v6457_v46 = vpack.c.bf16 %v871_v5, %v842_v27  ;;  %v7628_v53 = vld [vmem:[#allocation5 + $0x1e78] sm:$0xff]  ;;  %v7636_v3 = vld [vmem:[#allocation5 + $0x2050] sm:$0xff] }
 0x1db   :  { %v6369_v26 = vpack.c.bf16 %v928_v18, %v899_v38  ;;  %v987_v45 = vld [vmem:[#allocation5 + $0x1ca8] sm:$0xff]  ;;  %v7630_v7 = vld [vmem:[#allocation5 + $0x1f58] sm:$0xff]  ;;  %v7638_v55 = vld [vmem:[#allocation5 + $0x1f50] sm:$0xff] }
 0x1dc   :  { %v1015_v50 = vld [vmem:[#allocation5 + $0x1d88] sm:$0xff]  ;;  %v7642_v61 = vld [vmem:[#allocation5 + $0x1f60] sm:$0xff]  ;;  %v7650_v5 = vld [vmem:[#allocation5 + $0x2138] sm:$0xff]  ;;  %v6381_v15 = vpack.c.bf16 %v7632_v17, %v7630_v7 }
 0x1dd   :  { %6356 = vmatpush1.bf16.msra.mxu0 %v6355_v59  ;;  %6446 = vmatpush1.bf16.msra.mxu1 %v6445_v16  ;;  %v7624_v13 = vld [vmem:[#allocation5 + $0x1e68] sm:$0xff]  ;;  %v7652_v38 = vld [vmem:[#allocation5 + $0x2220] sm:$0xff]  ;;  %v7668_v20 = vld [vmem:[#allocation5 + $0x23f0] sm:$0xff] }
 0x1de   :  { %6358 = vmatprep.subr.bf16.mxu0 %v6357_v23  ;;  %6448 = vmatprep.subr.bf16.mxu1 %v6447_v63  ;;  %v6373_v63 = vpack.c.bf16 %v986_v10, %v957_v0  ;;  %v7644_v62 = vld [vmem:[#allocation5 + $0x2048] sm:$0xff]  ;;  %v7654_v18 = vld [vmem:[#allocation5 + $0x2120] sm:$0xff]  ;;  %v7670_v2 = vld [vmem:[#allocation5 + $0x22f0] sm:$0xff] }
 0x1df   :  { %v7646_v27 = vld [vmem:[#allocation5 + $0x2128] sm:$0xff]  ;;  %v7676_v31 = vld [vmem:[#allocation5 + $0x23d8] sm:$0xff]  ;;  %v7678_v0 = vld [vmem:[#allocation5 + $0x2300] sm:$0xff] }
 0x1e0   :  { %v7666_v28 = vld [vmem:[#allocation5 + $0x2308] sm:$0xff]  ;;  %v3998_v33 = vld [vmem:[#allocation8 + $0x2d8] sm:$0xff] }
 0x1e1   :  { %6360 = vmatpush1.bf16.msra.mxu0 %v6359_v42  ;;  %6450 = vmatpush1.bf16.msra.mxu1 %v6449_v43  ;;  %v6990_v29 = vpop.eup %6989  ;;  %v1017_v42 = vld [vmem:[#allocation5 + $0x1d98] sm:$0xff]  ;;  %v1046_v43 = vld [vmem:[#allocation5 + $0x1e80] sm:$0xff]  ;;  %v7680_v10 = vld [vmem:[#allocation5 + $0x23e8] sm:$0xff] }
 0x1e2   :  { %6362 = vmatprep.subr.bf16.mxu0 %v6361_v11  ;;  %6452 = vmatprep.subr.bf16.mxu1 %v6451_v60  ;;  %v6992_v39 = vpop.eup %6991  ;;  %v3824_v48 = vadd.f32 1.0, %v6990_v29  ;;  %v7622_v11 = vld [vmem:[#allocation5 + $0x1d80] sm:$0xff]  ;;  %v6375_v60 = vpack.c.bf16 %v985_v8, %v956_v22  ;;  %v6467_v47 = vpack.c.bf16 %v1046_v43, %v1017_v42  ;;  %v7660_v29 = vld [vmem:[#allocation5 + $0x2218] sm:$0xff]  ;;  %v7690_v22 = vld [vmem:[#allocation5 + $0x25b0] sm:$0xff] }
 0x1e3   :  { %v6994_v59 = vpop.eup %6993  ;;  %v3826_v32 = vadd.f32 1.0, %v6992_v39  ;;  %v3911_v39 = vld [vmem:[#allocation8 + $0x20] sm:$0xff]  ;;  %v4000_v17 = vld [vmem:[#allocation8 + $0x2e8] sm:$0xff]  ;;  %v4058_v7 = vld [vmem:[#allocation8 + $0x4b8] sm:$0xff] }
 0x1e4   :  { %v6996_v16 = vpop.eup %6995  ;;  %6997 = vrcp.f32 %v3824_v48  ;;  %v3825_v23 = vadd.f32 1.0, %v6994_v59  ;;  %v6379_v48 = vpack.c.bf16 %v7624_v13, %v7622_v11  ;;  %v3940_v59 = vld [vmem:[#allocation8 + $0x108] sm:$0xff]  ;;  %v7692_v8 = vld [vmem:[#allocation5 + $0x24d8] sm:$0xff]  ;;  %v4085_v13 = vld [vmem:[#allocation8 + $0x590] sm:$0x1] }
 0x1e5   :  { %6364 = vmatpush1.bf16.msra.mxu0 %v6363_v56  ;;  %6454 = vmatpush1.bf16.msra.mxu1 %v6453_v19  ;;  %6999 = vrcp.f32 %v3826_v32  ;;  %v3827_v34 = vadd.f32 1.0, %v6996_v16  ;;  %v7640_v56 = vld [vmem:[#allocation5 + $0x2038] sm:$0xff]  ;;  %v6465_v19 = vpack.c.bf16 %v987_v45, %v958_v44  ;;  %v3969_v32 = vld [vmem:[#allocation8 + $0x1f0] sm:$0xff]  ;;  %v6471_v16 = vpack.c.bf16 %v7636_v3, %v7634_v54  ;;  %v4056_v11 = vld [vmem:[#allocation8 + $0x4a8] sm:$0xff] }
 0x1e6   :  { %6366 = vmatprep.subr.bf16.mxu0 %v6365_v57  ;;  %6456 = vmatprep.subr.bf16.mxu1 %v6455_v25  ;;  %7001 = vrcp.f32 %v3825_v23  ;;  %v6377_v57 = vpack.c.bf16 %v1044_v41, %v1015_v50  ;;  %v7648_v25 = vld [vmem:[#allocation5 + $0x2210] sm:$0xff]  ;;  %v7702_v50 = vld [vmem:[#allocation5 + $0x25c0] sm:$0xff]  ;;  %v7706_v41 = vld [vmem:[#allocation5 + $0x25a8] sm:$0xff] }
 0x1e7   :  { %7003 = vrcp.f32 %v3827_v34  ;;  %v4027_v43 = vld [vmem:[#allocation8 + $0x3c0] sm:$0xff]  ;;  %v4029_v54 = vld [vmem:[#allocation8 + $0x3d0] sm:$0xff] }
 0x1e9   :  { %6368 = vmatpush1.bf16.msra.mxu0 %v6367_v58  ;;  %6458 = vmatpush1.bf16.msra.mxu1 %v6457_v46  ;;  %v7658_v58 = vld [vmem:[#allocation5 + $0x2130] sm:$0xff]  ;;  %v7662_v46 = vld [vmem:[#allocation5 + $0x22f8] sm:$0xff] }
 0x1ea   :  { %6370 = vmatprep.subr.bf16.mxu0 %v6369_v26  ;;  %6460 = vmatprep.subr.bf16.mxu1 %v6459_v30  ;;  %v7664_v26 = vld [vmem:[#allocation5 + $0x23e0] sm:$0xff]  ;;  %v6469_v30 = vpack.c.bf16 %v7628_v53, %v7626_v9 }
 0x1eb   :  { %v8381_v9 = vld [vmem:[#allocation18_spill] sm:$0xff] }
 0x1ed   :  { %6372 = vmatpush1.bf16.msra.mxu0 %v6371_v1  ;;  %6462 = vmatpush1.bf16.msra.mxu1 %v6461_v35  ;;  %v7688_v1 = vld [vmem:[#allocation5 + $0x24c8] sm:$0xff]  ;;  %v6473_v35 = vpack.c.bf16 %v7644_v62, %v7642_v61  ;;  %v3971_v61 = vld [vmem:[#allocation8 + $0x200] sm:$0xff] }
 0x1ee   :  { %6374 = vmatprep.subr.bf16.mxu0 %v6373_v63  ;;  %6464 = vmatprep.subr.bf16.mxu1 %v6463_v4  ;;  %v6998_v34 = vpop.eup %6997  ;;  %v6385_v63 = vpack.c.bf16 %v7648_v25, %v7646_v27  ;;  %v7704_v4 = vld [vmem:[#allocation5 + $0x24c0] sm:$0xff] }
 0x1ef   :  { %v7000_v42 = vpop.eup %6999  ;;  %v4129_v53 = vrot.slane %v6998_v34, %v8381_v9 }
 0x1f0   :  { %v7002_v3 = vpop.eup %7001  ;;  %v4137_v62 = vrot.slane %v7000_v42, %v8381_v9 }
 0x1f1   :  { %6376 = vmatpush1.bf16.msra.mxu0 %v6375_v60  ;;  %6466 = vmatpush1.bf16.msra.mxu1 %v6465_v19  ;;  %v8382_v60 = vld [vmem:[#allocation19_spill] sm:$0xff]  ;;  %v3913_v19 = vld [vmem:[#allocation8 + $0x30] sm:$0xff]  ;;  %v7722_v34 = vmul.f32 %v4129_v53, %v3911_v39  ;;  %v4259_v27 = vmul.f32 %v4129_v53, %v3940_v59  ;;  %v4288_v44 = vmul.f32 %v4129_v53, %v3969_v32  ;;  %v4087_v39 = vld [vmem:[#allocation8 + $0x5a0] sm:$0x1] }
 0x1f2   :  { %6378 = vmatprep.subr.bf16.mxu0 %v6377_v57  ;;  %6468 = vmatprep.subr.bf16.mxu1 %v6467_v47  ;;  %v3942_v57 = vld [vmem:[#allocation8 + $0x118] sm:$0xff]  ;;  %v7004_v47 = vpop.eup %7003  ;;  %v4317_v23 = vmul.f32 %v4129_v53, %v3998_v33  ;;  %v7730_v25 = vmul.f32 %v4129_v53, %v4027_v43  ;;  %v4375_v52 = vmul.f32 %v4129_v53, %v4056_v11  ;;  %v4057_v33 = vld [vmem:[#allocation8 + $0x4b0] sm:$0xff] }
 0x1f3   :  { %v7734_v51 = vmul.f32 %v4137_v62, %v3913_v19  ;;  %v7736_v45 = vmul.f32 %v4137_v62, %v3942_v57  ;;  %v7738_v59 = vmul.f32 %v4137_v62, %v3971_v61  ;;  %v7740_v32 = vmul.f32 %v4137_v62, %v4000_v17  ;;  %v4086_v43 = vld [vmem:[#allocation8 + $0x598] sm:$0x1] }
 0x1f4   :  { %2806 = vmatmul.mubr.f32.vlgmr.msra.gmra.mrb[8].mxu0 %v8382_v60  ;;  %2948 = vmatmul.mubr.f32.vlgmr.msra.gmra.mrb[8].mxu1 %v8382_v60  ;;  %v4028_v60 = vld [vmem:[#allocation8 + $0x3c8] sm:$0xff]  ;;  %v4133_v42 = vrot.slane %v7002_v3, %v8381_v9  ;;  %v4141_v11 = vrot.slane %v7004_v47, %v8381_v9  ;;  %v7749_v19 = vmul.f32 %v4137_v62, %v4058_v7  ;;  %v3943_v3 = vld [vmem:[#allocation8 + $0x120] sm:$0xff]  ;;  %v4030_v7 = vld [vmem:[#allocation8 + $0x3d8] sm:$0xff] }
 0x1f5   :  { %6380 = vmatpush1.bf16.msra.mxu0 %v6379_v48  ;;  %6470 = vmatpush1.bf16.msra.mxu1 %v6469_v30  ;;  %v7732_v30 = vmul.f32 %v4129_v53, %v4085_v13  ;;  %v3970_v48 = vld [vmem:[#allocation8 + $0x1f8] sm:$0xff]  ;;  %v8383_v13 = vpack.c.bf16 %v7640_v56, %v7638_v55  ;;  %v7747_v53 = vmul.f32 %v4137_v62, %v4029_v54  ;;  %v4059_v9 = vld [vmem:[#allocation8 + $0x4c0] sm:$0xff] }
 0x1f6   :  { %6382 = vmatprep.subr.bf16.mxu0 %v6381_v15  ;;  %6472 = vmatprep.subr.bf16.mxu1 %v6471_v16  ;;  %v3914_v15 = vld [vmem:[#allocation8 + $0x38] sm:$0xff]  ;;  %v7751_v16 = vmul.f32 %v4137_v62, %v4087_v39  ;;  %v4231_v17 = vmul.f32 %v4133_v42, %v3912_v49  ;;  %v4260_v57 = vmul.f32 %v4133_v42, %v3941_v12 }
 0x1f7   :  { %v4289_v61 = vmul.f32 %v4133_v42, %v3970_v48  ;;  %v4318_v6 = vmul.f32 %v4133_v42, %v3999_v36  ;;  %v8384_v47 = vpack.c.bf16 %v7652_v38, %v7650_v5  ;;  %v4347_v55 = vmul.f32 %v4133_v42, %v4028_v60  ;;  %2876 = vmatprep.mubr.f32.mxu0 %v8362_v40  ;;  %v4088_v48 = vld [vmem:[#allocation8 + $0x5a8] sm:$0x1] }
 0x1f8   :  { %v4376_v56 = vmul.f32 %v4133_v42, %v4057_v33  ;;  %v4405_v54 = vmul.f32 %v4133_v42, %v4086_v43  ;;  %v4233_v62 = vmul.f32 %v4141_v11, %v3914_v15  ;;  %v5415_v49 = vpack.c.bf16 %v4231_v17, %v7722_v34  ;;  %v1248_v34 = vld [vmem:[#allocation5 + $0x24d0] sm:$0xff]  ;;  %v1307_v43 = vld [vmem:[#allocation5 + $0x26a8] sm:$0xff]  ;;  %3018 = vmatprep.mubr.f32.mxu1 %v8362_v40 }
 0x1f9   :  { %6384 = vmatpush1.bf16.msra.mxu0 %v8383_v13  ;;  %6474 = vmatpush1.bf16.msra.mxu1 %v6473_v35  ;;  %v4001_v13 = vld [vmem:[#allocation8 + $0x2f0] sm:$0xff]  ;;  %v5430_v12 = vpack.c.bf16 %v4260_v57, %v4259_v27  ;;  %v5445_v35 = vpack.c.bf16 %v4289_v61, %v4288_v44  ;;  %v5460_v36 = vpack.c.bf16 %v4318_v6, %v4317_v23  ;;  %v1305_v27 = vld [vmem:[#allocation5 + $0x2698] sm:$0xff]  ;;  %v1306_v61 = vld [vmem:[#allocation5 + $0x26a0] sm:$0xff] }
 0x1fa   :  { %6386 = vmatprep.subr.bf16.mxu0 %v6385_v63  ;;  %6476 = vmatprep.subr.bf16.mxu1 %v8384_v47  ;;  %v5177_v63 = vld [vmem:[#allocation10 + $0x2c8] sm:$0x11]  ;;  %v8385_v5 = vpack.c.bf16 %v7656_v21, %v7654_v18  ;;  %v5475_v38 = vpack.c.bf16 %v4347_v55, %v7730_v25  ;;  %v5490_v60 = vpack.c.bf16 %v4376_v56, %v4375_v52 }
 0x1fb   :  { %v5505_v42 = vpack.c.bf16 %v4405_v54, %v7732_v30  ;;  %v4262_v39 = vmul.f32 %v4141_v11, %v3943_v3  ;;  %v8386_v33 = vpack.c.bf16 %v7660_v29, %v7658_v58  ;;  %5076 = vst [vmem:[#allocation10 + $0x10] sm:$0xff] %v5415_v49  ;;  %5091 = vst [vmem:[#allocation10 + $0x84] sm:$0xff] %v5430_v12  ;;  %v1277_v52 = vld [vmem:[#allocation5 + $0x25b8] sm:$0xff]  ;;  %v1334_v25 = vld [vmem:[#allocation5 + $0x2780] sm:$0xf] }
 0x1fc   :  { %5106 = vst [vmem:[#allocation10 + $0xf8] sm:$0xff] %v5445_v35  ;;  %5121 = vst [vmem:[#allocation10 + $0x16c] sm:$0xff] %v5460_v36  ;;  %v4291_v6 = vmul.f32 %v4141_v11, %v3972_v37  ;;  %v4320_v23 = vmul.f32 %v4141_v11, %v4001_v13  ;;  %v4349_v44 = vmul.f32 %v4141_v11, %v4030_v7  ;;  %v122_v3 = vld [vmem:[#allocation5 + $0x1a0] sm:$0xff]  ;;  %v119_v54 = vld [vmem:[#allocation5 + $0x188] sm:$0xff] }
 0x1fd   :  { %6388 = vmatpush1.bf16.msra.mxu0 %v8385_v5  ;;  %6478 = vmatpush1.bf16.msra.mxu1 %v8386_v33  ;;  %v4378_v18 = vmul.f32 %v4141_v11, %v4059_v9  ;;  %v8387_v21 = vpack.c.bf16 %v7664_v26, %v7662_v46  ;;  %5136 = vst [vmem:[#allocation10 + $0x1e0] sm:$0xff] %v5475_v38  ;;  %5151 = vst [vmem:[#allocation10 + $0x254] sm:$0xff] %v5490_v60  ;;  %v1336_v46 = vld [vmem:[#allocation5 + $0x2790] sm:$0xf]  ;;  %v90_v56 = vld [vmem:[#allocation5 + $0xa0] sm:$0xff] }
 0x1fe   :  { %v5178_v58 = vsel %vm7546_vm10, %v5505_v42, %v5177_v63  ;;  %v4407_v29 = vmul.f32 %v4141_v11, %v4088_v48  ;;  %v5416_v30 = vpack.c.bf16 %v4233_v62, %v7734_v51  ;;  %v5431_v37 = vpack.c.bf16 %v4262_v39, %v7736_v45  ;;  %v5180_v11 = vld [vmem:[#allocation10 + $0x2d0] sm:$0x11]  ;;  %v92_v13 = vld [vmem:[#allocation5 + $0xb0] sm:$0xff]  ;;  %v121_v62 = vld [vmem:[#allocation5 + $0x198] sm:$0xff] }
 0x1ff   :  { %6390 = vmatprep.subr.bf16.mxu0 %v8387_v21  ;;  %v8388_v9 = vpack.c.bf16 %v7668_v20, %v7666_v28  ;;  %5179 = vst [vmem:[#allocation10 + $0x2c8] sm:$0x11] %v5178_v58  ;;  %v5446_v26 = vpack.c.bf16 %v4291_v6, %v7738_v59  ;;  %v5461_v15 = vpack.c.bf16 %v4320_v23, %v7740_v32  ;;  %v149_v49 = vld [vmem:[#allocation5 + $0x278] sm:$0xff]  ;;  %v178_v12 = vld [vmem:[#allocation5 + $0x360] sm:$0xff]  ;;  %v151_v35 = vld [vmem:[#allocation5 + $0x288] sm:$0xff] }
 0x200   :  { %v5476_v17 = vpack.c.bf16 %v4349_v44, %v7747_v53  ;;  %v5491_v57 = vpack.c.bf16 %v4378_v18, %v7749_v19  ;;  %v8389_v51 = vpack.c.bf16 %v7676_v31, %v7670_v2  ;;  %v5506_v45 = vpack.c.bf16 %v4407_v29, %v7751_v16  ;;  %5077 = vst [vmem:[#allocation10 + $0x18] sm:$0xff] %v5416_v30  ;;  %v1304_v53 = vld [vmem:[#allocation5 + $0x2690] sm:$0xff]  ;;  %v1333_v19 = vld [vmem:[#allocation5 + $0x2778] sm:$0xf]  ;;  %v150_v38 = vld [vmem:[#allocation5 + $0x280] sm:$0xff] }
 0x201   :  { %6480 = vmatprep.subr.bf16.mxu1 %v8388_v9  ;;  %5092 = vst [vmem:[#allocation10 + $0x8c] sm:$0xff] %v5431_v37  ;;  %v8390_v28 = vpack.c.bf16 %v7680_v10, %v7678_v0  ;;  %v8391_v20 = vpack.c.bf16 %v7690_v22, %v7688_v1  ;;  %v6485_v59 = vpack.c.bf16 %v1277_v52, %v1248_v34  ;;  %5107 = vst [vmem:[#allocation10 + $0x100] sm:$0xff] %v5446_v26  ;;  %v1335_v0 = vld [vmem:[#allocation5 + $0x2788] sm:$0xf]  ;;  %v120_v1 = vld [vmem:[#allocation5 + $0x190] sm:$0xff] }
 0x202   :  { %6392 = vmatpush1.bf16.msra.mxu0 %v8389_v51  ;;  %v6397_v32 = vpack.c.bf16 %v1334_v25, %v1305_v27  ;;  %5122 = vst [vmem:[#allocation10 + $0x174] sm:$0xff] %v5461_v15  ;;  %5137 = vst [vmem:[#allocation10 + $0x1e8] sm:$0xff] %v5476_v17  ;;  %v8392_v2 = vpack.c.bf16 %v7702_v50, %v7692_v8  ;;  %v6487_v31 = vpack.c.bf16 %v1336_v46, %v1307_v43  ;;  %v91_v10 = vld [vmem:[#allocation5 + $0xa8] sm:$0xff]  ;;  %v93_v16 = vld [vmem:[#allocation5 + $0xb8] sm:$0xff] }
 0x203   :  { %6482 = vmatpush1.bf16.msra.mxu1 %v8390_v28  ;;  %6394 = vmatprep.subr.bf16.mxu0 %v8391_v20  ;;  %5152 = vst [vmem:[#allocation10 + $0x25c] sm:$0xff] %v5491_v57  ;;  %v5181_v22 = vsel %vm7546_vm10, %v5506_v45, %v5180_v11  ;;  %v8393_v47 = vpack.c.bf16 %v7706_v41, %v7704_v4  ;;  %v180_v4 = vld [vmem:[#allocation5 + $0x370] sm:$0xff]  ;;  %v177_v5 = vld [vmem:[#allocation5 + $0x358] sm:$0xff]  ;;  %v179_v42 = vld [vmem:[#allocation5 + $0x368] sm:$0xff] }
 0x204   :  { %6484 = vmatprep.subr.bf16.mxu1 %v8392_v2  ;;  %5182 = vst [vmem:[#allocation10 + $0x2d0] sm:$0x11] %v5181_v22  ;;  %v6400_v55 = vpack.c.bf16 %v1333_v19, %v1304_v53  ;;  %v6490_v8 = vpack.c.bf16 %v1335_v0, %v1306_v61  ;;  %v6493_v50 = vpack.c.bf16 %v120_v1, %v91_v10  ;;  %v148_v48 = vld [vmem:[#allocation5 + $0x270] sm:$0xff]  ;;  %v207_v39 = vld [vmem:[#allocation5 + $0x448] sm:$0xff]  ;;  %v209_v6 = vld [vmem:[#allocation5 + $0x458] sm:$0xff] }
 0x205   :  { %v6583_v7 = vpack.c.bf16 %v122_v3, %v93_v16  ;;  %v6495_v41 = vpack.c.bf16 %v119_v54, %v90_v56  ;;  %v6585_v36 = vpack.c.bf16 %v121_v62, %v92_v13  ;;  %v6497_v63 = vpack.c.bf16 %v178_v12, %v149_v49  ;;  %v236_v33 = vld [vmem:[#allocation5 + $0x530] sm:$0xff]  ;;  %v238_v23 = vld [vmem:[#allocation5 + $0x540] sm:$0xff]  ;;  %v235_v27 = vld [vmem:[#allocation5 + $0x528] sm:$0xff] }
 0x206   :  { %6396 = vmatpush1.bf16.msra.mxu0 %v8393_v47  ;;  %v6587_v60 = vpack.c.bf16 %v180_v4, %v151_v35  ;;  %v8394_v34 = vld [vmem:[#allocation21_spill] sm:$0xff]  ;;  %v6499_v44 = vpack.c.bf16 %v177_v5, %v148_v48  ;;  %v6589_v18 = vpack.c.bf16 %v179_v42, %v150_v38  ;;  %v6501_v21 = vpack.c.bf16 %v236_v33, %v207_v39  ;;  %v206_v52 = vld [vmem:[#allocation5 + $0x440] sm:$0xff]  ;;  %v267_v43 = vld [vmem:[#allocation5 + $0x628] sm:$0xff] }
 0x207   :  { %6486 = vmatpush1.bf16.msra.mxu1 %v6485_v59  ;;  %6399 = vmatprep.subr.msk.bf16.mxu0 %vm7324_vm2, %v6397_v32  ;;  %v208_v25 = vld [vmem:[#allocation5 + $0x450] sm:$0xff]  ;;  %v6591_v58 = vpack.c.bf16 %v238_v23, %v209_v6  ;;  %v237_v29 = vld [vmem:[#allocation5 + $0x538] sm:$0xff]  ;;  %v294_v37 = vld [vmem:[#allocation5 + $0x700] sm:$0xff]  ;;  %v6503_v26 = vpack.c.bf16 %v235_v27, %v206_v52 }
 0x208   :  { %6489 = vmatprep.subr.msk.bf16.mxu1 %vm7324_vm2, %v6487_v31  ;;  %v265_v30 = vld [vmem:[#allocation5 + $0x618] sm:$0xff]  ;;  %v296_v46 = vld [vmem:[#allocation5 + $0x710] sm:$0xff]  ;;  %v6593_v15 = vpack.c.bf16 %v237_v29, %v208_v25  ;;  %v266_v51 = vld [vmem:[#allocation5 + $0x620] sm:$0xff] }
 0x209   :  { %v8395_v9 = vld [vmem:[#allocation17_spill] sm:$0xff]  ;;  %v6505_v17 = vpack.c.bf16 %v294_v37, %v265_v30  ;;  %v6595_v45 = vpack.c.bf16 %v296_v46, %v267_v43  ;;  %v295_v28 = vld [vmem:[#allocation5 + $0x708] sm:$0xff]  ;;  %v354_v53 = vld [vmem:[#allocation5 + $0x8e0] sm:$0xff] }
 0x20a   :  { %6402 = vmatpush1.bf16.msk.msra.mxu0 %vm7324_vm2, %v6400_v55  ;;  %v264_v57 = vld [vmem:[#allocation5 + $0x610] sm:$0xff]  ;;  %v293_v11 = vld [vmem:[#allocation5 + $0x6f8] sm:$0xff]  ;;  %v323_v20 = vld [vmem:[#allocation5 + $0x7e8] sm:$0xff]  ;;  %v6597_v61 = vpack.c.bf16 %v295_v28, %v266_v51 }
 0x20b   :  { %6492 = vmatpush1.bf16.msk.msra.mxu1 %vm7324_vm2, %v6490_v8  ;;  %6494 = vmatprep.subr.bf16.mxu0 %v6493_v50  ;;  %v352_v59 = vld [vmem:[#allocation5 + $0x8d0] sm:$0xff]  ;;  %v325_v32 = vld [vmem:[#allocation5 + $0x7f8] sm:$0xff]  ;;  %v6507_v19 = vpack.c.bf16 %v293_v11, %v264_v57  ;;  %v322_v31 = vld [vmem:[#allocation5 + $0x7e0] sm:$0xff] }
 0x20c   :  { %6584 = vmatprep.subr.bf16.mxu1 %v6583_v7  ;;  %v6509_v2 = vpack.c.bf16 %v352_v59, %v323_v20  ;;  %v351_v0 = vld [vmem:[#allocation5 + $0x8c8] sm:$0xff]  ;;  %v324_v10 = vld [vmem:[#allocation5 + $0x7f0] sm:$0xff]  ;;  %v6599_v1 = vpack.c.bf16 %v354_v53, %v325_v32  ;;  %v353_v22 = vld [vmem:[#allocation5 + $0x8d8] sm:$0xff] }
 0x20d   :  { %5261 = vmatmul.mubr.msk.f32.vlgmr.msra.gmra.mrb[8].mxu0 %vm1514_vm3, %v8394_v34  ;;  %v381_v16 = vld [vmem:[#allocation5 + $0x9b8] sm:$0xff]  ;;  %v410_v3 = vld [vmem:[#allocation5 + $0xaa0] sm:$0xff]  ;;  %v383_v47 = vld [vmem:[#allocation5 + $0x9c8] sm:$0xff]  ;;  %v6511_v8 = vpack.c.bf16 %v351_v0, %v322_v31  ;;  %v6601_v50 = vpack.c.bf16 %v353_v22, %v324_v10 }
 0x20e   :  { %5264 = vmatmul.mubr.msk.f32.vlgmr.msra.gmra.mrb[8].mxu1 %vm1514_vm3, %v8394_v34  ;;  %6496 = vmatpush1.bf16.msra.mxu0 %v6495_v41  ;;  %v412_v55 = vld [vmem:[#allocation5 + $0xab0] sm:$0xff]  ;;  %v6513_v56 = vpack.c.bf16 %v410_v3, %v381_v16  ;;  %v409_v13 = vld [vmem:[#allocation5 + $0xa98] sm:$0xff]  ;;  %v382_v7 = vld [vmem:[#allocation5 + $0x9c0] sm:$0xff] }
 0x20f   :  { %6586 = vmatpush1.bf16.msra.mxu1 %v6585_v36  ;;  %6498 = vmatprep.subr.bf16.mxu0 %v6497_v63  ;;  %v380_v54 = vld [vmem:[#allocation5 + $0x9b0] sm:$0xff]  ;;  %v6603_v62 = vpack.c.bf16 %v412_v55, %v383_v47  ;;  %v411_v49 = vld [vmem:[#allocation5 + $0xaa8] sm:$0xff]  ;;  %v441_v4 = vld [vmem:[#allocation5 + $0xb98] sm:$0xff] }
 0x210   :  { %6588 = vmatprep.subr.bf16.mxu1 %v6587_v60  ;;  %3089 = vmatprep.mubr.f32.mxu0 %v8395_v9  ;;  %v439_v12 = vld [vmem:[#allocation5 + $0xb88] sm:$0xff]  ;;  %v468_v35 = vld [vmem:[#allocation5 + $0xc70] sm:$0xff]  ;;  %v470_v41 = vld [vmem:[#allocation5 + $0xc80] sm:$0xff]  ;;  %v6515_v36 = vpack.c.bf16 %v409_v13, %v380_v54  ;;  %v6605_v63 = vpack.c.bf16 %v411_v49, %v382_v7 }
 0x211   :  { %3231 = vmatprep.mubr.f32.mxu1 %v8395_v9  ;;  %v6517_v48 = vpack.c.bf16 %v468_v35, %v439_v12  ;;  %v438_v5 = vld [vmem:[#allocation5 + $0xb80] sm:$0xff]  ;;  %v467_v38 = vld [vmem:[#allocation5 + $0xc68] sm:$0xff]  ;;  %v440_v60 = vld [vmem:[#allocation5 + $0xb90] sm:$0xff]  ;;  %v6607_v42 = vpack.c.bf16 %v470_v41, %v441_v4 }
 0x212   :  { %6500 = vmatpush1.bf16.msra.mxu0 %v6499_v44  ;;  %v469_v39 = vld [vmem:[#allocation5 + $0xc78] sm:$0xff]  ;;  %v526_v6 = vld [vmem:[#allocation5 + $0xe40] sm:$0xff]  ;;  %v499_v23 = vld [vmem:[#allocation5 + $0xd68] sm:$0xff] }
 0x213   :  { %6590 = vmatpush1.bf16.msra.mxu1 %v6589_v18  ;;  %6502 = vmatprep.subr.bf16.mxu0 %v6501_v21  ;;  %v497_v33 = vld [vmem:[#allocation5 + $0xd58] sm:$0xff]  ;;  %v528_v44 = vld [vmem:[#allocation5 + $0xe50] sm:$0xff]  ;;  %v6519_v18 = vpack.c.bf16 %v467_v38, %v438_v5  ;;  %v6609_v21 = vpack.c.bf16 %v469_v39, %v440_v60  ;;  %v527_v30 = vld [vmem:[#allocation5 + $0xe48] sm:$0xff] }
 0x214   :  { %6592 = vmatprep.subr.bf16.mxu1 %v6591_v58  ;;  %v6521_v52 = vpack.c.bf16 %v526_v6, %v497_v33  ;;  %v496_v27 = vld [vmem:[#allocation5 + $0xd50] sm:$0xff]  ;;  %v525_v25 = vld [vmem:[#allocation5 + $0xe38] sm:$0xff]  ;;  %v498_v58 = vld [vmem:[#allocation5 + $0xd60] sm:$0xff]  ;;  %v6611_v29 = vpack.c.bf16 %v528_v44, %v499_v23 }
 0x215   :  { %v555_v37 = vld [vmem:[#allocation5 + $0xf28] sm:$0xff]  ;;  %v584_v43 = vld [vmem:[#allocation5 + $0x1010] sm:$0xff]  ;;  %v557_v46 = vld [vmem:[#allocation5 + $0xf38] sm:$0xff] }
 0x216   :  { %6504 = vmatpush1.bf16.msra.mxu0 %v6503_v26  ;;  %v586_v26 = vld [vmem:[#allocation5 + $0x1020] sm:$0xff]  ;;  %v6525_v57 = vpack.c.bf16 %v584_v43, %v555_v37  ;;  %v583_v51 = vld [vmem:[#allocation5 + $0x1008] sm:$0xff]  ;;  %v585_v20 = vld [vmem:[#allocation5 + $0x1018] sm:$0xff] }
 0x217   :  { %6594 = vmatpush1.bf16.msra.mxu1 %v6593_v15  ;;  %6506 = vmatprep.subr.bf16.mxu0 %v6505_v17  ;;  %v6523_v15 = vpack.c.bf16 %v525_v25, %v496_v27  ;;  %v6613_v17 = vpack.c.bf16 %v527_v30, %v498_v58  ;;  %v554_v11 = vld [vmem:[#allocation5 + $0xf20] sm:$0xff]  ;;  %v6615_v28 = vpack.c.bf16 %v586_v26, %v557_v46  ;;  %v613_v59 = vld [vmem:[#allocation5 + $0x10f8] sm:$0xff]  ;;  %v615_v53 = vld [vmem:[#allocation5 + $0x1108] sm:$0xff] }
 0x218   :  { %6596 = vmatprep.subr.bf16.mxu1 %v6595_v45  ;;  %v556_v45 = vld [vmem:[#allocation5 + $0xf30] sm:$0xff]  ;;  %v642_v32 = vld [vmem:[#allocation5 + $0x11e0] sm:$0xff]  ;;  %v643_v3 = vld [vmem:[#allocation5 + $0x11e8] sm:$0xff] }
 0x219   :  { %v6617_v31 = vpack.c.bf16 %v585_v20, %v556_v45  ;;  %v6529_v0 = vpack.c.bf16 %v642_v32, %v613_v59  ;;  %v612_v10 = vld [vmem:[#allocation5 + $0x10f0] sm:$0xff]  ;;  %v614_v22 = vld [vmem:[#allocation5 + $0x1100] sm:$0xff]  ;;  %v671_v47 = vld [vmem:[#allocation5 + $0x12c8] sm:$0xff] }
 0x21a   :  { %6508 = vmatpush1.bf16.msra.mxu0 %v6507_v19  ;;  %v644_v19 = vld [vmem:[#allocation5 + $0x11f0] sm:$0xff]  ;;  %v702_v54 = vld [vmem:[#allocation5 + $0x13c0] sm:$0xff]  ;;  %v6621_v41 = vpack.c.bf16 %v643_v3, %v614_v22  ;;  %v729_v39 = vld [vmem:[#allocation5 + $0x1498] sm:$0xff] }
 0x21b   :  { %6598 = vmatpush1.bf16.msra.mxu1 %v6597_v61  ;;  %6510 = vmatprep.subr.bf16.mxu0 %v6509_v2  ;;  %v6527_v61 = vpack.c.bf16 %v583_v51, %v554_v11  ;;  %v7813_v2 = vld [vmem:[#allocation7 + $0x8] sm:$0xff]  ;;  %v6619_v16 = vpack.c.bf16 %v644_v19, %v615_v53  ;;  %v700_v55 = vld [vmem:[#allocation5 + $0x13b0] sm:$0xff]  ;;  %v8400_v35 = vld [vmem:[#allocation22_spill] sm:$0xff] }
 0x21c   :  { %6600 = vmatprep.subr.bf16.mxu1 %v6599_v1  ;;  %8396 = vst [vmem:[#allocation27_spill] sm:$0xff] %v7813_v2  ;;  %v641_v1 = vld [vmem:[#allocation5 + $0x11d8] sm:$0xff]  ;;  %v8398_v13 = vld [vmem:[#allocation20_spill] sm:$0xff]  ;;  %v1416_v4 = vrot.slane %v7813_v2, %v8400_v35  ;;  %v758_v33 = vld [vmem:[#allocation5 + $0x1580] sm:$0xff] }
 0x21d   :  { %v1412_v7 = vrot.slane %v7813_v2, %v8398_v13  ;;  %v6531_v12 = vpack.c.bf16 %v641_v1, %v612_v10  ;;  %v672_v5 = vld [vmem:[#allocation5 + $0x12d0] sm:$0xff]  ;;  %v6537_v46 = vpack.c.bf16 %v758_v33, %v729_v39  ;;  %v757_v26 = vld [vmem:[#allocation5 + $0x1578] sm:$0xff]  ;;  %v787_v45 = vld [vmem:[#allocation5 + $0x1668] sm:$0xff] }
 0x21e   :  { %6512 = vmatpush1.bf16.msra.mxu0 %v6511_v8  ;;  %v8397_v8 = vld [vmem:[#allocation18_spill] sm:$0xff]  ;;  %v788_v10 = vld [vmem:[#allocation5 + $0x1670] sm:$0xff]  ;;  %v3976_v34 = vld [vmem:[#allocation8 + $0x228] sm:$0xff] }
 0x21f   :  { %6602 = vmatpush1.bf16.msra.mxu1 %v6601_v50  ;;  %6514 = vmatprep.subr.bf16.mxu0 %v6513_v56  ;;  %v1404_v50 = vrot.slane %v7813_v2, %v8397_v8  ;;  %v673_v56 = vld [vmem:[#allocation5 + $0x12d8] sm:$0xff]  ;;  %v818_v32 = vld [vmem:[#allocation5 + $0x1760] sm:$0xff]  ;;  %v3945_v35 = vld [vmem:[#allocation8 + $0x130] sm:$0xff] }
 0x220   :  { %6604 = vmatprep.subr.bf16.mxu1 %v6603_v62  ;;  %v8399_v62 = vld [vmem:[#allocation16_spill] sm:$0xff]  ;;  %v6623_v60 = vpack.c.bf16 %v702_v54, %v673_v56  ;;  %v789_v59 = vld [vmem:[#allocation5 + $0x1678] sm:$0xff]  ;;  %v874_v3 = vld [vmem:[#allocation5 + $0x1920] sm:$0xff] }
 0x221   :  { %v1408_v49 = vrot.slane %v7813_v2, %v8399_v62  ;;  %v6631_v1 = vpack.c.bf16 %v818_v32, %v789_v59  ;;  %v817_v22 = vld [vmem:[#allocation5 + $0x1758] sm:$0xff]  ;;  %v902_v33 = vld [vmem:[#allocation5 + $0x1a00] sm:$0xff]  ;;  %v1048_v32 = vld [vmem:[#allocation5 + $0x1e90] sm:$0xff] }
 0x222   :  { %6516 = vmatpush1.bf16.msra.mxu0 %v6515_v36  ;;  %v6533_v36 = vpack.c.bf16 %v700_v55, %v671_v47  ;;  %v847_v47 = vld [vmem:[#allocation5 + $0x1848] sm:$0xff]  ;;  %v876_v55 = vld [vmem:[#allocation5 + $0x1930] sm:$0xff]  ;;  %v6633_v56 = vpack.c.bf16 %v817_v22, %v788_v10  ;;  %v7829_v10 = vld [vmem:[#allocation5 + $0x1e98] sm:$0xff] }
 0x223   :  { %6606 = vmatpush1.bf16.msra.mxu1 %v6605_v63  ;;  %6518 = vmatprep.subr.bf16.mxu0 %v6517_v48  ;;  %v670_v63 = vld [vmem:[#allocation5 + $0x12c0] sm:$0xff]  ;;  %v699_v48 = vld [vmem:[#allocation5 + $0x13a8] sm:$0xff]  ;;  %v7831_v22 = vld [vmem:[#allocation5 + $0x1f78] sm:$0xff] }
 0x224   :  { %6608 = vmatprep.subr.bf16.mxu1 %v6607_v42  ;;  %v701_v42 = vld [vmem:[#allocation5 + $0x13b8] sm:$0xff]  ;;  %v6535_v58 = vpack.c.bf16 %v699_v48, %v670_v63  ;;  %v932_v63 = vld [vmem:[#allocation5 + $0x1af0] sm:$0xff]  ;;  %v4032_v2 = vld [vmem:[#allocation8 + $0x3e8] sm:$0xff] }
 0x225   :  { %v6625_v43 = vpack.c.bf16 %v701_v42, %v672_v5  ;;  %v905_v48 = vld [vmem:[#allocation5 + $0x1a18] sm:$0xff]  ;;  %v934_v5 = vld [vmem:[#allocation5 + $0x1b00] sm:$0xff] }
 0x226   :  { %6520 = vmatpush1.bf16.msra.mxu0 %v6519_v18  ;;  %v731_v18 = vld [vmem:[#allocation5 + $0x14a8] sm:$0xff] }
 0x227   :  { %6610 = vmatpush1.bf16.msra.mxu1 %v6609_v21  ;;  %6522 = vmatprep.subr.bf16.mxu0 %v6521_v52  ;;  %v760_v21 = vld [vmem:[#allocation5 + $0x1590] sm:$0xff] }
 0x228   :  { %6612 = vmatprep.subr.bf16.mxu1 %v6611_v29  ;;  %v728_v29 = vld [vmem:[#allocation5 + $0x1490] sm:$0xff]  ;;  %v6627_v51 = vpack.c.bf16 %v760_v21, %v731_v18  ;;  %v6639_v21 = vpack.c.bf16 %v934_v5, %v905_v48  ;;  %v7857_v48 = vld [vmem:[#allocation5 + $0x2228] sm:$0xff] }
 0x229   :  { %v6539_v53 = vpack.c.bf16 %v757_v26, %v728_v29 }
 0x22a   :  { %6524 = vmatpush1.bf16.msra.mxu0 %v6523_v15  ;;  %v2310_v38 = vpop.f32.mrb[4].mxu0  ;;  %v2452_v23 = vpop.f32.mrb[4].mxu1  ;;  %v730_v15 = vld [vmem:[#allocation5 + $0x14a0] sm:$0xff] }
 0x22b   :  { %6614 = vmatpush1.bf16.msra.mxu1 %v6613_v17  ;;  %6526 = vmatprep.subr.bf16.mxu0 %v6525_v57  ;;  %v6912_v6 = vadd.f32 %v2310_v38, %v1404_v50  ;;  %v2312_v44 = vpop.f32.mrb[5].mxu0  ;;  %v6914_v52 = vadd.f32 %v2452_v23, %v1412_v7  ;;  %v2454_v25 = vpop.f32.mrb[5].mxu1  ;;  %v759_v17 = vld [vmem:[#allocation5 + $0x1588] sm:$0xff]  ;;  %v844_v7 = vld [vmem:[#allocation5 + $0x1830] sm:$0xff] }
 0x22c   :  { %6616 = vmatprep.subr.bf16.mxu1 %v6615_v28  ;;  %v6913_v27 = vadd.f32 %v2312_v44, %v1408_v49  ;;  %v6915_v37 = vadd.f32 %v2454_v25, %v1416_v4  ;;  %v816_v28 = vld [vmem:[#allocation5 + $0x1750] sm:$0xff]  ;;  %v6629_v19 = vpack.c.bf16 %v759_v17, %v730_v15  ;;  %v873_v49 = vld [vmem:[#allocation5 + $0x1918] sm:$0xff]  ;;  %v6635_v4 = vpack.c.bf16 %v876_v55, %v847_v47  ;;  %v990_v25 = vld [vmem:[#allocation5 + $0x1cc0] sm:$0xff] }
 0x22d   :  { %v5287_v30 = vmul.f32 -1.442695, %v6912_v6  ;;  %v5289_v57 = vmul.f32 -1.442695, %v6914_v52  ;;  %v6547_v38 = vpack.c.bf16 %v873_v49, %v844_v7  ;;  %v931_v6 = vld [vmem:[#allocation5 + $0x1ae8] sm:$0xff]  ;;  %v904_v23 = vld [vmem:[#allocation5 + $0x1a10] sm:$0xff] }
 0x22e   :  { %6528 = vmatpush1.bf16.msra.mxu0 %v6527_v61  ;;  %v5288_v11 = vmul.f32 -1.442695, %v6913_v27  ;;  %v5290_v20 = vmul.f32 -1.442695, %v6915_v37  ;;  %v6541_v61 = vpack.c.bf16 %v816_v28, %v787_v45  ;;  %v933_v52 = vld [vmem:[#allocation5 + $0x1af8] sm:$0xff]  ;;  %v992_v37 = vld [vmem:[#allocation5 + $0x1cd0] sm:$0xff]  ;;  %v6551_v26 = vpack.c.bf16 %v931_v6, %v902_v33 }
 0x22f   :  { %6618 = vmatpush1.bf16.msra.mxu1 %v6617_v31  ;;  %6530 = vmatprep.subr.bf16.mxu0 %v6529_v0  ;;  %7005 = vpow2.f32 %v5287_v30  ;;  %v786_v31 = vld [vmem:[#allocation5 + $0x1660] sm:$0xff]  ;;  %v815_v0 = vld [vmem:[#allocation5 + $0x1748] sm:$0xff]  ;;  %v961_v27 = vld [vmem:[#allocation5 + $0x1bd8] sm:$0xff] }
 0x230   :  { %6620 = vmatprep.subr.bf16.mxu1 %v6619_v16  ;;  %7007 = vpow2.f32 %v5289_v57  ;;  %v845_v16 = vld [vmem:[#allocation5 + $0x1838] sm:$0xff]  ;;  %v6543_v50 = vpack.c.bf16 %v815_v0, %v786_v31  ;;  %v963_v30 = vld [vmem:[#allocation5 + $0x1be8] sm:$0xff]  ;;  %v960_v15 = vld [vmem:[#allocation5 + $0x1bd0] sm:$0xff] }
 0x231   :  { %7009 = vpow2.f32 %v5288_v11  ;;  %v6545_v54 = vpack.c.bf16 %v874_v3, %v845_v16  ;;  %v989_v17 = vld [vmem:[#allocation5 + $0x1cb8] sm:$0xff]  ;;  %v6641_v11 = vpack.c.bf16 %v933_v52, %v904_v23  ;;  %v962_v45 = vld [vmem:[#allocation5 + $0x1be0] sm:$0xff]  ;;  %v991_v28 = vld [vmem:[#allocation5 + $0x1cc8] sm:$0xff]  ;;  %v6643_v59 = vpack.c.bf16 %v992_v37, %v963_v30 }
 0x232   :  { %6532 = vmatpush1.bf16.msra.mxu0 %v6531_v12  ;;  %7011 = vpow2.f32 %v5290_v20  ;;  %v846_v12 = vld [vmem:[#allocation5 + $0x1840] sm:$0xff]  ;;  %v1019_v20 = vld [vmem:[#allocation5 + $0x1da8] sm:$0xff]  ;;  %v7827_v0 = vld [vmem:[#allocation5 + $0x1db0] sm:$0xff] }
 0x233   :  { %6622 = vmatpush1.bf16.msra.mxu1 %v6621_v41  ;;  %6534 = vmatprep.subr.bf16.mxu0 %v6533_v36  ;;  %v875_v41 = vld [vmem:[#allocation5 + $0x1928] sm:$0xff]  ;;  %v7833_v16 = vld [vmem:[#allocation5 + $0x2060] sm:$0xff]  ;;  %v7837_v47 = vld [vmem:[#allocation5 + $0x2070] sm:$0xff] }
 0x234   :  { %6624 = vmatprep.subr.bf16.mxu1 %v6623_v60  ;;  %v903_v36 = vld [vmem:[#allocation5 + $0x1a08] sm:$0xff]  ;;  %v6637_v42 = vpack.c.bf16 %v875_v41, %v846_v12  ;;  %v7839_v55 = vld [vmem:[#allocation5 + $0x1f70] sm:$0xff]  ;;  %v7843_v7 = vld [vmem:[#allocation5 + $0x1f80] sm:$0xff]  ;;  %v6561_v37 = vpack.c.bf16 %v7833_v16, %v7831_v22 }
 0x235   :  { %v6549_v39 = vpack.c.bf16 %v932_v63, %v903_v36  ;;  %v7825_v31 = vld [vmem:[#allocation5 + $0x1e88] sm:$0xff]  ;;  %v7851_v41 = vld [vmem:[#allocation5 + $0x2158] sm:$0xff]  ;;  %v7853_v36 = vld [vmem:[#allocation5 + $0x2240] sm:$0xff] }
 0x236   :  { %6536 = vmatpush1.bf16.msra.mxu0 %v6535_v58  ;;  %v7835_v3 = vld [vmem:[#allocation5 + $0x1f88] sm:$0xff]  ;;  %v7855_v63 = vld [vmem:[#allocation5 + $0x2140] sm:$0xff]  ;;  %v7869_v6 = vld [vmem:[#allocation5 + $0x2410] sm:$0xff] }
 0x237   :  { %6626 = vmatpush1.bf16.msra.mxu1 %v6625_v43  ;;  %6538 = vmatprep.subr.bf16.mxu0 %v6537_v46  ;;  %v7845_v49 = vld [vmem:[#allocation5 + $0x2068] sm:$0xff]  ;;  %v7871_v23 = vld [vmem:[#allocation5 + $0x2310] sm:$0xff]  ;;  %v7877_v52 = vld [vmem:[#allocation5 + $0x23f8] sm:$0xff] }
 0x238   :  { %6628 = vmatprep.subr.bf16.mxu1 %v6627_v51  ;;  %v6553_v51 = vpack.c.bf16 %v990_v25, %v961_v27  ;;  %v7847_v12 = vld [vmem:[#allocation5 + $0x2148] sm:$0xff]  ;;  %v7879_v27 = vld [vmem:[#allocation5 + $0x2320] sm:$0xff]  ;;  %v4002_v30 = vld [vmem:[#allocation8 + $0x2f8] sm:$0xff] }
 0x239   :  { %v7006_v60 = vpop.eup %7005  ;;  %v7867_v33 = vld [vmem:[#allocation5 + $0x2328] sm:$0xff]  ;;  %v4062_v22 = vld [vmem:[#allocation8 + $0x4d8] sm:$0xff] }
 0x23a   :  { %6540 = vmatpush1.bf16.msra.mxu0 %v6539_v53  ;;  %v7008_v44 = vpop.eup %7007  ;;  %v3828_v18 = vadd.f32 1.0, %v7006_v60  ;;  %v1021_v53 = vld [vmem:[#allocation5 + $0x1db8] sm:$0xff]  ;;  %v7881_v25 = vld [vmem:[#allocation5 + $0x2408] sm:$0xff] }
 0x23b   :  { %6630 = vmatpush1.bf16.msra.mxu1 %v6629_v19  ;;  %6542 = vmatprep.subr.bf16.mxu0 %v6541_v61  ;;  %v7010_v58 = vpop.eup %7009  ;;  %v3830_v29 = vadd.f32 1.0, %v7008_v44  ;;  %v1050_v19 = vld [vmem:[#allocation5 + $0x1ea0] sm:$0xff]  ;;  %v7861_v60 = vld [vmem:[#allocation5 + $0x2238] sm:$0xff]  ;;  %v4033_v16 = vld [vmem:[#allocation8 + $0x3f0] sm:$0xff] }
 0x23c   :  { %6632 = vmatprep.subr.bf16.mxu1 %v6631_v1  ;;  %v7012_v43 = vpop.eup %7011  ;;  %7013 = vrcp.f32 %v3828_v18  ;;  %v3829_v46 = vadd.f32 1.0, %v7010_v58  ;;  %v7823_v61 = vld [vmem:[#allocation5 + $0x1da0] sm:$0xff]  ;;  %v6555_v1 = vpack.c.bf16 %v989_v17, %v960_v15  ;;  %v6647_v5 = vpack.c.bf16 %v1050_v19, %v1021_v53  ;;  %v7891_v15 = vld [vmem:[#allocation5 + $0x25d0] sm:$0xff]  ;;  %v7893_v17 = vld [vmem:[#allocation5 + $0x24f8] sm:$0xff] }
 0x23d   :  { %7015 = vrcp.f32 %v3830_v29  ;;  %v3831_v57 = vadd.f32 1.0, %v7012_v43  ;;  %v3915_v44 = vld [vmem:[#allocation8 + $0x40] sm:$0xff]  ;;  %v6559_v18 = vpack.c.bf16 %v7825_v31, %v7823_v61  ;;  %v3944_v58 = vld [vmem:[#allocation8 + $0x128] sm:$0xff]  ;;  %v3973_v29 = vld [vmem:[#allocation8 + $0x210] sm:$0xff]  ;;  %v6651_v43 = vpack.c.bf16 %v7837_v47, %v7835_v3 }
 0x23e   :  { %6544 = vmatpush1.bf16.msra.mxu0 %v6543_v50  ;;  %7017 = vrcp.f32 %v3829_v46  ;;  %v7841_v50 = vld [vmem:[#allocation5 + $0x2058] sm:$0xff]  ;;  %v4060_v61 = vld [vmem:[#allocation8 + $0x4c8] sm:$0xff]  ;;  %v4089_v31 = vld [vmem:[#allocation8 + $0x5b0] sm:$0x1] }
 0x23f   :  { %6634 = vmatpush1.bf16.msra.mxu1 %v6633_v56  ;;  %6546 = vmatprep.subr.bf16.mxu0 %v6545_v54  ;;  %7019 = vrcp.f32 %v3831_v57  ;;  %v6645_v56 = vpack.c.bf16 %v991_v28, %v962_v45  ;;  %v6557_v54 = vpack.c.bf16 %v1048_v32, %v1019_v20  ;;  %v7903_v20 = vld [vmem:[#allocation5 + $0x25e0] sm:$0xff]  ;;  %v7907_v32 = vld [vmem:[#allocation5 + $0x25c8] sm:$0xff] }
 0x240   :  { %6636 = vmatprep.subr.bf16.mxu1 %v6635_v4  ;;  %v7849_v4 = vld [vmem:[#allocation5 + $0x2230] sm:$0xff]  ;;  %v4031_v19 = vld [vmem:[#allocation8 + $0x3e0] sm:$0xff]  ;;  %v3916_v46 = vld [vmem:[#allocation8 + $0x48] sm:$0xff] }
 0x241   :  { %v3917_v47 = vld [vmem:[#allocation8 + $0x50] sm:$0xff] }
 0x242   :  { %6548 = vmatpush1.bf16.msra.mxu0 %v6547_v38  ;;  %v7859_v38 = vld [vmem:[#allocation5 + $0x2150] sm:$0xff] }
 0x243   :  { %6638 = vmatpush1.bf16.msra.mxu1 %v6637_v42  ;;  %6550 = vmatprep.subr.bf16.mxu0 %v6549_v39  ;;  %v7863_v42 = vld [vmem:[#allocation5 + $0x2318] sm:$0xff]  ;;  %v7865_v39 = vld [vmem:[#allocation5 + $0x2400] sm:$0xff] }
 0x244   :  { %6640 = vmatprep.subr.bf16.mxu1 %v6639_v21  ;;  %v6649_v21 = vpack.c.bf16 %v7829_v10, %v7827_v0  ;;  %v8401_v10 = vld [vmem:[#allocation19_spill] sm:$0xff] }
 0x246   :  { %6552 = vmatpush1.bf16.msra.mxu0 %v6551_v26  ;;  %v7889_v26 = vld [vmem:[#allocation5 + $0x24e8] sm:$0xff]  ;;  %v7014_v57 = vpop.eup %7013 }
 0x247   :  { %6642 = vmatpush1.bf16.msra.mxu1 %v6641_v11  ;;  %6554 = vmatprep.subr.bf16.mxu0 %v6553_v51  ;;  %v6653_v11 = vpack.c.bf16 %v7845_v49, %v7843_v7  ;;  %v6565_v51 = vpack.c.bf16 %v7849_v4, %v7847_v12  ;;  %v7016_v53 = vpop.eup %7015  ;;  %v4145_v0 = vrot.slane %v7014_v57, %v8397_v8  ;;  %v4004_v57 = vld [vmem:[#allocation8 + $0x308] sm:$0xff] }
 0x248   :  { %6644 = vmatprep.subr.bf16.mxu1 %v6643_v59  ;;  %v7905_v59 = vld [vmem:[#allocation5 + $0x24e0] sm:$0xff]  ;;  %v7018_v3 = vpop.eup %7017  ;;  %v4153_v7 = vrot.slane %v7016_v53, %v8397_v8 }
 0x249   :  { %v7020_v4 = vpop.eup %7019  ;;  %v4263_v49 = vmul.f32 %v4145_v0, %v3944_v58  ;;  %v4292_v28 = vmul.f32 %v4145_v0, %v3973_v29  ;;  %v4321_v45 = vmul.f32 %v4145_v0, %v4002_v30  ;;  %v7931_v12 = vmul.f32 %v4145_v0, %v4031_v19  ;;  %v4061_v30 = vld [vmem:[#allocation8 + $0x4d0] sm:$0xff]  ;;  %v4090_v19 = vld [vmem:[#allocation8 + $0x5b8] sm:$0x1] }
 0x24a   :  { %6556 = vmatpush1.bf16.msra.mxu0 %v6555_v1  ;;  %v4379_v62 = vmul.f32 %v4145_v0, %v4060_v61  ;;  %v7935_v13 = vmul.f32 %v4153_v7, %v3917_v47  ;;  %v7941_v29 = vmul.f32 %v4153_v7, %v4004_v57  ;;  %v4149_v53 = vrot.slane %v7018_v3, %v8397_v8  ;;  %v3947_v3 = vld [vmem:[#allocation8 + $0x140] sm:$0xff] }
 0x24b   :  { %6646 = vmatpush1.bf16.msra.mxu1 %v6645_v56  ;;  %6558 = vmatprep.subr.bf16.mxu0 %v6557_v54  ;;  %v3946_v56 = vld [vmem:[#allocation8 + $0x138] sm:$0xff]  ;;  %v3975_v54 = vld [vmem:[#allocation8 + $0x220] sm:$0xff]  ;;  %v4157_v61 = vrot.slane %v7020_v4, %v8397_v8  ;;  %v7950_v47 = vmul.f32 %v4153_v7, %v4062_v22  ;;  %v8403_v4 = vpack.c.bf16 %v7853_v36, %v7851_v41 }
 0x24c   :  { %6648 = vmatprep.subr.bf16.mxu1 %v6647_v5  ;;  %v7923_v5 = vmul.f32 %v4145_v0, %v3915_v44  ;;  %v4091_v44 = vld [vmem:[#allocation8 + $0x5c0] sm:$0x1]  ;;  %v7937_v1 = vmul.f32 %v4153_v7, %v3946_v56  ;;  %v7939_v58 = vmul.f32 %v4153_v7, %v3975_v54  ;;  %v4235_v56 = vmul.f32 %v4149_v53, %v3916_v46  ;;  %v4034_v22 = vld [vmem:[#allocation8 + $0x3f8] sm:$0xff] }
 0x24d   :  { %3090 = vmatmul.mubr.f32.vlgmr.msra.gmra.mrb[10].mxu0 %v8401_v10  ;;  %v4264_v54 = vmul.f32 %v4149_v53, %v3945_v35  ;;  %v4063_v8 = vld [vmem:[#allocation8 + $0x4e0] sm:$0xff]  ;;  %v8404_v41 = vpack.c.bf16 %v7857_v48, %v7855_v63  ;;  %v8406_v48 = vpack.c.bf16 %v7865_v39, %v7863_v42  ;;  %v1340_v42 = vld [vmem:[#allocation5 + $0x27b0] sm:$0xf] }
 0x24e   :  { %6560 = vmatpush1.bf16.msra.mxu0 %v6559_v18  ;;  %3232 = vmatmul.mubr.f32.vlgmr.msra.gmra.mrb[10].mxu1 %v8401_v10  ;;  %v3974_v18 = vld [vmem:[#allocation8 + $0x218] sm:$0xff]  ;;  %v4003_v10 = vld [vmem:[#allocation8 + $0x300] sm:$0xff]  ;;  %v5417_v46 = vpack.c.bf16 %v4235_v56, %v7923_v5  ;;  %v4382_v63 = vmul.f32 %v4157_v61, %v4063_v8  ;;  %v8407_v8 = vpack.c.bf16 %v7869_v6, %v7867_v33 }
 0x24f   :  { %6650 = vmatpush1.bf16.msra.mxu1 %v6649_v21  ;;  %6562 = vmatprep.subr.bf16.mxu0 %v6561_v37  ;;  %v7933_v21 = vmul.f32 %v4145_v0, %v4089_v31  ;;  %v3918_v37 = vld [vmem:[#allocation8 + $0x58] sm:$0xff]  ;;  %v8402_v31 = vpack.c.bf16 %v7841_v50, %v7839_v55  ;;  %v7948_v0 = vmul.f32 %v4153_v7, %v4033_v16 }
 0x250   :  { %6652 = vmatprep.subr.bf16.mxu1 %v6651_v43  ;;  %v7952_v43 = vmul.f32 %v4153_v7, %v4091_v44  ;;  %v4293_v57 = vmul.f32 %v4149_v53, %v3974_v18  ;;  %v4322_v9 = vmul.f32 %v4149_v53, %v4003_v10  ;;  %v4351_v55 = vmul.f32 %v4149_v53, %v4032_v2  ;;  %v5183_v10 = vld [vmem:[#allocation10 + $0x2d8] sm:$0x11]  ;;  %v4092_v18 = vld [vmem:[#allocation8 + $0x5c8] sm:$0x1] }
 0x251   :  { %v4380_v50 = vmul.f32 %v4149_v53, %v4061_v30  ;;  %v4409_v16 = vmul.f32 %v4149_v53, %v4090_v19  ;;  %v4237_v7 = vmul.f32 %v4157_v61, %v3918_v37  ;;  %3160 = vmatprep.mubr.f32.mxu0 %v8362_v40  ;;  %v5432_v35 = vpack.c.bf16 %v4264_v54, %v4263_v49  ;;  %v1252_v5 = vld [vmem:[#allocation5 + $0x24f0] sm:$0xff]  ;;  %v1309_v49 = vld [vmem:[#allocation5 + $0x26b8] sm:$0xff]  ;;  %v1311_v19 = vld [vmem:[#allocation5 + $0x26c8] sm:$0xff] }
 0x252   :  { %6564 = vmatpush1.bf16.msra.mxu0 %v8402_v31  ;;  %v4005_v31 = vld [vmem:[#allocation8 + $0x310] sm:$0xff]  ;;  %v5477_v2 = vpack.c.bf16 %v4351_v55, %v7931_v12  ;;  %v4266_v44 = vmul.f32 %v4157_v61, %v3947_v3  ;;  %v8405_v30 = vpack.c.bf16 %v7861_v60, %v7859_v38  ;;  %5078 = vst [vmem:[#allocation10 + $0x20] sm:$0xff] %v5417_v46  ;;  %v1338_v12 = vld [vmem:[#allocation5 + $0x27a0] sm:$0xf]  ;;  %v153_v46 = vld [vmem:[#allocation5 + $0x298] sm:$0xff] }
 0x253   :  { %6654 = vmatpush1.bf16.msra.mxu1 %v6653_v11  ;;  %6566 = vmatprep.subr.bf16.mxu0 %v6565_v51  ;;  %v5447_v11 = vpack.c.bf16 %v4293_v57, %v4292_v28  ;;  %v5462_v51 = vpack.c.bf16 %v4322_v9, %v4321_v45  ;;  %v5492_v36 = vpack.c.bf16 %v4380_v50, %v4379_v62  ;;  %v1281_v62 = vld [vmem:[#allocation5 + $0x25d8] sm:$0xff]  ;;  %v1310_v57 = vld [vmem:[#allocation5 + $0x26c0] sm:$0xff] }
 0x254   :  { %6656 = vmatprep.subr.bf16.mxu1 %v8403_v4  ;;  %v5507_v53 = vpack.c.bf16 %v4409_v16, %v7933_v21  ;;  %5093 = vst [vmem:[#allocation10 + $0x94] sm:$0xff] %v5432_v35  ;;  %v4295_v9 = vmul.f32 %v4157_v61, %v3976_v34  ;;  %v4324_v45 = vmul.f32 %v4157_v61, %v4005_v31  ;;  %5138 = vst [vmem:[#allocation10 + $0x1f0] sm:$0xff] %v5477_v2  ;;  %v126_v3 = vld [vmem:[#allocation5 + $0x1c0] sm:$0xff]  ;;  %v123_v16 = vld [vmem:[#allocation5 + $0x1a8] sm:$0xff] }
 0x255   :  { %5108 = vst [vmem:[#allocation10 + $0x108] sm:$0xff] %v5447_v11  ;;  %5123 = vst [vmem:[#allocation10 + $0x17c] sm:$0xff] %v5462_v51  ;;  %v4353_v28 = vmul.f32 %v4157_v61, %v4034_v22  ;;  %v4411_v60 = vmul.f32 %v4157_v61, %v4092_v18  ;;  %v5418_v21 = vpack.c.bf16 %v4237_v7, %v7935_v13  ;;  %v5186_v61 = vld [vmem:[#allocation10 + $0x2e0] sm:$0x11]  ;;  %3302 = vmatprep.mubr.f32.mxu1 %v8362_v40  ;;  %v94_v50 = vld [vmem:[#allocation5 + $0xc0] sm:$0xff] }
 0x256   :  { %6568 = vmatpush1.bf16.msra.mxu0 %v8404_v41  ;;  %5153 = vst [vmem:[#allocation10 + $0x264] sm:$0xff] %v5492_v36  ;;  %v5184_v38 = vsel %vm7546_vm10, %v5507_v53, %v5183_v10  ;;  %v5433_v34 = vpack.c.bf16 %v4266_v44, %v7937_v1  ;;  %v5448_v39 = vpack.c.bf16 %v4295_v9, %v7939_v58  ;;  %v96_v31 = vld [vmem:[#allocation5 + $0xd0] sm:$0xff]  ;;  %v125_v7 = vld [vmem:[#allocation5 + $0x1b8] sm:$0xff]  ;;  %v182_v35 = vld [vmem:[#allocation5 + $0x380] sm:$0xff] }
 0x257   :  { %6658 = vmatpush1.bf16.msra.mxu1 %v8405_v30  ;;  %6570 = vmatprep.subr.bf16.mxu0 %v8406_v48  ;;  %5185 = vst [vmem:[#allocation10 + $0x2d8] sm:$0x11] %v5184_v38  ;;  %v5463_v37 = vpack.c.bf16 %v4324_v45, %v7941_v29  ;;  %v5478_v56 = vpack.c.bf16 %v4353_v28, %v7948_v0  ;;  %5079 = vst [vmem:[#allocation10 + $0x28] sm:$0xff] %v5418_v21  ;;  %v1308_v0 = vld [vmem:[#allocation5 + $0x26b0] sm:$0xff]  ;;  %v155_v11 = vld [vmem:[#allocation5 + $0x2a8] sm:$0xff] }
 0x258   :  { %6660 = vmatprep.subr.bf16.mxu1 %v8407_v8  ;;  %v5493_v54 = vpack.c.bf16 %v4382_v63, %v7950_v47  ;;  %v8408_v13 = vpack.c.bf16 %v7877_v52, %v7871_v23  ;;  %v5508_v1 = vpack.c.bf16 %v4411_v60, %v7952_v43  ;;  %5094 = vst [vmem:[#allocation10 + $0x9c] sm:$0xff] %v5433_v34  ;;  %v1337_v47 = vld [vmem:[#allocation5 + $0x2798] sm:$0xf]  ;;  %5109 = vst [vmem:[#allocation10 + $0x110] sm:$0xff] %v5448_v39  ;;  %v152_v18 = vld [vmem:[#allocation5 + $0x290] sm:$0xff] }
 0x259   :  { %v8409_v33 = vpack.c.bf16 %v7881_v25, %v7879_v27  ;;  %v8410_v6 = vpack.c.bf16 %v7891_v15, %v7889_v26  ;;  %v6665_v58 = vpack.c.bf16 %v1281_v62, %v1252_v5  ;;  %v6577_v29 = vpack.c.bf16 %v1338_v12, %v1309_v49  ;;  %5124 = vst [vmem:[#allocation10 + $0x184] sm:$0xff] %v5463_v37  ;;  %v1339_v27 = vld [vmem:[#allocation5 + $0x27a8] sm:$0xf]  ;;  %v124_v26 = vld [vmem:[#allocation5 + $0x1b0] sm:$0xff]  ;;  %v97_v43 = vld [vmem:[#allocation5 + $0xd8] sm:$0xff] }
 0x25a   :  { %6572 = vmatpush1.bf16.msra.mxu0 %v8408_v13  ;;  %5139 = vst [vmem:[#allocation10 + $0x1f8] sm:$0xff] %v5478_v56  ;;  %5154 = vst [vmem:[#allocation10 + $0x26c] sm:$0xff] %v5493_v54  ;;  %v8411_v23 = vpack.c.bf16 %v7903_v20, %v7893_v17  ;;  %v6667_v52 = vpack.c.bf16 %v1340_v42, %v1311_v19  ;;  %v95_v25 = vld [vmem:[#allocation5 + $0xc8] sm:$0xff]  ;;  %v5187_v15 = vsel %vm7546_vm10, %v5508_v1, %v5186_v61  ;;  %v181_v41 = vld [vmem:[#allocation5 + $0x378] sm:$0xff] }
 0x25b   :  { %6662 = vmatpush1.bf16.msra.mxu1 %v8409_v33  ;;  %6574 = vmatprep.subr.bf16.mxu0 %v8410_v6  ;;  %5188 = vst [vmem:[#allocation10 + $0x2e0] sm:$0x11] %v5187_v15  ;;  %v8412_v4 = vpack.c.bf16 %v7907_v32, %v7905_v59  ;;  %v6580_v55 = vpack.c.bf16 %v1337_v47, %v1308_v0  ;;  %v184_v59 = vld [vmem:[#allocation5 + $0x390] sm:$0xff]  ;;  %v154_v2 = vld [vmem:[#allocation5 + $0x2a0] sm:$0xff]  ;;  %v183_v53 = vld [vmem:[#allocation5 + $0x388] sm:$0xff] }
 0x25c   :  { %6664 = vmatprep.subr.bf16.mxu1 %v8411_v23  ;;  %v6670_v17 = vpack.c.bf16 %v1339_v27, %v1310_v57  ;;  %v6673_v20 = vpack.c.bf16 %v124_v26, %v95_v25  ;;  %v6763_v22 = vpack.c.bf16 %v126_v3, %v97_v43  ;;  %v6675_v32 = vpack.c.bf16 %v123_v16, %v94_v50  ;;  %v211_v44 = vld [vmem:[#allocation5 + $0x468] sm:$0xff]  ;;  %v240_v30 = vld [vmem:[#allocation5 + $0x550] sm:$0xff]  ;;  %v213_v9 = vld [vmem:[#allocation5 + $0x478] sm:$0xff] }
 0x25d   :  { %v6765_v51 = vpack.c.bf16 %v125_v7, %v96_v31  ;;  %v6677_v10 = vpack.c.bf16 %v182_v35, %v153_v46  ;;  %v6767_v36 = vpack.c.bf16 %v184_v59, %v155_v11  ;;  %v8413_v5 = vld [vmem:[#allocation21_spill] sm:$0xff]  ;;  %v242_v45 = vld [vmem:[#allocation5 + $0x560] sm:$0xff]  ;;  %v6679_v28 = vpack.c.bf16 %v181_v41, %v152_v18  ;;  %v239_v49 = vld [vmem:[#allocation5 + $0x548] sm:$0xff] }
 0x25e   :  { %6576 = vmatpush1.bf16.msra.mxu0 %v8412_v4  ;;  %v6769_v63 = vpack.c.bf16 %v183_v53, %v154_v2  ;;  %v6681_v48 = vpack.c.bf16 %v240_v30, %v211_v44  ;;  %v210_v62 = vld [vmem:[#allocation5 + $0x460] sm:$0xff]  ;;  %v212_v12 = vld [vmem:[#allocation5 + $0x470] sm:$0xff]  ;;  %v6771_v38 = vpack.c.bf16 %v242_v45, %v213_v9  ;;  %v241_v60 = vld [vmem:[#allocation5 + $0x558] sm:$0xff] }
 0x25f   :  { %6666 = vmatpush1.bf16.msra.mxu1 %v6665_v58  ;;  %6579 = vmatprep.subr.msk.bf16.mxu0 %vm7324_vm2, %v6577_v29  ;;  %v269_v21 = vld [vmem:[#allocation5 + $0x638] sm:$0xff]  ;;  %v298_v34 = vld [vmem:[#allocation5 + $0x720] sm:$0xff]  ;;  %v271_v19 = vld [vmem:[#allocation5 + $0x648] sm:$0xff]  ;;  %v6683_v39 = vpack.c.bf16 %v239_v49, %v210_v62  ;;  %v6773_v37 = vpack.c.bf16 %v241_v60, %v212_v12 }
 0x260   :  { %6669 = vmatprep.subr.msk.bf16.mxu1 %vm7324_vm2, %v6667_v52  ;;  %v8414_v8 = vld [vmem:[#allocation17_spill] sm:$0xff]  ;;  %v6685_v56 = vpack.c.bf16 %v298_v34, %v269_v21  ;;  %v270_v13 = vld [vmem:[#allocation5 + $0x640] sm:$0xff]  ;;  %v299_v33 = vld [vmem:[#allocation5 + $0x728] sm:$0xff] }
 0x261   :  { %v300_v42 = vld [vmem:[#allocation5 + $0x730] sm:$0xff]  ;;  %v297_v61 = vld [vmem:[#allocation5 + $0x718] sm:$0xff]  ;;  %v327_v6 = vld [vmem:[#allocation5 + $0x808] sm:$0xff]  ;;  %v6777_v57 = vpack.c.bf16 %v299_v33, %v270_v13 }
 0x262   :  { %6582 = vmatpush1.bf16.msk.msra.mxu0 %vm7324_vm2, %v6580_v55  ;;  %v268_v54 = vld [vmem:[#allocation5 + $0x630] sm:$0xff]  ;;  %v6775_v1 = vpack.c.bf16 %v300_v42, %v271_v19  ;;  %v329_v29 = vld [vmem:[#allocation5 + $0x818] sm:$0xff]  ;;  %v358_v0 = vld [vmem:[#allocation5 + $0x900] sm:$0xff] }
 0x263   :  { %6672 = vmatpush1.bf16.msk.msra.mxu1 %vm7324_vm2, %v6670_v17  ;;  %6674 = vmatprep.subr.bf16.mxu0 %v6673_v20  ;;  %v356_v58 = vld [vmem:[#allocation5 + $0x8f0] sm:$0xff]  ;;  %v6687_v47 = vpack.c.bf16 %v297_v61, %v268_v54  ;;  %v326_v52 = vld [vmem:[#allocation5 + $0x800] sm:$0xff]  ;;  %v355_v27 = vld [vmem:[#allocation5 + $0x8e8] sm:$0xff]  ;;  %v6779_v26 = vpack.c.bf16 %v358_v0, %v329_v29 }
 0x264   :  { %6764 = vmatprep.subr.bf16.mxu1 %v6763_v22  ;;  %v6689_v23 = vpack.c.bf16 %v356_v58, %v327_v6  ;;  %v328_v25 = vld [vmem:[#allocation5 + $0x810] sm:$0xff]  ;;  %v357_v15 = vld [vmem:[#allocation5 + $0x8f8] sm:$0xff]  ;;  %v414_v3 = vld [vmem:[#allocation5 + $0xac0] sm:$0xff]  ;;  %v6691_v17 = vpack.c.bf16 %v355_v27, %v326_v52 }
 0x265   :  { %5267 = vmatmul.mubr.msk.f32.vlgmr.msra.gmra.mrb[10].mxu0 %vm1514_vm3, %v8413_v5  ;;  %v385_v43 = vld [vmem:[#allocation5 + $0x9d8] sm:$0xff]  ;;  %v387_v4 = vld [vmem:[#allocation5 + $0x9e8] sm:$0xff]  ;;  %v416_v55 = vld [vmem:[#allocation5 + $0xad0] sm:$0xff]  ;;  %v6781_v20 = vpack.c.bf16 %v357_v15, %v328_v25 }
 0x266   :  { %5270 = vmatmul.mubr.msk.f32.vlgmr.msra.gmra.mrb[10].mxu1 %vm1514_vm3, %v8413_v5  ;;  %6676 = vmatpush1.bf16.msra.mxu0 %v6675_v32  ;;  %v6693_v50 = vpack.c.bf16 %v414_v3, %v385_v43  ;;  %v384_v16 = vld [vmem:[#allocation5 + $0x9d0] sm:$0xff]  ;;  %v413_v31 = vld [vmem:[#allocation5 + $0xab8] sm:$0xff]  ;;  %v386_v22 = vld [vmem:[#allocation5 + $0x9e0] sm:$0xff]  ;;  %v6783_v7 = vpack.c.bf16 %v416_v55, %v387_v4 }
 0x267   :  { %6766 = vmatpush1.bf16.msra.mxu1 %v6765_v51  ;;  %6678 = vmatprep.subr.bf16.mxu0 %v6677_v10  ;;  %v415_v46 = vld [vmem:[#allocation5 + $0xac8] sm:$0xff]  ;;  %v472_v11 = vld [vmem:[#allocation5 + $0xc90] sm:$0xff]  ;;  %v445_v59 = vld [vmem:[#allocation5 + $0xbb8] sm:$0xff]  ;;  %v6695_v51 = vpack.c.bf16 %v413_v31, %v384_v16 }
 0x268   :  { %6768 = vmatprep.subr.bf16.mxu1 %v6767_v36  ;;  %3373 = vmatprep.mubr.f32.mxu0 %v8414_v8  ;;  %v443_v35 = vld [vmem:[#allocation5 + $0xba8] sm:$0xff]  ;;  %v474_v32 = vld [vmem:[#allocation5 + $0xca0] sm:$0xff]  ;;  %v6785_v10 = vpack.c.bf16 %v415_v46, %v386_v22  ;;  %v444_v36 = vld [vmem:[#allocation5 + $0xbb0] sm:$0xff] }
 0x269   :  { %3515 = vmatprep.mubr.f32.mxu1 %v8414_v8  ;;  %v6697_v18 = vpack.c.bf16 %v472_v11, %v443_v35  ;;  %v442_v41 = vld [vmem:[#allocation5 + $0xba0] sm:$0xff]  ;;  %v471_v2 = vld [vmem:[#allocation5 + $0xc88] sm:$0xff]  ;;  %v6787_v53 = vpack.c.bf16 %v474_v32, %v445_v59  ;;  %v473_v44 = vld [vmem:[#allocation5 + $0xc98] sm:$0xff] }
 0x26a   :  { %6680 = vmatpush1.bf16.msra.mxu0 %v6679_v28  ;;  %v501_v30 = vld [vmem:[#allocation5 + $0xd78] sm:$0xff]  ;;  %v530_v9 = vld [vmem:[#allocation5 + $0xe60] sm:$0xff]  ;;  %v503_v45 = vld [vmem:[#allocation5 + $0xd88] sm:$0xff] }
 0x26b   :  { %6770 = vmatpush1.bf16.msra.mxu1 %v6769_v63  ;;  %6682 = vmatprep.subr.bf16.mxu0 %v6681_v48  ;;  %v532_v28 = vld [vmem:[#allocation5 + $0xe70] sm:$0xff]  ;;  %v6699_v63 = vpack.c.bf16 %v471_v2, %v442_v41  ;;  %v6789_v48 = vpack.c.bf16 %v473_v44, %v444_v36  ;;  %v6701_v62 = vpack.c.bf16 %v530_v9, %v501_v30  ;;  %v529_v12 = vld [vmem:[#allocation5 + $0xe58] sm:$0xff]  ;;  %v531_v21 = vld [vmem:[#allocation5 + $0xe68] sm:$0xff] }
 0x26c   :  { %6772 = vmatprep.subr.bf16.mxu1 %v6771_v38  ;;  %v500_v49 = vld [vmem:[#allocation5 + $0xd70] sm:$0xff]  ;;  %v502_v38 = vld [vmem:[#allocation5 + $0xd80] sm:$0xff]  ;;  %v6791_v60 = vpack.c.bf16 %v532_v28, %v503_v45  ;;  %v559_v34 = vld [vmem:[#allocation5 + $0xf48] sm:$0xff] }
 0x26d   :  { %v588_v19 = vld [vmem:[#allocation5 + $0x1030] sm:$0xff]  ;;  %v561_v42 = vld [vmem:[#allocation5 + $0xf58] sm:$0xff]  ;;  %v558_v61 = vld [vmem:[#allocation5 + $0xf40] sm:$0xff] }
 0x26e   :  { %6684 = vmatpush1.bf16.msra.mxu0 %v6683_v39  ;;  %v590_v39 = vld [vmem:[#allocation5 + $0x1040] sm:$0xff]  ;;  %v6705_v54 = vpack.c.bf16 %v588_v19, %v559_v34  ;;  %v587_v13 = vld [vmem:[#allocation5 + $0x1028] sm:$0xff]  ;;  %v589_v6 = vld [vmem:[#allocation5 + $0x1038] sm:$0xff] }
 0x26f   :  { %6774 = vmatpush1.bf16.msra.mxu1 %v6773_v37  ;;  %6686 = vmatprep.subr.bf16.mxu0 %v6685_v56  ;;  %v6703_v37 = vpack.c.bf16 %v529_v12, %v500_v49  ;;  %v6793_v56 = vpack.c.bf16 %v531_v21, %v502_v38  ;;  %v6795_v33 = vpack.c.bf16 %v590_v39, %v561_v42  ;;  %v617_v58 = vld [vmem:[#allocation5 + $0x1118] sm:$0xff]  ;;  %v646_v29 = vld [vmem:[#allocation5 + $0x1200] sm:$0xff]  ;;  %v619_v0 = vld [vmem:[#allocation5 + $0x1128] sm:$0xff] }
 0x270   :  { %6776 = vmatprep.subr.bf16.mxu1 %v6775_v1  ;;  %v560_v1 = vld [vmem:[#allocation5 + $0xf50] sm:$0xff]  ;;  %v6709_v52 = vpack.c.bf16 %v646_v29, %v617_v58  ;;  %v645_v25 = vld [vmem:[#allocation5 + $0x11f8] sm:$0xff]  ;;  %v647_v43 = vld [vmem:[#allocation5 + $0x1208] sm:$0xff] }
 0x271   :  { %v616_v27 = vld [vmem:[#allocation5 + $0x1110] sm:$0xff]  ;;  %v675_v3 = vld [vmem:[#allocation5 + $0x12e8] sm:$0xff]  ;;  %v706_v16 = vld [vmem:[#allocation5 + $0x13e0] sm:$0xff] }
 0x272   :  { %6688 = vmatpush1.bf16.msra.mxu0 %v6687_v47  ;;  %v648_v47 = vld [vmem:[#allocation5 + $0x1210] sm:$0xff]  ;;  %v8415_v55 = vld [vmem:[#allocation15_spill] sm:$0xff]  ;;  %v6711_v35 = vpack.c.bf16 %v645_v25, %v616_v27  ;;  %v8419_v11 = vld [vmem:[#allocation26_spill] sm:$0xff] }
 0x273   :  { %6778 = vmatpush1.bf16.msra.mxu1 %v6777_v57  ;;  %6690 = vmatprep.subr.bf16.mxu0 %v6689_v23  ;;  %v6707_v57 = vpack.c.bf16 %v587_v13, %v558_v61  ;;  %v6797_v23 = vpack.c.bf16 %v589_v6, %v560_v1  ;;  %v6799_v15 = vpack.c.bf16 %v648_v47, %v619_v0  ;;  %v704_v4 = vld [vmem:[#allocation5 + $0x13d0] sm:$0xff]  ;;  %v733_v44 = vld [vmem:[#allocation5 + $0x14b8] sm:$0xff]  ;;  %v762_v30 = vld [vmem:[#allocation5 + $0x15a0] sm:$0xff] }
 0x274   :  { %6780 = vmatprep.subr.bf16.mxu1 %v6779_v26  ;;  %v618_v26 = vld [vmem:[#allocation5 + $0x1120] sm:$0xff]  ;;  %v8417_v31 = vld [vmem:[#allocation24_spill] sm:$0xff]  ;;  %v6717_v42 = vpack.c.bf16 %v762_v30, %v733_v44  ;;  %v761_v39 = vld [vmem:[#allocation5 + $0x1598] sm:$0xff] }
 0x275   :  { %v6801_v32 = vpack.c.bf16 %v647_v43, %v618_v26  ;;  %v676_v41 = vld [vmem:[#allocation5 + $0x12f0] sm:$0xff]  ;;  %v791_v1 = vld [vmem:[#allocation5 + $0x1688] sm:$0xff]  ;;  %v793_v58 = vld [vmem:[#allocation5 + $0x1698] sm:$0xff] }
 0x276   :  { %6692 = vmatpush1.bf16.msra.mxu0 %v6691_v17  ;;  %v8416_v17 = vld [vmem:[#allocation27_spill] sm:$0xff]  ;;  %v792_v27 = vld [vmem:[#allocation5 + $0x1690] sm:$0xff]  ;;  %v821_v26 = vld [vmem:[#allocation5 + $0x1778] sm:$0xff] }
 0x277   :  { %6782 = vmatpush1.bf16.msra.mxu1 %v6781_v20  ;;  %6694 = vmatprep.subr.bf16.mxu0 %v6693_v50  ;;  %v1420_v20 = vrot.slane %v8416_v17, %v8415_v55  ;;  %v677_v50 = vld [vmem:[#allocation5 + $0x12f8] sm:$0xff]  ;;  %v1428_v22 = vrot.slane %v8416_v17, %v8417_v31  ;;  %v1432_v59 = vrot.slane %v8416_v17, %v8419_v11  ;;  %v822_v29 = vld [vmem:[#allocation5 + $0x1780] sm:$0xff]  ;;  %v935_v30 = vld [vmem:[#allocation5 + $0x1b08] sm:$0xff] }
 0x278   :  { %6784 = vmatprep.subr.bf16.mxu1 %v6783_v7  ;;  %v8418_v7 = vld [vmem:[#allocation25_spill] sm:$0xff]  ;;  %v6803_v36 = vpack.c.bf16 %v706_v16, %v677_v50  ;;  %v6811_v25 = vpack.c.bf16 %v822_v29, %v793_v58  ;;  %v878_v43 = vld [vmem:[#allocation5 + $0x1940] sm:$0xff] }
 0x279   :  { %v1424_v46 = vrot.slane %v8416_v17, %v8418_v7  ;;  %v848_v16 = vld [vmem:[#allocation5 + $0x1850] sm:$0xff]  ;;  %v906_v44 = vld [vmem:[#allocation5 + $0x1a20] sm:$0xff]  ;;  %v1025_v29 = vld [vmem:[#allocation5 + $0x1dd8] sm:$0xff] }
 0x27a   :  { %6696 = vmatpush1.bf16.msra.mxu0 %v6695_v51  ;;  %v6713_v51 = vpack.c.bf16 %v704_v4, %v675_v3  ;;  %v851_v3 = vld [vmem:[#allocation5 + $0x1868] sm:$0xff]  ;;  %v880_v4 = vld [vmem:[#allocation5 + $0x1950] sm:$0xff]  ;;  %v4007_v55 = vld [vmem:[#allocation8 + $0x320] sm:$0xff] }
 0x27b   :  { %6786 = vmatpush1.bf16.msra.mxu1 %v6785_v10  ;;  %6698 = vmatprep.subr.bf16.mxu0 %v6697_v18  ;;  %v674_v10 = vld [vmem:[#allocation5 + $0x12e0] sm:$0xff]  ;;  %v703_v18 = vld [vmem:[#allocation5 + $0x13c8] sm:$0xff]  ;;  %v1052_v58 = vld [vmem:[#allocation5 + $0x1eb0] sm:$0xff] }
 0x27c   :  { %6788 = vmatprep.subr.bf16.mxu1 %v6787_v53  ;;  %v705_v53 = vld [vmem:[#allocation5 + $0x13d8] sm:$0xff]  ;;  %v6715_v38 = vpack.c.bf16 %v703_v18, %v674_v10  ;;  %v938_v18 = vld [vmem:[#allocation5 + $0x1b20] sm:$0xff]  ;;  %v3949_v11 = vld [vmem:[#allocation8 + $0x150] sm:$0xff] }
 0x27d   :  { %v6805_v19 = vpack.c.bf16 %v705_v53, %v676_v41  ;;  %v909_v10 = vld [vmem:[#allocation5 + $0x1a38] sm:$0xff]  ;;  %v3980_v5 = vld [vmem:[#allocation8 + $0x248] sm:$0xff] }
 0x27e   :  { %6700 = vmatpush1.bf16.msra.mxu0 %v6699_v63  ;;  %v735_v63 = vld [vmem:[#allocation5 + $0x14c8] sm:$0xff] }
 0x27f   :  { %6790 = vmatpush1.bf16.msra.mxu1 %v6789_v48  ;;  %6702 = vmatprep.subr.bf16.mxu0 %v6701_v62  ;;  %v764_v48 = vld [vmem:[#allocation5 + $0x15b0] sm:$0xff] }
 0x280   :  { %6792 = vmatprep.subr.bf16.mxu1 %v6791_v60  ;;  %v732_v60 = vld [vmem:[#allocation5 + $0x14b0] sm:$0xff]  ;;  %v6807_v13 = vpack.c.bf16 %v764_v48, %v735_v63  ;;  %v6819_v63 = vpack.c.bf16 %v938_v18, %v909_v10  ;;  %v937_v48 = vld [vmem:[#allocation5 + $0x1b18] sm:$0xff] }
 0x281   :  { %v6719_v0 = vpack.c.bf16 %v761_v39, %v732_v60  ;;  %v967_v60 = vld [vmem:[#allocation5 + $0x1c08] sm:$0xff]  ;;  %v964_v39 = vld [vmem:[#allocation5 + $0x1bf0] sm:$0xff] }
 0x282   :  { %6704 = vmatpush1.bf16.msra.mxu0 %v6703_v37  ;;  %v734_v37 = vld [vmem:[#allocation5 + $0x14c0] sm:$0xff]  ;;  %v8058_v18 = vld [vmem:[#allocation5 + $0x2170] sm:$0xff] }
 0x283   :  { %6794 = vmatpush1.bf16.msra.mxu1 %v6793_v56  ;;  %6706 = vmatprep.subr.bf16.mxu0 %v6705_v54  ;;  %v763_v56 = vld [vmem:[#allocation5 + $0x15a8] sm:$0xff] }
 0x284   :  { %6796 = vmatprep.subr.bf16.mxu1 %v6795_v33  ;;  %v820_v33 = vld [vmem:[#allocation5 + $0x1770] sm:$0xff]  ;;  %v6809_v47 = vpack.c.bf16 %v763_v56, %v734_v37  ;;  %v993_v37 = vld [vmem:[#allocation5 + $0x1cd8] sm:$0xff] }
 0x286   :  { %6708 = vmatpush1.bf16.msra.mxu0 %v6707_v57  ;;  %v6721_v57 = vpack.c.bf16 %v820_v33, %v791_v1  ;;  %v995_v1 = vld [vmem:[#allocation5 + $0x1ce8] sm:$0xff] }
 0x287   :  { %6798 = vmatpush1.bf16.msra.mxu1 %v6797_v23  ;;  %6710 = vmatprep.subr.bf16.mxu0 %v6709_v52  ;;  %v2594_v2 = vpop.f32.mrb[6].mxu0  ;;  %v2736_v45 = vpop.f32.mrb[6].mxu1  ;;  %v790_v23 = vld [vmem:[#allocation5 + $0x1680] sm:$0xff]  ;;  %v819_v52 = vld [vmem:[#allocation5 + $0x1768] sm:$0xff] }
 0x288   :  { %6800 = vmatprep.subr.bf16.mxu1 %v6799_v15  ;;  %v6916_v9 = vadd.f32 %v2594_v2, %v1420_v20  ;;  %v2596_v28 = vpop.f32.mrb[7].mxu0  ;;  %v6918_v62 = vadd.f32 %v2736_v45, %v1428_v22  ;;  %v2738_v12 = vpop.f32.mrb[7].mxu1  ;;  %v849_v15 = vld [vmem:[#allocation5 + $0x1858] sm:$0xff]  ;;  %v6723_v17 = vpack.c.bf16 %v819_v52, %v790_v23  ;;  %v6813_v20 = vpack.c.bf16 %v821_v26, %v792_v27  ;;  %v1023_v33 = vld [vmem:[#allocation5 + $0x1dc8] sm:$0xff]  ;;  %v8026_v23 = vld [vmem:[#allocation5 + $0x1dd0] sm:$0xff] }
 0x289   :  { %v6917_v49 = vadd.f32 %v2596_v28, %v1424_v46  ;;  %v6919_v34 = vadd.f32 %v2738_v12, %v1432_v59  ;;  %v6725_v50 = vpack.c.bf16 %v878_v43, %v849_v15  ;;  %v877_v22 = vld [vmem:[#allocation5 + $0x1938] sm:$0xff]  ;;  %v850_v46 = vld [vmem:[#allocation5 + $0x1860] sm:$0xff]  ;;  %v879_v59 = vld [vmem:[#allocation5 + $0x1948] sm:$0xff]  ;;  %v6735_v27 = vpack.c.bf16 %v993_v37, %v964_v39 }
 0x28a   :  { %6712 = vmatpush1.bf16.msra.mxu0 %v6711_v35  ;;  %v5291_v21 = vmul.f32 -1.442695, %v6916_v9  ;;  %v5293_v54 = vmul.f32 -1.442695, %v6918_v62  ;;  %v6815_v35 = vpack.c.bf16 %v880_v4, %v851_v3  ;;  %v6727_v41 = vpack.c.bf16 %v877_v22, %v848_v16  ;;  %v908_v9 = vld [vmem:[#allocation5 + $0x1a30] sm:$0xff]  ;;  %v965_v62 = vld [vmem:[#allocation5 + $0x1bf8] sm:$0xff] }
 0x28b   :  { %6802 = vmatpush1.bf16.msra.mxu1 %v6801_v32  ;;  %6714 = vmatprep.subr.bf16.mxu0 %v6713_v51  ;;  %v5292_v61 = vmul.f32 -1.442695, %v6917_v49  ;;  %v5294_v6 = vmul.f32 -1.442695, %v6919_v34  ;;  %v907_v32 = vld [vmem:[#allocation5 + $0x1a28] sm:$0xff]  ;;  %v936_v51 = vld [vmem:[#allocation5 + $0x1b10] sm:$0xff] }
 0x28c   :  { %6804 = vmatprep.subr.bf16.mxu1 %v6803_v36  ;;  %7021 = vpow2.f32 %v5291_v21  ;;  %v6817_v36 = vpack.c.bf16 %v879_v59, %v850_v46  ;;  %v6729_v53 = vpack.c.bf16 %v936_v51, %v907_v32  ;;  %v994_v49 = vld [vmem:[#allocation5 + $0x1ce0] sm:$0xff]  ;;  %v996_v21 = vld [vmem:[#allocation5 + $0x1cf0] sm:$0xff]  ;;  %v8028_v52 = vld [vmem:[#allocation5 + $0x1eb8] sm:$0xff] }
 0x28d   :  { %7023 = vpow2.f32 %v5293_v54  ;;  %v6821_v54 = vpack.c.bf16 %v937_v48, %v908_v9  ;;  %v8032_v26 = vld [vmem:[#allocation5 + $0x2080] sm:$0xff]  ;;  %v8034_v15 = vld [vmem:[#allocation5 + $0x1fa8] sm:$0xff]  ;;  %v8036_v43 = vld [vmem:[#allocation5 + $0x2090] sm:$0xff] }
 0x28e   :  { %6716 = vmatpush1.bf16.msra.mxu0 %v6715_v38  ;;  %7025 = vpow2.f32 %v5292_v61  ;;  %v6733_v61 = vpack.c.bf16 %v994_v49, %v965_v62  ;;  %v8038_v3 = vld [vmem:[#allocation5 + $0x1f90] sm:$0xff]  ;;  %v8040_v4 = vld [vmem:[#allocation5 + $0x2078] sm:$0xff]  ;;  %v8044_v16 = vld [vmem:[#allocation5 + $0x2088] sm:$0xff] }
 0x28f   :  { %6806 = vmatpush1.bf16.msra.mxu1 %v6805_v19  ;;  %6718 = vmatprep.subr.bf16.mxu0 %v6717_v42  ;;  %7027 = vpow2.f32 %v5294_v6  ;;  %v6731_v42 = vpack.c.bf16 %v935_v30, %v906_v44  ;;  %v6823_v6 = vpack.c.bf16 %v996_v21, %v967_v60  ;;  %v8046_v22 = vld [vmem:[#allocation5 + $0x2168] sm:$0xff]  ;;  %v8048_v46 = vld [vmem:[#allocation5 + $0x2250] sm:$0xff]  ;;  %v8052_v59 = vld [vmem:[#allocation5 + $0x2260] sm:$0xff]  ;;  %v6831_v21 = vpack.c.bf16 %v8036_v43, %v8034_v15 }
 0x290   :  { %6808 = vmatprep.subr.bf16.mxu1 %v6807_v13  ;;  %v966_v13 = vld [vmem:[#allocation5 + $0x1c00] sm:$0xff]  ;;  %v8056_v51 = vld [vmem:[#allocation5 + $0x2248] sm:$0xff]  ;;  %v8068_v44 = vld [vmem:[#allocation5 + $0x2430] sm:$0xff] }
 0x291   :  { %v8054_v32 = vld [vmem:[#allocation5 + $0x2160] sm:$0xff]  ;;  %v8070_v30 = vld [vmem:[#allocation5 + $0x2330] sm:$0xff]  ;;  %v8080_v62 = vld [vmem:[#allocation5 + $0x2428] sm:$0xff] }
 0x292   :  { %6720 = vmatpush1.bf16.msra.mxu0 %v6719_v0  ;;  %v1054_v0 = vld [vmem:[#allocation5 + $0x1ec0] sm:$0xff]  ;;  %v8092_v39 = vld [vmem:[#allocation5 + $0x2518] sm:$0xff]  ;;  %v3921_v43 = vld [vmem:[#allocation8 + $0x70] sm:$0xff] }
 0x293   :  { %6810 = vmatpush1.bf16.msra.mxu1 %v6809_v47  ;;  %6722 = vmatprep.subr.bf16.mxu0 %v6721_v57  ;;  %v8022_v47 = vld [vmem:[#allocation5 + $0x1dc0] sm:$0xff]  ;;  %v8024_v57 = vld [vmem:[#allocation5 + $0x1ea8] sm:$0xff]  ;;  %v6827_v10 = vpack.c.bf16 %v1054_v0, %v1025_v29 }
 0x294   :  { %6812 = vmatprep.subr.bf16.mxu1 %v6811_v25  ;;  %v8030_v25 = vld [vmem:[#allocation5 + $0x1f98] sm:$0xff]  ;;  %v8078_v48 = vld [vmem:[#allocation5 + $0x2340] sm:$0xff] }
 0x295   :  { %v3919_v9 = vld [vmem:[#allocation8 + $0x60] sm:$0xff]  ;;  %v3948_v49 = vld [vmem:[#allocation8 + $0x148] sm:$0xff]  ;;  %v6741_v60 = vpack.c.bf16 %v8032_v26, %v8030_v25  ;;  %v4037_v26 = vld [vmem:[#allocation8 + $0x410] sm:$0xff] }
 0x296   :  { %6724 = vmatpush1.bf16.msra.mxu0 %v6723_v17  ;;  %v7022_v2 = vpop.eup %7021  ;;  %v6825_v17 = vpack.c.bf16 %v995_v1, %v966_v13  ;;  %v8102_v1 = vld [vmem:[#allocation5 + $0x2600] sm:$0xff]  ;;  %v4066_v25 = vld [vmem:[#allocation8 + $0x4f8] sm:$0xff] }
 0x297   :  { %6814 = vmatpush1.bf16.msra.mxu1 %v6813_v20  ;;  %6726 = vmatprep.subr.bf16.mxu0 %v6725_v50  ;;  %v7024_v45 = vpop.eup %7023  ;;  %v3832_v28 = vadd.f32 1.0, %v7022_v2  ;;  %v6737_v20 = vpack.c.bf16 %v1052_v58, %v1023_v33  ;;  %v8042_v50 = vld [vmem:[#allocation5 + $0x1fa0] sm:$0xff]  ;;  %v8062_v2 = vld [vmem:[#allocation5 + $0x2338] sm:$0xff] }
 0x298   :  { %6816 = vmatprep.subr.bf16.mxu1 %v6815_v35  ;;  %v7026_v12 = vpop.eup %7025  ;;  %v3834_v38 = vadd.f32 1.0, %v7024_v45  ;;  %v8050_v35 = vld [vmem:[#allocation5 + $0x2178] sm:$0xff]  ;;  %v6739_v45 = vpack.c.bf16 %v8024_v57, %v8022_v47  ;;  %v8104_v33 = vld [vmem:[#allocation5 + $0x2500] sm:$0xff]  ;;  %v4093_v47 = vld [vmem:[#allocation8 + $0x5d0] sm:$0x1] }
 0x299   :  { %v7028_v34 = vpop.eup %7027  ;;  %7029 = vrcp.f32 %v3832_v28  ;;  %v3833_v19 = vadd.f32 1.0, %v7026_v12  ;;  %v6829_v28 = vpack.c.bf16 %v8028_v52, %v8026_v23  ;;  %v3977_v12 = vld [vmem:[#allocation8 + $0x230] sm:$0xff]  ;;  %v4035_v29 = vld [vmem:[#allocation8 + $0x400] sm:$0xff]  ;;  %v4064_v0 = vld [vmem:[#allocation8 + $0x4e8] sm:$0xff] }
 0x29a   :  { %6728 = vmatpush1.bf16.msra.mxu0 %v6727_v41  ;;  %7031 = vrcp.f32 %v3834_v38  ;;  %v3835_v56 = vadd.f32 1.0, %v7028_v34  ;;  %v8060_v41 = vld [vmem:[#allocation5 + $0x2258] sm:$0xff]  ;;  %v8421_v52 = vld [vmem:[#allocation19_spill] sm:$0xff] }
 0x29b   :  { %6818 = vmatpush1.bf16.msra.mxu1 %v6817_v36  ;;  %6730 = vmatprep.subr.bf16.mxu0 %v6729_v53  ;;  %7033 = vrcp.f32 %v3833_v19  ;;  %v8064_v36 = vld [vmem:[#allocation5 + $0x2420] sm:$0xff]  ;;  %v8066_v53 = vld [vmem:[#allocation5 + $0x2348] sm:$0xff]  ;;  %v4006_v38 = vld [vmem:[#allocation8 + $0x318] sm:$0xff] }
 0x29c   :  { %6820 = vmatprep.subr.bf16.mxu1 %v6819_v63  ;;  %7035 = vrcp.f32 %v3835_v56  ;;  %v8076_v63 = vld [vmem:[#allocation5 + $0x2418] sm:$0xff]  ;;  %v8088_v19 = vld [vmem:[#allocation5 + $0x2508] sm:$0xff]  ;;  %v6833_v56 = vpack.c.bf16 %v8044_v16, %v8042_v50 }
 0x29d   :  { %v8420_v57 = vld [vmem:[#allocation18_spill] sm:$0xff]  ;;  %v3920_v34 = vld [vmem:[#allocation8 + $0x68] sm:$0xff] }
 0x29e   :  { %6732 = vmatpush1.bf16.msra.mxu0 %v6731_v42  ;;  %v8090_v42 = vld [vmem:[#allocation5 + $0x25f0] sm:$0xff] }
 0x29f   :  { %6822 = vmatpush1.bf16.msra.mxu1 %v6821_v54  ;;  %6734 = vmatprep.subr.bf16.mxu0 %v6733_v61  ;;  %v6745_v54 = vpack.c.bf16 %v8048_v46, %v8046_v22 }
 0x2a0   :  { %6824 = vmatprep.subr.bf16.mxu1 %v6823_v6  ;;  %v8106_v6 = vld [vmem:[#allocation5 + $0x25e8] sm:$0xff] }
 0x2a2   :  { %6736 = vmatpush1.bf16.msra.mxu0 %v6735_v27 }
 0x2a3   :  { %6826 = vmatpush1.bf16.msra.mxu1 %v6825_v17  ;;  %6738 = vmatprep.subr.bf16.mxu0 %v6737_v20  ;;  %v7030_v37 = vpop.eup %7029  ;;  %v3950_v17 = vld [vmem:[#allocation8 + $0x158] sm:$0xff]  ;;  %v3979_v20 = vld [vmem:[#allocation8 + $0x240] sm:$0xff] }
 0x2a4   :  { %6828 = vmatprep.subr.bf16.mxu1 %v6827_v10  ;;  %v7032_v58 = vpop.eup %7031  ;;  %v4161_v23 = vrot.slane %v7030_v37, %v8420_v57  ;;  %v4008_v37 = vld [vmem:[#allocation8 + $0x328] sm:$0xff] }
 0x2a5   :  { %3374 = vmatmul.mubr.f32.vlgmr.msra.gmra.mrb[12].mxu0 %v8421_v52  ;;  %v7034_v15 = vpop.eup %7033  ;;  %v4169_v50 = vrot.slane %v7032_v58, %v8420_v57 }
 0x2a6   :  { %6740 = vmatpush1.bf16.msra.mxu0 %v6739_v45  ;;  %3516 = vmatmul.mubr.f32.vlgmr.msra.gmra.mrb[12].mxu1 %v8421_v52  ;;  %v7036_v46 = vpop.eup %7035  ;;  %v8122_v10 = vmul.f32 %v4161_v23, %v3919_v9  ;;  %v4267_v16 = vmul.f32 %v4161_v23, %v3948_v49  ;;  %v4296_v13 = vmul.f32 %v4161_v23, %v3977_v12  ;;  %v4095_v9 = vld [vmem:[#allocation8 + $0x5e0] sm:$0x1]  ;;  %v3978_v45 = vld [vmem:[#allocation8 + $0x238] sm:$0xff]  ;;  %v4036_v52 = vld [vmem:[#allocation8 + $0x408] sm:$0xff] }
 0x2a7   :  { %6830 = vmatpush1.bf16.msra.mxu1 %v6829_v28  ;;  %v4325_v61 = vmul.f32 %v4161_v23, %v4006_v38  ;;  %v8130_v22 = vmul.f32 %v4161_v23, %v4035_v29  ;;  %6742 = vmatprep.subr.bf16.mxu0 %v6741_v60  ;;  %v4383_v7 = vmul.f32 %v4161_v23, %v4064_v0  ;;  %v4065_v38 = vld [vmem:[#allocation8 + $0x4f0] sm:$0xff]  ;;  %v4094_v29 = vld [vmem:[#allocation8 + $0x5d8] sm:$0x1] }
 0x2a8   :  { %v8132_v28 = vmul.f32 %v4161_v23, %v4093_v47  ;;  %v8134_v31 = vmul.f32 %v4169_v50, %v3921_v43  ;;  %v8136_v27 = vmul.f32 %v4169_v50, %v3950_v17  ;;  %6832 = vmatprep.subr.bf16.mxu1 %v6831_v21  ;;  %v8138_v49 = vmul.f32 %v4169_v50, %v3979_v20  ;;  %v3922_v60 = vld [vmem:[#allocation8 + $0x78] sm:$0xff] }
 0x2a9   :  { %v8140_v12 = vmul.f32 %v4169_v50, %v4008_v37  ;;  %v4165_v58 = vrot.slane %v7034_v15, %v8420_v57  ;;  %v4173_v0 = vrot.slane %v7036_v46, %v8420_v57  ;;  %v8422_v47 = vpack.c.bf16 %v8040_v4, %v8038_v3  ;;  %v3951_v15 = vld [vmem:[#allocation8 + $0x160] sm:$0xff]  ;;  %3444 = vmatprep.mubr.f32.mxu0 %v8362_v40 }
 0x2aa   :  { %v8147_v23 = vmul.f32 %v4169_v50, %v4037_v26  ;;  %v8149_v43 = vmul.f32 %v4169_v50, %v4066_v25  ;;  %v8151_v21 = vmul.f32 %v4169_v50, %v4095_v9  ;;  %v8423_v46 = vpack.c.bf16 %v8052_v59, %v8050_v35  ;;  %v4038_v25 = vld [vmem:[#allocation8 + $0x418] sm:$0xff]  ;;  %v4067_v57 = vld [vmem:[#allocation8 + $0x500] sm:$0xff]  ;;  %3586 = vmatprep.mubr.f32.mxu1 %v8362_v40 }
 0x2ab   :  { %6744 = vmatpush1.bf16.msra.mxu0 %v8422_v47  ;;  %6834 = vmatpush1.bf16.msra.mxu1 %v6833_v56  ;;  %v4239_v17 = vmul.f32 %v4165_v58, %v3920_v34  ;;  %v4268_v20 = vmul.f32 %v4165_v58, %v3949_v11  ;;  %v4297_v37 = vmul.f32 %v4165_v58, %v3978_v45  ;;  %v4009_v47 = vld [vmem:[#allocation8 + $0x330] sm:$0xff]  ;;  %v4096_v45 = vld [vmem:[#allocation8 + $0x5e8] sm:$0x1] }
 0x2ac   :  { %6746 = vmatprep.subr.bf16.mxu0 %v6745_v54  ;;  %v4326_v8 = vmul.f32 %v4165_v58, %v4007_v55  ;;  %6836 = vmatprep.subr.bf16.mxu1 %v8423_v46  ;;  %v4355_v3 = vmul.f32 %v4165_v58, %v4036_v52  ;;  %v4384_v4 = vmul.f32 %v4165_v58, %v4065_v38  ;;  %v5189_v54 = vld [vmem:[#allocation10 + $0x2e8] sm:$0x11] }
 0x2ad   :  { %v4413_v26 = vmul.f32 %v4165_v58, %v4094_v29  ;;  %v4241_v50 = vmul.f32 %v4173_v0, %v3922_v60  ;;  %v5419_v34 = vpack.c.bf16 %v4239_v17, %v8122_v10  ;;  %v5434_v11 = vpack.c.bf16 %v4268_v20, %v4267_v16  ;;  %v1256_v10 = vld [vmem:[#allocation5 + $0x2510] sm:$0xff]  ;;  %v1313_v16 = vld [vmem:[#allocation5 + $0x26d8] sm:$0xff]  ;;  %v1315_v29 = vld [vmem:[#allocation5 + $0x26e8] sm:$0xff] }
 0x2ae   :  { %v5449_v56 = vpack.c.bf16 %v4297_v37, %v4296_v13  ;;  %v5464_v55 = vpack.c.bf16 %v4326_v8, %v4325_v61  ;;  %v8424_v35 = vpack.c.bf16 %v8056_v51, %v8054_v32  ;;  %v5479_v59 = vpack.c.bf16 %v4355_v3, %v8130_v22  ;;  %v1342_v22 = vld [vmem:[#allocation5 + $0x27c0] sm:$0xf]  ;;  %v127_v3 = vld [vmem:[#allocation5 + $0x1c8] sm:$0xff] }
 0x2af   :  { %v5494_v52 = vpack.c.bf16 %v4384_v4, %v4383_v7  ;;  %v5509_v58 = vpack.c.bf16 %v4413_v26, %v8132_v28  ;;  %v4270_v9 = vmul.f32 %v4173_v0, %v3951_v15  ;;  %v8425_v38 = vpack.c.bf16 %v8060_v41, %v8058_v18  ;;  %5080 = vst [vmem:[#allocation10 + $0x30] sm:$0xff] %v5419_v34  ;;  %v1285_v7 = vld [vmem:[#allocation5 + $0x25f8] sm:$0xff]  ;;  %v1314_v37 = vld [vmem:[#allocation5 + $0x26e0] sm:$0xff]  ;;  %v620_v4 = vld [vmem:[#allocation5 + $0x1130] sm:$0xff] }
 0x2b0   :  { %6748 = vmatpush1.bf16.msra.mxu0 %v8424_v35  ;;  %5095 = vst [vmem:[#allocation10 + $0xa4] sm:$0xff] %v5434_v11  ;;  %5110 = vst [vmem:[#allocation10 + $0x118] sm:$0xff] %v5449_v56  ;;  %v4299_v8 = vmul.f32 %v4173_v0, %v3980_v5  ;;  %v4328_v61 = vmul.f32 %v4173_v0, %v4009_v47  ;;  %v4357_v13 = vmul.f32 %v4173_v0, %v4038_v25  ;;  %v98_v46 = vld [vmem:[#allocation5 + $0xe0] sm:$0xff]  ;;  %v649_v26 = vld [vmem:[#allocation5 + $0x1218] sm:$0xff] }
 0x2b1   :  { %6838 = vmatpush1.bf16.msra.mxu1 %v8425_v38  ;;  %5125 = vst [vmem:[#allocation10 + $0x18c] sm:$0xff] %v5464_v55  ;;  %v4386_v32 = vmul.f32 %v4173_v0, %v4067_v57  ;;  %v8426_v51 = vpack.c.bf16 %v8064_v36, %v8062_v2  ;;  %5140 = vst [vmem:[#allocation10 + $0x200] sm:$0xff] %v5479_v59  ;;  %v5190_v18 = vsel %vm7546_vm10, %v5509_v58, %v5189_v54  ;;  %v1344_v2 = vld [vmem:[#allocation5 + $0x27d0] sm:$0xf]  ;;  %v1026_v47 = vld [vmem:[#allocation5 + $0x1de0] sm:$0xff]  ;;  %v7216_v54 = vmov 0.0|0.0  }
 0x2b2   :  { %5155 = vst [vmem:[#allocation10 + $0x274] sm:$0xff] %v5494_v52  ;;  %v4415_v41 = vmul.f32 %v4173_v0, %v4096_v45  ;;  %v5420_v28 = vpack.c.bf16 %v4241_v50, %v8134_v31  ;;  %v5435_v5 = vpack.c.bf16 %v4270_v9, %v8136_v27  ;;  %v8427_v57 = vpack.c.bf16 %v8068_v44, %v8066_v53  ;;  %v5192_v0 = vld [vmem:[#allocation10 + $0x2f0] sm:$0x11]  ;;  %v156_v50 = vld [vmem:[#allocation5 + $0x2b0] sm:$0xff]  ;;  %v185_v34 = vld [vmem:[#allocation5 + $0x398] sm:$0xff] }
 0x2b3   :  { %6750 = vmatprep.subr.bf16.mxu0 %v8426_v51  ;;  %5191 = vst [vmem:[#allocation10 + $0x2e8] sm:$0x11] %v5190_v18  ;;  %v5450_v36 = vpack.c.bf16 %v4299_v8, %v8138_v49  ;;  %v5465_v60 = vpack.c.bf16 %v4328_v61, %v8140_v12  ;;  %v5480_v17 = vpack.c.bf16 %v4357_v13, %v8147_v23  ;;  %v1312_v23 = vld [vmem:[#allocation5 + $0x26d0] sm:$0xff]  ;;  %v1055_v25 = vld [vmem:[#allocation5 + $0x1ec8] sm:$0xff]  ;;  %v678_v11 = vld [vmem:[#allocation5 + $0x1300] sm:$0xff] }
 0x2b4   :  { %6840 = vmatprep.subr.bf16.mxu1 %v8427_v57  ;;  %v5495_v20 = vpack.c.bf16 %v4386_v32, %v8149_v43  ;;  %v8428_v31 = vpack.c.bf16 %v8076_v63, %v8070_v30  ;;  %v5510_v27 = vpack.c.bf16 %v4415_v41, %v8151_v21  ;;  %5081 = vst [vmem:[#allocation10 + $0x38] sm:$0xff] %v5420_v28  ;;  %5096 = vst [vmem:[#allocation10 + $0xac] sm:$0xff] %v5435_v5  ;;  %v1341_v43 = vld [vmem:[#allocation5 + $0x27b8] sm:$0xf]  ;;  %v707_v55 = vld [vmem:[#allocation5 + $0x13e8] sm:$0xff] }
 0x2b5   :  { %v8429_v53 = vpack.c.bf16 %v8080_v62, %v8078_v48  ;;  %v8430_v44 = vpack.c.bf16 %v8090_v42, %v8088_v19  ;;  %v6845_v49 = vpack.c.bf16 %v1285_v7, %v1256_v10  ;;  %v6757_v12 = vpack.c.bf16 %v1342_v22, %v1313_v16  ;;  %5111 = vst [vmem:[#allocation10 + $0x120] sm:$0xff] %v5450_v36  ;;  %v1343_v48 = vld [vmem:[#allocation5 + $0x27c8] sm:$0xf]  ;;  %v562_v62 = vld [vmem:[#allocation5 + $0xf60] sm:$0xff]  ;;  %v1084_v45 = vld [vmem:[#allocation5 + $0x1fb0] sm:$0xff] }
 0x2b6   :  { %6752 = vmatpush1.bf16.msra.mxu0 %v8428_v31  ;;  %5126 = vst [vmem:[#allocation10 + $0x194] sm:$0xff] %v5465_v60  ;;  %5141 = vst [vmem:[#allocation10 + $0x208] sm:$0xff] %v5480_v17  ;;  %v8431_v30 = vpack.c.bf16 %v8102_v1, %v8092_v39  ;;  %v6847_v63 = vpack.c.bf16 %v1344_v2, %v1315_v29  ;;  %v591_v19 = vld [vmem:[#allocation5 + $0x1048] sm:$0xff]  ;;  %v5193_v42 = vsel %vm7546_vm10, %v5510_v27, %v5192_v0  ;;  %v1113_v35 = vld [vmem:[#allocation5 + $0x2098] sm:$0xff] }
 0x2b7   :  { %6842 = vmatpush1.bf16.msra.mxu1 %v8429_v53  ;;  %6754 = vmatprep.subr.bf16.mxu0 %v8430_v44  ;;  %5156 = vst [vmem:[#allocation10 + $0x27c] sm:$0xff] %v5495_v20  ;;  %5194 = vst [vmem:[#allocation10 + $0x2f0] sm:$0x11] %v5193_v42  ;;  %v8432_v21 = vpack.c.bf16 %v8106_v6, %v8104_v33  ;;  %v6760_v15 = vpack.c.bf16 %v1341_v43, %v1312_v23  ;;  %v8433_v59 = vld [vmem:[#allocation21_spill] sm:$0xff]  ;;  %v214_v9 = vld [vmem:[#allocation5 + $0x480] sm:$0xff] }
 0x2b8   :  { %6844 = vmatprep.subr.bf16.mxu1 %v8431_v30  ;;  %v6850_v39 = vpack.c.bf16 %v1343_v48, %v1314_v37  ;;  %v6853_v1 = vpack.c.bf16 %v591_v19, %v562_v62  ;;  %v6855_v33 = vpack.c.bf16 %v127_v3, %v98_v46  ;;  %v6857_v6 = vpack.c.bf16 %v649_v26, %v620_v4  ;;  %v243_v38 = vld [vmem:[#allocation5 + $0x568] sm:$0xff]  ;;  %v736_v10 = vld [vmem:[#allocation5 + $0x14d0] sm:$0xff]  ;;  %v765_v61 = vld [vmem:[#allocation5 + $0x15b8] sm:$0xff] }
 0x2b9   :  { %v6886_v56 = vpack.c.bf16 %v1055_v25, %v1026_v47  ;;  %v6859_v52 = vpack.c.bf16 %v185_v34, %v156_v50  ;;  %v6861_v58 = vpack.c.bf16 %v707_v55, %v678_v11  ;;  %v6889_v8 = vpack.c.bf16 %v1113_v35, %v1084_v45  ;;  %v1142_v13 = vld [vmem:[#allocation5 + $0x2180] sm:$0xff]  ;;  %v1171_v32 = vld [vmem:[#allocation5 + $0x2268] sm:$0xff]  ;;  %v8434_v51 = vld [vmem:[#allocation17_spill] sm:$0xff] }
 0x2ba   :  { %6756 = vmatpush1.bf16.msra.mxu0 %v8432_v21  ;;  %v6863_v7 = vpack.c.bf16 %v243_v38, %v214_v9  ;;  %v6865_v16 = vpack.c.bf16 %v765_v61, %v736_v10  ;;  %v272_v22 = vld [vmem:[#allocation5 + $0x650] sm:$0xff]  ;;  %v301_v18 = vld [vmem:[#allocation5 + $0x738] sm:$0xff]  ;;  %v794_v41 = vld [vmem:[#allocation5 + $0x16a0] sm:$0xff]  ;;  %v6892_v28 = vpack.c.bf16 %v1171_v32, %v1142_v13 }
 0x2bb   :  { %6846 = vmatpush1.bf16.msra.mxu1 %v6845_v49  ;;  %6759 = vmatprep.subr.msk.bf16.mxu0 %vm7324_vm2, %v6757_v12  ;;  %v823_v5 = vld [vmem:[#allocation5 + $0x1788] sm:$0xff]  ;;  %v1200_v57 = vld [vmem:[#allocation5 + $0x2350] sm:$0xff]  ;;  %v1229_v29 = vld [vmem:[#allocation5 + $0x2438] sm:$0xff]  ;;  %v6867_v2 = vpack.c.bf16 %v301_v18, %v272_v22 }
 0x2bc   :  { %6849 = vmatprep.subr.msk.bf16.mxu1 %vm7324_vm2, %v6847_v63  ;;  %v6869_v36 = vpack.c.bf16 %v823_v5, %v794_v41  ;;  %v330_v60 = vld [vmem:[#allocation5 + $0x820] sm:$0xff]  ;;  %v852_v17 = vld [vmem:[#allocation5 + $0x1870] sm:$0xff]  ;;  %v6895_v20 = vpack.c.bf16 %v1229_v29, %v1200_v57  ;;  %v881_v0 = vld [vmem:[#allocation5 + $0x1958] sm:$0xff] }
 0x2bd   :  { %v1258_v31 = vld [vmem:[#allocation5 + $0x2520] sm:$0xff]  ;;  %v1287_v27 = vld [vmem:[#allocation5 + $0x2608] sm:$0xff]  ;;  %v6873_v44 = vpack.c.bf16 %v881_v0, %v852_v17  ;;  %v388_v49 = vld [vmem:[#allocation5 + $0x9f0] sm:$0xff] }
 0x2be   :  { %6762 = vmatpush1.bf16.msk.msra.mxu0 %vm7324_vm2, %v6760_v15  ;;  %v417_v12 = vld [vmem:[#allocation5 + $0xad8] sm:$0xff]  ;;  %v910_v23 = vld [vmem:[#allocation5 + $0x1a40] sm:$0xff]  ;;  %v6898_v43 = vpack.c.bf16 %v1287_v27, %v1258_v31  ;;  %v939_v37 = vld [vmem:[#allocation5 + $0x1b28] sm:$0xff] }
 0x2bf   :  { %6852 = vmatpush1.bf16.msk.msra.mxu1 %vm7324_vm2, %v6850_v39  ;;  %6854 = vmatprep.subr.bf16.mxu0 %v6853_v1  ;;  %v1316_v30 = vld [vmem:[#allocation5 + $0x26f0] sm:$0xff]  ;;  %v1345_v63 = vld [vmem:[#allocation5 + $0x27d8] sm:$0xf]  ;;  %v6875_v48 = vpack.c.bf16 %v417_v12, %v388_v49  ;;  %v6877_v62 = vpack.c.bf16 %v939_v37, %v910_v23  ;;  %v446_v19 = vld [vmem:[#allocation5 + $0xbc0] sm:$0xff] }
 0x2c0   :  { %6885 = vmatprep.subr.bf16.mxu1 %v7216_v54  ;;  %v475_v42 = vld [vmem:[#allocation5 + $0xca8] sm:$0xff]  ;;  %v6901_v21 = vpack.c.bf16 %v1345_v63, %v1316_v30  ;;  %v968_v15 = vld [vmem:[#allocation5 + $0x1c10] sm:$0xff]  ;;  %v997_v39 = vld [vmem:[#allocation5 + $0x1cf8] sm:$0xff] }
 0x2c1   :  { %5273 = vmatmul.mubr.msk.f32.vlgmr.msra.gmra.mrb[12].mxu0 %vm1514_vm3, %v8433_v59  ;;  %v6879_v1 = vpack.c.bf16 %v475_v42, %v446_v19  ;;  %v6881_v46 = vpack.c.bf16 %v997_v39, %v968_v15  ;;  %v504_v3 = vld [vmem:[#allocation5 + $0xd90] sm:$0xff]  ;;  %v533_v4 = vld [vmem:[#allocation5 + $0xe78] sm:$0xff]  ;;  %v8435_v25 = vld [vmem:[#allocation19_spill] sm:$0xff] }
 0x2c2   :  { %5276 = vmatmul.mubr.msk.f32.vlgmr.msra.gmra.mrb[12].mxu1 %vm1514_vm3, %v8433_v59  ;;  %6856 = vmatpush3.bf16.msra.mxu0 %v6855_v33  ;;  %v6883_v26 = vpack.c.bf16 %v533_v4, %v504_v3  ;;  %v8223_v47 = vld [vmem:[#allocation7 + $0x10] sm:$0xff]  ;;  %v8436_v33 = vld [vmem:[#allocation18_spill] sm:$0xff]  ;;  %v3952_v29 = vld [vmem:[#allocation8 + $0x168] sm:$0xff] }
 0x2c3   :  { %6858 = vmatprep.subr.bf16.mxu0 %v6857_v6  ;;  %6887 = vmatpush3.bf16.msra.mxu1 %v6886_v56  ;;  %v1436_v6 = vrot.slane %v8223_v47, %v8436_v33  ;;  %v8437_v50 = vld [vmem:[#allocation20_spill] sm:$0xff]  ;;  %v8439_v56 = vld [vmem:[#allocation22_spill] sm:$0xff] }
 0x2c4   :  { %6888 = vmatprep.subr.bf16.mxu1 %v7216_v54  ;;  %3657 = vmatprep.mubr.f32.mxu0 %v8434_v51  ;;  %v1444_v34 = vrot.slane %v8223_v47, %v8437_v50  ;;  %v8438_v11 = vld [vmem:[#allocation16_spill] sm:$0xff]  ;;  %v1448_v55 = vrot.slane %v8223_v47, %v8439_v56  ;;  %v3923_v5 = vld [vmem:[#allocation8 + $0x80] sm:$0xff]  ;;  %v4070_v37 = vld [vmem:[#allocation8 + $0x518] sm:$0xff] }
 0x2c5   :  { %5590 = vmatprep.mubr.msk.f32.mxu1 %vm7217_vm11, %v8362_v40  ;;  %v359_v40 = vld [vmem:[#allocation5 + $0x908] sm:$0xff]  ;;  %v1440_v14 = vrot.slane %v8223_v47, %v8438_v11  ;;  %v4099_v19 = vld [vmem:[#allocation8 + $0x600] sm:$0x1]  ;;  %v3982_v3 = vld [vmem:[#allocation8 + $0x258] sm:$0xff] }
 0x2c6   :  { %6860 = vmatpush3.bf16.msra.mxu0 %v6859_v52  ;;  %v6871_v53 = vpack.c.bf16 %v359_v40, %v330_v60  ;;  %v4039_v40 = vld [vmem:[#allocation8 + $0x420] sm:$0xff]  ;;  %v4068_v17 = vld [vmem:[#allocation8 + $0x508] sm:$0xff]  ;;  %v3925_v27 = vld [vmem:[#allocation8 + $0x90] sm:$0xff] }
 0x2c7   :  { %6862 = vmatprep.subr.bf16.mxu0 %v6861_v58  ;;  %6890 = vmatpush3.bf16.msra.mxu1 %v6889_v8  ;;  %v4012_v23 = vld [vmem:[#allocation8 + $0x348] sm:$0xff]  ;;  %v4011_v4 = vld [vmem:[#allocation8 + $0x340] sm:$0xff] }
 0x2c8   :  { %6891 = vmatprep.subr.bf16.mxu1 %v7216_v54  ;;  %v3924_v42 = vld [vmem:[#allocation8 + $0x88] sm:$0xff] }
 0x2ca   :  { %6864 = vmatpush3.bf16.msra.mxu0 %v6863_v7 }
 0x2cb   :  { %6866 = vmatprep.subr.bf16.mxu0 %v6865_v16  ;;  %6893 = vmatpush3.bf16.msra.mxu1 %v6892_v28 }
 0x2cc   :  { %6894 = vmatprep.subr.bf16.mxu1 %v7216_v54 }
 0x2ce   :  { %6868 = vmatpush3.bf16.msra.mxu0 %v6867_v2  ;;  %v3981_v2 = vld [vmem:[#allocation8 + $0x250] sm:$0xff] }
 0x2cf   :  { %6870 = vmatprep.subr.bf16.mxu0 %v6869_v36  ;;  %6896 = vmatpush3.bf16.msra.mxu1 %v6895_v20  ;;  %v4010_v36 = vld [vmem:[#allocation8 + $0x338] sm:$0xff]  ;;  %v4097_v20 = vld [vmem:[#allocation8 + $0x5f0] sm:$0x1] }
 0x2d0   :  { %6897 = vmatprep.subr.bf16.mxu1 %v7216_v54 }
 0x2d2   :  { %6872 = vmatpush3.bf16.msra.mxu0 %v6871_v53  ;;  %v3954_v53 = vld [vmem:[#allocation8 + $0x178] sm:$0xff] }
 0x2d3   :  { %6874 = vmatprep.subr.bf16.mxu0 %v6873_v44  ;;  %6899 = vmatpush3.bf16.msra.mxu1 %v6898_v43  ;;  %v3983_v44 = vld [vmem:[#allocation8 + $0x260] sm:$0xff]  ;;  %v4041_v43 = vld [vmem:[#allocation8 + $0x430] sm:$0xff] }
 0x2d4   :  { %6900 = vmatprep.subr.bf16.mxu1 %v7216_v54 }
 0x2d6   :  { %6876 = vmatpush3.bf16.msra.mxu0 %v6875_v48 }
 0x2d7   :  { %6878 = vmatprep.subr.bf16.mxu0 %v6877_v62  ;;  %6903 = vmatpush3.bf16.msk.msra.mxu1 %vm7324_vm2, %v6901_v21  ;;  %v3953_v21 = vld [vmem:[#allocation8 + $0x170] sm:$0xff] }
 0x2da   :  { %6880 = vmatpush3.bf16.msra.mxu0 %v6879_v1  ;;  %5591 = vmatmul.mubr.msk.f32.vlgmr.msra.gmra.mrb[14].mxu1 %vm1514_vm3, %v8433_v59 }
 0x2db   :  { %6882 = vmatprep.subr.bf16.mxu0 %v6881_v46 }
 0x2de   :  { %6884 = vmatpush3.bf16.msra.mxu0 %v6883_v26  ;;  %v4040_v26 = vld [vmem:[#allocation8 + $0x428] sm:$0xff] }
 0x2e0   :  { %v2878_v54 = vpop.f32.mrb[8].mxu0 }
 0x2e1   :  { %3658 = vmatmul.mubr.f32.vlgmr.msra.gmra.mrb[14].mxu0 %v8435_v25  ;;  %v6920_v45 = vadd.f32 %v2878_v54, %v1436_v6  ;;  %v3020_v35 = vpop.f32.mrb[8].mxu1  ;;  %v2880_v59 = vpop.f32.mrb[9].mxu0  ;;  %v3926_v54 = vld [vmem:[#allocation8 + $0x98] sm:$0xff] }
 0x2e2   :  { %v6922_v52 = vadd.f32 %v3020_v35, %v1444_v34  ;;  %v6921_v58 = vadd.f32 %v2880_v59, %v1440_v14  ;;  %v3022_v9 = vpop.f32.mrb[9].mxu1  ;;  %v4069_v34 = vld [vmem:[#allocation8 + $0x510] sm:$0xff]  ;;  %v4098_v14 = vld [vmem:[#allocation8 + $0x5f8] sm:$0x1] }
 0x2e3   :  { %v5295_v38 = vmul.f32 -1.442695, %v6920_v45  ;;  %v6923_v10 = vadd.f32 %v3022_v9, %v1448_v55 }
 0x2e4   :  { %v5297_v8 = vmul.f32 -1.442695, %v6922_v52  ;;  %v5296_v61 = vmul.f32 -1.442695, %v6921_v58 }
 0x2e5   :  { %7037 = vpow2.f32 %v5295_v38  ;;  %v5298_v13 = vmul.f32 -1.442695, %v6923_v10 }
 0x2e6   :  { %7039 = vpow2.f32 %v5297_v8 }
 0x2e7   :  { %7041 = vpow2.f32 %v5296_v61  ;;  %v3955_v61 = vld [vmem:[#allocation8 + $0x180] sm:$0xff] }
 0x2e8   :  { %7043 = vpow2.f32 %v5298_v13  ;;  %v3984_v13 = vld [vmem:[#allocation8 + $0x268] sm:$0xff] }
 0x2ef   :  { %v7038_v32 = vpop.eup %7037 }
 0x2f0   :  { %v7040_v51 = vpop.eup %7039  ;;  %v3836_v7 = vadd.f32 1.0, %v7038_v32 }
 0x2f1   :  { %v7042_v16 = vpop.eup %7041  ;;  %v3838_v22 = vadd.f32 1.0, %v7040_v51 }
 0x2f2   :  { %v7044_v18 = vpop.eup %7043  ;;  %7045 = vrcp.f32 %v3836_v7  ;;  %v3837_v41 = vadd.f32 1.0, %v7042_v16  ;;  %v4013_v16 = vld [vmem:[#allocation8 + $0x350] sm:$0xff] }
 0x2f3   :  { %7047 = vrcp.f32 %v3838_v22  ;;  %v3839_v28 = vadd.f32 1.0, %v7044_v18  ;;  %v4042_v22 = vld [vmem:[#allocation8 + $0x438] sm:$0xff]  ;;  %v4071_v18 = vld [vmem:[#allocation8 + $0x520] sm:$0xff] }
 0x2f4   :  { %7049 = vrcp.f32 %v3837_v41 }
 0x2f5   :  { %7051 = vrcp.f32 %v3839_v28 }
 0x2fc   :  { %v7046_v57 = vpop.eup %7045 }
 0x2fd   :  { %v7048_v60 = vpop.eup %7047  ;;  %v4177_v0 = vrot.slane %v7046_v57, %v8436_v33 }
 0x2fe   :  { %v7050_v31 = vpop.eup %7049  ;;  %v4185_v49 = vrot.slane %v7048_v60, %v8436_v33 }
 0x2ff   :  { %v7052_v12 = vpop.eup %7051  ;;  %v4242_v30 = vmul.f32 %v4177_v0, %v3923_v5  ;;  %v4271_v63 = vmul.f32 %v4177_v0, %v3952_v29  ;;  %v4300_v48 = vmul.f32 %v4177_v0, %v3981_v2  ;;  %v4329_v62 = vmul.f32 %v4177_v0, %v4010_v36  ;;  %v5195_v2 = vld [vmem:[#allocation10 + $0x2f8] sm:$0x11]  ;;  %v4100_v36 = vld [vmem:[#allocation8 + $0x608] sm:$0x1] }
 0x300   :  { %v4358_v15 = vmul.f32 %v4177_v0, %v4039_v40  ;;  %v4387_v39 = vmul.f32 %v4177_v0, %v4068_v17  ;;  %v4416_v1 = vmul.f32 %v4177_v0, %v4097_v20  ;;  %v4244_v46 = vmul.f32 %v4185_v49, %v3925_v27 }
 0x301   :  { %v4273_v25 = vmul.f32 %v4185_v49, %v3954_v53  ;;  %v4302_v6 = vmul.f32 %v4185_v49, %v3983_v44  ;;  %v4181_v55 = vrot.slane %v7050_v31, %v8436_v33  ;;  %v4189_v45 = vrot.slane %v7052_v12, %v8436_v33 }
 0x302   :  { %v4331_v35 = vmul.f32 %v4185_v49, %v4012_v23  ;;  %v4360_v59 = vmul.f32 %v4185_v49, %v4041_v43  ;;  %v4389_v52 = vmul.f32 %v4185_v49, %v4070_v37  ;;  %v4418_v58 = vmul.f32 %v4185_v49, %v4099_v19 }
 0x303   :  { %v4243_v9 = vmul.f32 %v4181_v55, %v3924_v42  ;;  %v4272_v38 = vmul.f32 %v4181_v55, %v3953_v21  ;;  %v4301_v10 = vmul.f32 %v4181_v55, %v3982_v3  ;;  %v4330_v8 = vmul.f32 %v4181_v55, %v4011_v4  ;;  %v8440_v42 = vld [vmem:[#allocation15_spill] sm:$0xff]  ;;  %v8443_v3 = vld [vmem:[#allocation26_spill] sm:$0xff] }
 0x304   :  { %v4359_v32 = vmul.f32 %v4181_v55, %v4040_v26  ;;  %v4388_v51 = vmul.f32 %v4181_v55, %v4069_v34  ;;  %v4417_v7 = vmul.f32 %v4181_v55, %v4098_v14  ;;  %v4245_v41 = vmul.f32 %v4189_v45, %v3926_v54 }
 0x305   :  { %v5421_v28 = vpack.c.bf16 %v4243_v9, %v4242_v30  ;;  %v5436_v5 = vpack.c.bf16 %v4272_v38, %v4271_v63  ;;  %v5451_v57 = vpack.c.bf16 %v4301_v10, %v4300_v48  ;;  %v5466_v29 = vpack.c.bf16 %v4330_v8, %v4329_v62  ;;  %v5198_v48 = vld [vmem:[#allocation10 + $0x300] sm:$0x11] }
 0x306   :  { %v5481_v60 = vpack.c.bf16 %v4359_v32, %v4358_v15  ;;  %v5496_v40 = vpack.c.bf16 %v4388_v51, %v4387_v39  ;;  %v5511_v17 = vpack.c.bf16 %v4417_v7, %v4416_v1  ;;  %v4274_v20 = vmul.f32 %v4189_v45, %v3955_v61  ;;  %v8441_v15 = vld [vmem:[#allocation24_spill] sm:$0xff]  ;;  %v8442_v1 = vld [vmem:[#allocation25_spill] sm:$0xff]  ;;  %v3927_v51 = vld [vmem:[#allocation8 + $0xa0] sm:$0xff] }
 0x307   :  { %5082 = vst [vmem:[#allocation10 + $0x40] sm:$0xff] %v5421_v28  ;;  %5097 = vst [vmem:[#allocation10 + $0xb4] sm:$0xff] %v5436_v5  ;;  %v4303_v0 = vmul.f32 %v4189_v45, %v3984_v13  ;;  %v4332_v31 = vmul.f32 %v4189_v45, %v4013_v16  ;;  %v4361_v27 = vmul.f32 %v4189_v45, %v4042_v22  ;;  %v3956_v16 = vld [vmem:[#allocation8 + $0x188] sm:$0xff]  ;;  %v3985_v22 = vld [vmem:[#allocation8 + $0x270] sm:$0xff] }
 0x308   :  { %5112 = vst [vmem:[#allocation10 + $0x128] sm:$0xff] %v5451_v57  ;;  %5127 = vst [vmem:[#allocation10 + $0x19c] sm:$0xff] %v5466_v29  ;;  %v4390_v53 = vmul.f32 %v4189_v45, %v4071_v18  ;;  %v5196_v44 = vsel %vm7546_vm10, %v5511_v17, %v5195_v2  ;;  %v4419_v49 = vmul.f32 %v4189_v45, %v4100_v36  ;;  %v4014_v18 = vld [vmem:[#allocation8 + $0x358] sm:$0xff]  ;;  %v4043_v28 = vld [vmem:[#allocation8 + $0x440] sm:$0xff] }
 0x309   :  { %5142 = vst [vmem:[#allocation10 + $0x210] sm:$0xff] %v5481_v60  ;;  %5157 = vst [vmem:[#allocation10 + $0x284] sm:$0xff] %v5496_v40  ;;  %v5422_v12 = vpack.c.bf16 %v4245_v41, %v4244_v46  ;;  %v5437_v23 = vpack.c.bf16 %v4274_v20, %v4273_v25  ;;  %v5452_v43 = vpack.c.bf16 %v4303_v0, %v4302_v6  ;;  %v4072_v5 = vld [vmem:[#allocation8 + $0x528] sm:$0xff]  ;;  %v4101_v57 = vld [vmem:[#allocation8 + $0x610] sm:$0x1] }
 0x30a   :  { %5197 = vst [vmem:[#allocation10 + $0x2f8] sm:$0x11] %v5196_v44  ;;  %v5467_v37 = vpack.c.bf16 %v4332_v31, %v4331_v35  ;;  %v5482_v30 = vpack.c.bf16 %v4361_v27, %v4360_v59  ;;  %v5497_v63 = vpack.c.bf16 %v4390_v53, %v4389_v52  ;;  %v5512_v62 = vpack.c.bf16 %v4419_v49, %v4418_v58  ;;  %v3929_v36 = vld [vmem:[#allocation8 + $0xb0] sm:$0xff]  ;;  %v3958_v60 = vld [vmem:[#allocation8 + $0x198] sm:$0xff]  ;;  %v3987_v40 = vld [vmem:[#allocation8 + $0x280] sm:$0xff] }
 0x30b   :  { %5083 = vst [vmem:[#allocation10 + $0x48] sm:$0xff] %v5422_v12  ;;  %5098 = vst [vmem:[#allocation10 + $0xbc] sm:$0xff] %v5437_v23  ;;  %v1452_v21 = vrot.slane %v8223_v47, %v8440_v42  ;;  %v1460_v39 = vrot.slane %v8223_v47, %v8441_v15  ;;  %v1456_v46 = vrot.slane %v8223_v47, %v8442_v1  ;;  %v4016_v0 = vld [vmem:[#allocation8 + $0x368] sm:$0xff]  ;;  %v4045_v31 = vld [vmem:[#allocation8 + $0x450] sm:$0xff] }
 0x30c   :  { %5113 = vst [vmem:[#allocation10 + $0x130] sm:$0xff] %v5452_v43  ;;  %5128 = vst [vmem:[#allocation10 + $0x1a4] sm:$0xff] %v5467_v37  ;;  %v5199_v19 = vsel %vm7546_vm10, %v5512_v62, %v5198_v48  ;;  %v1464_v4 = vrot.slane %v8223_v47, %v8443_v3  ;;  %v4074_v27 = vld [vmem:[#allocation8 + $0x538] sm:$0xff]  ;;  %v4103_v23 = vld [vmem:[#allocation8 + $0x620] sm:$0x1] }
 0x30d   :  { %5143 = vst [vmem:[#allocation10 + $0x218] sm:$0xff] %v5482_v30  ;;  %5158 = vst [vmem:[#allocation10 + $0x28c] sm:$0xff] %v5497_v63  ;;  %v3928_v43 = vld [vmem:[#allocation8 + $0xa8] sm:$0xff]  ;;  %v3957_v37 = vld [vmem:[#allocation8 + $0x190] sm:$0xff] }
 0x30e   :  { %5200 = vst [vmem:[#allocation10 + $0x300] sm:$0x11] %v5199_v19  ;;  %v3986_v19 = vld [vmem:[#allocation8 + $0x278] sm:$0xff]  ;;  %v4044_v15 = vld [vmem:[#allocation8 + $0x448] sm:$0xff] }
 0x30f   :  { %v4102_v3 = vld [vmem:[#allocation8 + $0x618] sm:$0x1] }
 0x338   :  { %v3162_v26 = vpop.f32.mrb[10].mxu0 }
 0x339   :  { %v6924_v25 = vadd.f32 %v3162_v26, %v1452_v21  ;;  %v3304_v6 = vpop.f32.mrb[10].mxu1  ;;  %v3164_v34 = vpop.f32.mrb[11].mxu0  ;;  %v4015_v21 = vld [vmem:[#allocation8 + $0x360] sm:$0xff]  ;;  %v3930_v26 = vld [vmem:[#allocation8 + $0xb8] sm:$0xff] }
 0x33a   :  { %v6926_v14 = vadd.f32 %v3304_v6, %v1460_v39  ;;  %v6925_v55 = vadd.f32 %v3164_v34, %v1456_v46  ;;  %v3306_v54 = vpop.f32.mrb[11].mxu1  ;;  %v4073_v46 = vld [vmem:[#allocation8 + $0x530] sm:$0xff] }
 0x33b   :  { %v5299_v45 = vmul.f32 -1.442695, %v6924_v25  ;;  %v6927_v35 = vadd.f32 %v3306_v54, %v1464_v4 }
 0x33c   :  { %v5301_v59 = vmul.f32 -1.442695, %v6926_v14  ;;  %v5300_v52 = vmul.f32 -1.442695, %v6925_v55 }
 0x33d   :  { %7053 = vpow2.f32 %v5299_v45  ;;  %v5302_v58 = vmul.f32 -1.442695, %v6927_v35 }
 0x33e   :  { %7055 = vpow2.f32 %v5301_v59 }
 0x33f   :  { %7057 = vpow2.f32 %v5300_v52  ;;  %v3959_v52 = vld [vmem:[#allocation8 + $0x1a0] sm:$0xff] }
 0x340   :  { %7059 = vpow2.f32 %v5302_v58  ;;  %v3988_v58 = vld [vmem:[#allocation8 + $0x288] sm:$0xff] }
 0x347   :  { %v7054_v9 = vpop.eup %7053 }
 0x348   :  { %v7056_v38 = vpop.eup %7055  ;;  %v3840_v10 = vadd.f32 1.0, %v7054_v9 }
 0x349   :  { %v7058_v47 = vpop.eup %7057  ;;  %v3842_v8 = vadd.f32 1.0, %v7056_v38 }
 0x34a   :  { %v7060_v61 = vpop.eup %7059  ;;  %7061 = vrcp.f32 %v3840_v10  ;;  %v3841_v13 = vadd.f32 1.0, %v7058_v47  ;;  %v4017_v47 = vld [vmem:[#allocation8 + $0x370] sm:$0xff] }
 0x34b   :  { %7063 = vrcp.f32 %v3842_v8  ;;  %v3843_v32 = vadd.f32 1.0, %v7060_v61  ;;  %v4046_v8 = vld [vmem:[#allocation8 + $0x458] sm:$0xff]  ;;  %v4075_v61 = vld [vmem:[#allocation8 + $0x540] sm:$0xff] }
 0x34c   :  { %7065 = vrcp.f32 %v3841_v13 }
 0x34d   :  { %7067 = vrcp.f32 %v3843_v32 }
 0x354   :  { %v7062_v7 = vpop.eup %7061 }
 0x355   :  { %v7064_v41 = vpop.eup %7063  ;;  %v4193_v29 = vrot.slane %v7062_v7, %v8436_v33 }
 0x356   :  { %v7066_v2 = vpop.eup %7065  ;;  %v4201_v17 = vrot.slane %v7064_v41, %v8436_v33 }
 0x357   :  { %v7068_v20 = vpop.eup %7067  ;;  %v4246_v53 = vmul.f32 %v4193_v29, %v3927_v51  ;;  %v4275_v44 = vmul.f32 %v4193_v29, %v3956_v16  ;;  %v4304_v49 = vmul.f32 %v4193_v29, %v3985_v22  ;;  %v4333_v12 = vmul.f32 %v4193_v29, %v4014_v18  ;;  %v5201_v22 = vld [vmem:[#allocation10 + $0x308] sm:$0x11]  ;;  %v4104_v18 = vld [vmem:[#allocation8 + $0x628] sm:$0x1] }
 0x358   :  { %v4362_v30 = vmul.f32 %v4193_v29, %v4043_v28  ;;  %v4391_v63 = vmul.f32 %v4193_v29, %v4072_v5  ;;  %v4420_v48 = vmul.f32 %v4193_v29, %v4101_v57  ;;  %v4248_v62 = vmul.f32 %v4201_v17, %v3929_v36 }
 0x359   :  { %v4277_v39 = vmul.f32 %v4201_v17, %v3958_v60  ;;  %v4306_v1 = vmul.f32 %v4201_v17, %v3987_v40  ;;  %v4197_v4 = vrot.slane %v7066_v2, %v8436_v33  ;;  %v4205_v25 = vrot.slane %v7068_v20, %v8436_v33 }
 0x35a   :  { %v4335_v6 = vmul.f32 %v4201_v17, %v4016_v0  ;;  %v4364_v34 = vmul.f32 %v4201_v17, %v4045_v31  ;;  %v4393_v14 = vmul.f32 %v4201_v17, %v4074_v27  ;;  %v4422_v55 = vmul.f32 %v4201_v17, %v4103_v23 }
 0x35b   :  { %v4247_v54 = vmul.f32 %v4197_v4, %v3928_v43  ;;  %v4276_v45 = vmul.f32 %v4197_v4, %v3957_v37  ;;  %v4305_v35 = vmul.f32 %v4197_v4, %v3986_v19  ;;  %v4334_v59 = vmul.f32 %v4197_v4, %v4015_v21  ;;  %v8258_v43 = vld [vmem:[#allocation7 + $0x18] sm:$0x1f] }
 0x35c   :  { %v4363_v9 = vmul.f32 %v4197_v4, %v4044_v15  ;;  %v4392_v38 = vmul.f32 %v4197_v4, %v4073_v46  ;;  %v4421_v10 = vmul.f32 %v4197_v4, %v4102_v3  ;;  %v4249_v13 = vmul.f32 %v4205_v25, %v3930_v26 }
 0x35d   :  { %v5423_v32 = vpack.c.bf16 %v4247_v54, %v4246_v53  ;;  %v5438_v51 = vpack.c.bf16 %v4276_v45, %v4275_v44  ;;  %v5453_v7 = vpack.c.bf16 %v4305_v35, %v4304_v49  ;;  %v5468_v16 = vpack.c.bf16 %v4334_v59, %v4333_v12  ;;  %v5204_v49 = vld [vmem:[#allocation10 + $0x310] sm:$0x11] }
 0x35e   :  { %v5483_v41 = vpack.c.bf16 %v4363_v9, %v4362_v30  ;;  %v5498_v28 = vpack.c.bf16 %v4392_v38, %v4391_v63  ;;  %v5513_v5 = vpack.c.bf16 %v4421_v10, %v4420_v48  ;;  %v4278_v57 = vmul.f32 %v4205_v25, %v3959_v52  ;;  %v3931_v52 = vld [vmem:[#allocation8 + $0xc0] sm:$0xff]  ;;  %v3960_v9 = vld [vmem:[#allocation8 + $0x1a8] sm:$0xff]  ;;  %v3989_v38 = vld [vmem:[#allocation8 + $0x290] sm:$0xff] }
 0x35f   :  { %5084 = vst [vmem:[#allocation10 + $0x50] sm:$0xff] %v5423_v32  ;;  %5099 = vst [vmem:[#allocation10 + $0xc4] sm:$0xff] %v5438_v51  ;;  %v4307_v29 = vmul.f32 %v4205_v25, %v3988_v58  ;;  %v4336_v2 = vmul.f32 %v4205_v25, %v4017_v47  ;;  %v4365_v36 = vmul.f32 %v4205_v25, %v4046_v8  ;;  %v4018_v10 = vld [vmem:[#allocation8 + $0x378] sm:$0xff]  ;;  %v4047_v8 = vld [vmem:[#allocation8 + $0x460] sm:$0xff] }
 0x360   :  { %5114 = vst [vmem:[#allocation10 + $0x138] sm:$0xff] %v5453_v7  ;;  %5129 = vst [vmem:[#allocation10 + $0x1ac] sm:$0xff] %v5468_v16  ;;  %v4394_v60 = vmul.f32 %v4205_v25, %v4075_v61  ;;  %v5202_v40 = vsel %vm7546_vm10, %v5513_v5, %v5201_v22  ;;  %v4423_v17 = vmul.f32 %v4205_v25, %v4104_v18  ;;  %v4076_v61 = vld [vmem:[#allocation8 + $0x548] sm:$0xff]  ;;  %v3933_v7 = vld [vmem:[#allocation8 + $0xd0] sm:$0xff] }
 0x361   :  { %5144 = vst [vmem:[#allocation10 + $0x220] sm:$0xff] %v5483_v41  ;;  %5159 = vst [vmem:[#allocation10 + $0x294] sm:$0xff] %v5498_v28  ;;  %v5424_v20 = vpack.c.bf16 %v4249_v13, %v4248_v62  ;;  %v5439_v0 = vpack.c.bf16 %v4278_v57, %v4277_v39  ;;  %v5454_v31 = vpack.c.bf16 %v4307_v29, %v4306_v1  ;;  %v4105_v13 = vld [vmem:[#allocation8 + $0x630] sm:$0x1]  ;;  %v3962_v16 = vld [vmem:[#allocation8 + $0x1b8] sm:$0xff] }
 0x362   :  { %5203 = vst [vmem:[#allocation10 + $0x308] sm:$0x11] %v5202_v40  ;;  %v5469_v27 = vpack.c.bf16 %v4336_v2, %v4335_v6  ;;  %v5484_v53 = vpack.c.bf16 %v4365_v36, %v4364_v34  ;;  %v5499_v44 = vpack.c.bf16 %v4394_v60, %v4393_v14  ;;  %v5514_v12 = vpack.c.bf16 %v4423_v17, %v4422_v55  ;;  %v3991_v22 = vld [vmem:[#allocation8 + $0x2a0] sm:$0xff]  ;;  %v4020_v5 = vld [vmem:[#allocation8 + $0x388] sm:$0xff]  ;;  %v4049_v57 = vld [vmem:[#allocation8 + $0x470] sm:$0xff] }
 0x363   :  { %5085 = vst [vmem:[#allocation10 + $0x58] sm:$0xff] %v5424_v20  ;;  %5100 = vst [vmem:[#allocation10 + $0xcc] sm:$0xff] %v5439_v0  ;;  %v1468_v37 = vrot.slane %v8258_v43, %v8436_v33  ;;  %v1476_v30 = vrot.slane %v8258_v43, %v8437_v50  ;;  %v1472_v63 = vrot.slane %v8258_v43, %v8438_v11  ;;  %v4078_v29 = vld [vmem:[#allocation8 + $0x558] sm:$0xff]  ;;  %v4107_v20 = vld [vmem:[#allocation8 + $0x640] sm:$0x1] }
 0x364   :  { %5115 = vst [vmem:[#allocation10 + $0x140] sm:$0xff] %v5454_v31  ;;  %5130 = vst [vmem:[#allocation10 + $0x1b4] sm:$0xff] %v5469_v27  ;;  %v5205_v23 = vsel %vm7546_vm10, %v5514_v12, %v5204_v49  ;;  %v1480_v48 = vrot.slane %v8258_v43, %v8439_v56  ;;  %v1484_v2 = vrot.slane %v8258_v43, %v8440_v42  ;;  %v3932_v0 = vld [vmem:[#allocation8 + $0xc8] sm:$0xff]  ;;  %v3961_v31 = vld [vmem:[#allocation8 + $0x1b0] sm:$0xff] }
 0x365   :  { %5145 = vst [vmem:[#allocation10 + $0x228] sm:$0xff] %v5484_v53  ;;  %5160 = vst [vmem:[#allocation10 + $0x29c] sm:$0xff] %v5499_v44  ;;  %v3993_v42 = vld [vmem:[#allocation8 + $0x2b0] sm:$0xff]  ;;  %v4022_v43 = vld [vmem:[#allocation8 + $0x398] sm:$0xff] }
 0x366   :  { %5206 = vst [vmem:[#allocation10 + $0x310] sm:$0x11] %v5205_v23  ;;  %v3990_v23 = vld [vmem:[#allocation8 + $0x298] sm:$0xff] }
 0x394   :  { %v3446_v62 = vpop.f32.mrb[12].mxu0 }
 0x395   :  { %v6928_v19 = vadd.f32 %v3446_v62, %v1468_v37  ;;  %v3588_v21 = vpop.f32.mrb[12].mxu1  ;;  %v3448_v15 = vpop.f32.mrb[13].mxu0  ;;  %v4019_v37 = vld [vmem:[#allocation8 + $0x380] sm:$0xff] }
 0x396   :  { %v6930_v39 = vadd.f32 %v3588_v21, %v1476_v30  ;;  %v6929_v1 = vadd.f32 %v3448_v15, %v1472_v63  ;;  %v3590_v46 = vpop.f32.mrb[13].mxu1  ;;  %v4048_v30 = vld [vmem:[#allocation8 + $0x468] sm:$0xff]  ;;  %v4106_v21 = vld [vmem:[#allocation8 + $0x638] sm:$0x1] }
 0x397   :  { %v5303_v3 = vmul.f32 -1.442695, %v6928_v19  ;;  %v6931_v4 = vadd.f32 %v3590_v46, %v1480_v48  ;;  %v4077_v19 = vld [vmem:[#allocation8 + $0x550] sm:$0xff] }
 0x398   :  { %v5305_v26 = vmul.f32 -1.442695, %v6930_v39  ;;  %v5304_v25 = vmul.f32 -1.442695, %v6929_v1  ;;  %v3934_v39 = vld [vmem:[#allocation8 + $0xd8] sm:$0xff] }
 0x399   :  { %7069 = vpow2.f32 %v5303_v3  ;;  %v5306_v6 = vmul.f32 -1.442695, %v6931_v4 }
 0x39a   :  { %7071 = vpow2.f32 %v5305_v26 }
 0x39b   :  { %7073 = vpow2.f32 %v5304_v25 }
 0x39c   :  { %7075 = vpow2.f32 %v5306_v6 }
 0x3a3   :  { %v7070_v50 = vpop.eup %7069 }
 0x3a4   :  { %v7072_v11 = vpop.eup %7071  ;;  %v3844_v34 = vadd.f32 1.0, %v7070_v50 }
 0x3a5   :  { %v7074_v56 = vpop.eup %7073  ;;  %v3846_v14 = vadd.f32 1.0, %v7072_v11 }
 0x3a6   :  { %v7076_v55 = vpop.eup %7075  ;;  %7077 = vrcp.f32 %v3844_v34  ;;  %v3845_v54 = vadd.f32 1.0, %v7074_v56  ;;  %v3963_v34 = vld [vmem:[#allocation8 + $0x1c0] sm:$0xff]  ;;  %v3992_v56 = vld [vmem:[#allocation8 + $0x2a8] sm:$0xff] }
 0x3a7   :  { %7079 = vrcp.f32 %v3846_v14  ;;  %v3847_v45 = vadd.f32 1.0, %v7076_v55 }
 0x3a8   :  { %7081 = vrcp.f32 %v3845_v54 }
 0x3a9   :  { %7083 = vrcp.f32 %v3847_v45  ;;  %v4021_v45 = vld [vmem:[#allocation8 + $0x390] sm:$0xff] }
 0x3ad   :  { %v8268_v35 = vpop.f32.mrb[14].mxu1 }
 0x3ae   :  { %v5592_v59 = vpop.f32.mrb[15].mxu1 }
 0x3af   :  { %v4050_v59 = vld [vmem:[#allocation8 + $0x478] sm:$0xff] }
 0x3b0   :  { %v7078_v58 = vpop.eup %7077 }
 0x3b1   :  { %v7080_v47 = vpop.eup %7079  ;;  %v4209_v32 = vrot.slane %v7078_v58, %v8436_v33 }
 0x3b2   :  { %v7082_v51 = vpop.eup %7081  ;;  %v4217_v18 = vrot.slane %v7080_v47, %v8436_v33 }
 0x3b3   :  { %v7084_v41 = vpop.eup %7083  ;;  %v4250_v28 = vmul.f32 %v4209_v32, %v3931_v52  ;;  %v4279_v36 = vmul.f32 %v4209_v32, %v3960_v9  ;;  %v4308_v60 = vmul.f32 %v4209_v32, %v3989_v38  ;;  %v4337_v40 = vmul.f32 %v4209_v32, %v4018_v10  ;;  %v4079_v52 = vld [vmem:[#allocation8 + $0x560] sm:$0xff] }
 0x3b4   :  { %v4366_v17 = vmul.f32 %v4209_v32, %v4047_v8  ;;  %v5550_v27 = vpop.f32.mrb[14].mxu0  ;;  %v4395_v53 = vmul.f32 %v4209_v32, %v4076_v61  ;;  %v4424_v44 = vmul.f32 %v4209_v32, %v4105_v13  ;;  %v4252_v49 = vmul.f32 %v4217_v18, %v3933_v7  ;;  %v5207_v8 = vld [vmem:[#allocation10 + $0x318] sm:$0x11]  ;;  %v4108_v61 = vld [vmem:[#allocation8 + $0x648] sm:$0x1] }
 0x3b5   :  { %v4281_v12 = vmul.f32 %v4217_v18, %v3962_v16  ;;  %v5551_v63 = vpop.f32.mrb[15].mxu0  ;;  %v4310_v48 = vmul.f32 %v4217_v18, %v3991_v22  ;;  %v4339_v62 = vmul.f32 %v4217_v18, %v4020_v5  ;;  %v4213_v15 = vrot.slane %v7082_v51, %v8436_v33 }
 0x3b6   :  { %v4221_v1 = vrot.slane %v7084_v41, %v8436_v33  ;;  %v4368_v46 = vmul.f32 %v4217_v18, %v4049_v57  ;;  %v4397_v3 = vmul.f32 %v4217_v18, %v4078_v29  ;;  %v4426_v4 = vmul.f32 %v4217_v18, %v4107_v20  ;;  %v5210_v20 = vld [vmem:[#allocation10 + $0x320] sm:$0x11] }
 0x3b7   :  { %v5552_v26 = vadd.f32 %v5551_v63, %v5550_v27  ;;  %v4251_v25 = vmul.f32 %v4213_v15, %v3932_v0  ;;  %v4280_v6 = vmul.f32 %v4213_v15, %v3961_v31  ;;  %v4309_v50 = vmul.f32 %v4213_v15, %v3990_v23  ;;  %v3935_v23 = vld [vmem:[#allocation8 + $0xe0] sm:$0xff]  ;;  %v4080_v63 = vld [vmem:[#allocation8 + $0x568] sm:$0xff] }
 0x3b8   :  { %v4338_v11 = vmul.f32 %v4213_v15, %v4019_v37  ;;  %v4367_v14 = vmul.f32 %v4213_v15, %v4048_v30  ;;  %v4396_v55 = vmul.f32 %v4213_v15, %v4077_v19  ;;  %v4425_v54 = vmul.f32 %v4213_v15, %v4106_v21  ;;  %v3964_v30 = vld [vmem:[#allocation8 + $0x1c8] sm:$0xff] }
 0x3b9   :  { %v4253_v58 = vmul.f32 %v4221_v1, %v3934_v39  ;;  %v5425_v9 = vpack.c.bf16 %v4251_v25, %v4250_v28  ;;  %v5440_v38 = vpack.c.bf16 %v4280_v6, %v4279_v36  ;;  %v5455_v10 = vpack.c.bf16 %v4309_v50, %v4308_v60  ;;  %v5213_v25 = vld [vmem:[#allocation10 + $0x328] sm:$0x1] }
 0x3ba   :  { %v5470_v47 = vpack.c.bf16 %v4338_v11, %v4337_v40  ;;  %v5485_v13 = vpack.c.bf16 %v4367_v14, %v4366_v17  ;;  %v5500_v32 = vpack.c.bf16 %v4396_v55, %v4395_v53  ;;  %v5515_v51 = vpack.c.bf16 %v4425_v54, %v4424_v44 }
 0x3bb   :  { %v4282_v7 = vmul.f32 %v4221_v1, %v3963_v34  ;;  %5086 = vst [vmem:[#allocation10 + $0x60] sm:$0xff] %v5425_v9  ;;  %5101 = vst [vmem:[#allocation10 + $0xd4] sm:$0xff] %v5440_v38  ;;  %v4311_v16 = vmul.f32 %v4221_v1, %v3992_v56  ;;  %v4340_v22 = vmul.f32 %v4221_v1, %v4021_v45 }
 0x3bc   :  { %5116 = vst [vmem:[#allocation10 + $0x148] sm:$0xff] %v5455_v10  ;;  %5131 = vst [vmem:[#allocation10 + $0x1bc] sm:$0xff] %v5470_v47  ;;  %v4369_v18 = vmul.f32 %v4221_v1, %v4050_v59  ;;  %v4398_v41 = vmul.f32 %v4221_v1, %v4079_v52  ;;  %v5208_v28 = vsel %vm7546_vm10, %v5515_v51, %v5207_v8 }
 0x3bd   :  { %5146 = vst [vmem:[#allocation10 + $0x230] sm:$0xff] %v5485_v13  ;;  %5161 = vst [vmem:[#allocation10 + $0x2a4] sm:$0xff] %v5500_v32  ;;  %v4427_v5 = vmul.f32 %v4221_v1, %v4108_v61  ;;  %v5426_v57 = vpack.c.bf16 %v4253_v58, %v4252_v49  ;;  %v5441_v29 = vpack.c.bf16 %v4282_v7, %v4281_v12 }
 0x3be   :  { %5209 = vst [vmem:[#allocation10 + $0x318] sm:$0x11] %v5208_v28  ;;  %v5456_v36 = vpack.c.bf16 %v4311_v16, %v4310_v48  ;;  %v5471_v60 = vpack.c.bf16 %v4340_v22, %v4339_v62  ;;  %v5486_v40 = vpack.c.bf16 %v4369_v18, %v4368_v46  ;;  %v5501_v17 = vpack.c.bf16 %v4398_v41, %v4397_v3  ;;  %v4109_v48 = vld [vmem:[#allocation8 + $0x650] sm:$0x1] }
 0x3bf   :  { %v5516_v0 = vpack.c.bf16 %v4427_v5, %v4426_v4  ;;  %5087 = vst [vmem:[#allocation10 + $0x68] sm:$0xff] %v5426_v57  ;;  %5102 = vst [vmem:[#allocation10 + $0xdc] sm:$0xff] %v5441_v29  ;;  %v3660_v31 = vadd.f32 %v5552_v26, %v1484_v2  ;;  %v4051_v2 = vld [vmem:[#allocation8 + $0x480] sm:$0xff] }
 0x3c0   :  { %5117 = vst [vmem:[#allocation10 + $0x150] sm:$0xff] %v5456_v36  ;;  %5132 = vst [vmem:[#allocation10 + $0x1c4] sm:$0xff] %v5471_v60 }
 0x3c1   :  { %5147 = vst [vmem:[#allocation10 + $0x238] sm:$0xff] %v5486_v40  ;;  %5162 = vst [vmem:[#allocation10 + $0x2ac] sm:$0xff] %v5501_v17  ;;  %v5211_v27 = vsel %vm7546_vm10, %v5516_v0, %v5210_v20  ;;  %v3730_v53 = vadd.f32 %v8268_v35, %v3660_v31 }
 0x3c2   :  { %5212 = vst [vmem:[#allocation10 + $0x320] sm:$0x11] %v5211_v27 }
 0x3c3   :  { %v5307_v44 = vmul.f32 -1.442695, %v3730_v53 }
 0x3c5   :  { %7085 = vpow2.f32 %v5307_v44 }
 0x3cf   :  { %v7086_v49 = vpop.eup %7085 }
 0x3d0   :  { %v3848_v12 = vadd.f32 1.0, %v7086_v49 }
 0x3d2   :  { %7087 = vrcp.f32 %v3848_v12 }
 0x3dc   :  { %v7088_v37 = vpop.eup %7087 }
 0x3dd   :  { %v4225_v62 = vrot.slane %v7088_v37, %v8436_v33 }
 0x3df   :  { %v4254_v24 = vmul.f32 %v4225_v62, %v3935_v23  ;;  %v4283_v19 = vmul.f32 %v4225_v62, %v3964_v30  ;;  %v4312_v21 = vmul.f32 %v4225_v62, %v3993_v42  ;;  %v4341_v35 = vmul.f32 %v4225_v62, %v4022_v43 }
 0x3e0   :  { %v4370_v15 = vmul.f32 %v4225_v62, %v4051_v2  ;;  %v4399_v39 = vmul.f32 %v4225_v62, %v4080_v63  ;;  %v4428_v1 = vmul.f32 %v4225_v62, %v4109_v48 }
 0x3e1   :  { %v5427_v46 = vpack.c.bf16 %v4254_v24, %v4254_v24  ;;  %v5442_v3 = vpack.c.bf16 %v4283_v19, %v4283_v19  ;;  %v5457_v4 = vpack.c.bf16 %v4312_v21, %v4312_v21  ;;  %v5472_v26 = vpack.c.bf16 %v4341_v35, %v4341_v35 }
 0x3e2   :  { %v5487_v6 = vpack.c.bf16 %v4370_v15, %v4370_v15  ;;  %v5502_v50 = vpack.c.bf16 %v4399_v39, %v4399_v39  ;;  %v5517_v11 = vpack.c.bf16 %v4428_v1, %v4428_v1 }
 0x3e3   :  { %5088 = vst [vmem:[#allocation10 + $0x70] sm:$0xf] %v5427_v46  ;;  %5103 = vst [vmem:[#allocation10 + $0xe4] sm:$0xf] %v5442_v3 }
 0x3e4   :  { %5118 = vst [vmem:[#allocation10 + $0x158] sm:$0xf] %v5457_v4  ;;  %5133 = vst [vmem:[#allocation10 + $0x1cc] sm:$0xf] %v5472_v26  ;;  %v5214_v34 = vsel %vm7517_vm8, %v5517_v11, %v5213_v25 }
 0x3e5   :  { %5148 = vst [vmem:[#allocation10 + $0x240] sm:$0xf] %v5487_v6  ;;  %5163 = vst [vmem:[#allocation10 + $0x2b4] sm:$0xf] %v5502_v50 }
 0x3e6   :  { %5215 = vst [vmem:[#allocation10 + $0x328] sm:$0x1] %v5214_v34 }
 0x3e7   :  { %7189 = shalt.err (!%p7186_p8)
}
 0x3e8   :  { %s7190_s15 = scalar_lea.hbm %s8303_s4, 12992 }
 0x3e9   :  { %p7191_p9 = scmp.ne.s32.totalorder %s8303_s4, %s7190_s15  ;;  %p7194_p10 = scmp.lt.u32.totalorder %s7190_s15, %s8303_s4 }
 0x3eb   :  { %p7196_p11 = pnand %p7194_p10, %p7191_p9 }
 0x3ed   :  { %7199 = shalt.err (!%p7196_p11)
}
 0x3ee   :  { %s7219_s20 = smov 1856   ;;  %s7220_s21 = smov 116  }
 0x3ef   :  { %5227 = dma.vmem_to_hbm [thread:$0]  %s5222_s25, 12992, %s8303_s4, [#allocation4], %s7219_s20, %s7219_s20, %s7220_s21  }
 0x3f0   :  { %7206 = dma.done.wait [#allocation4], 12992  }
 0x3f1   :  { %7207 = vsyncadd [#allocation4], 4294954304 }
 0x3f2   :  { %5231 = vsyncpa [#allocation3], 1 }
 0x3f3   :  { %5232 = vsyncpa [#allocation6], 1 }
 0x3f4   :  { %5233 = vsyncpa [#allocation9], 1 }
 0x3f5   :  { %5234 = vsyncpa [#allocation4], 1 }

</bundles_post_ra>
